<compile_context>
chip_gen: v7x
topology: tpu7x:2x2x1
jax: 0.10.0
libtpu: 0.0.40
codegen_flags: <defaults>
</compile_context>

<pallas_src>
import jax
import jax.numpy as jnp
from jax.experimental import pallas as pl
from jax.experimental.pallas import tpu as pltpu

IN_DIM = 28 * 28      # 784
IN_PAD = 896          # 784 rounded up to a lane multiple (7 * 128)
HID = 512             # hidden1 = hidden2 = hidden3 = 512
OUT_DIM = 10
OUT_PAD = 128         # lane-dense output; sliced back to 10 outside the kernel


def _round_up(x, m):
    return (x + m - 1) // m * m


# ----------------------------------------------------------------------------
# Pallas kernel: fused 4-layer MLP on one M tile (all weights VMEM-resident)
# ----------------------------------------------------------------------------
def _mlp_kernel(x_ref, w1_ref, b1_ref, w2_ref, b2_ref, w3_ref, b3_ref,
                w4_ref, b4_ref, o_ref):
    h = jnp.dot(x_ref[...], w1_ref[...], preferred_element_type=jnp.float32)
    h = jnp.maximum(h + b1_ref[...], 0.0)                       # layer1 + ReLU
    h = jnp.dot(h, w2_ref[...], preferred_element_type=jnp.float32)
    h = jnp.maximum(h + b2_ref[...], 0.0)                       # layer2 + ReLU
    h = jnp.dot(h, w3_ref[...], preferred_element_type=jnp.float32)
    h = jnp.maximum(h + b3_ref[...], 0.0)                       # layer3 + ReLU
    h = jnp.dot(h, w4_ref[...], preferred_element_type=jnp.float32)
    o_ref[...] = (h + b4_ref[...]).astype(o_ref.dtype)          # layer4 (no ReLU)


# ----------------------------------------------------------------------------
# Wrapper
# ----------------------------------------------------------------------------
def small_mlp_forward(params, x):
    """x: any shape with N*1*28*28 elements (PyTorch `x.view(-1, 784)`)."""
    x2 = x.reshape(-1, IN_DIM).astype(jnp.float32)
    n = x2.shape[0]

    # Pad batch to a sublane multiple (8) and features 784 -> 896 (lane
    # multiple).  w1's padded rows are zero, so results are unchanged.
    tm = 128
    mp = _round_up(max(n, 8), 8)
    if mp > tm:
        mp = _round_up(mp, tm)
    else:
        tm = mp
    xp = jnp.pad(x2, ((0, mp - n), (0, IN_PAD - IN_DIM)))

    full = lambda i: (0, 0)   # weights / biases: same block for every M tile

    out = pl.pallas_call(
        _mlp_kernel,
        out_shape=jax.ShapeDtypeStruct((mp, OUT_PAD), jnp.float32),
        grid=(mp // tm,),
        in_specs=[
            pl.BlockSpec((tm, IN_PAD), lambda i: (i, 0)),   # x tile
            pl.BlockSpec((IN_PAD, HID), full),              # w1 (pre-transposed)
            pl.BlockSpec((1, HID), full),                   # b1
            pl.BlockSpec((HID, HID), full),                 # w2
            pl.BlockSpec((1, HID), full),                   # b2
            pl.BlockSpec((HID, HID), full),                 # w3
            pl.BlockSpec((1, HID), full),                   # b3
            pl.BlockSpec((HID, OUT_PAD), full),             # w4 (padded to 128 cols)
            pl.BlockSpec((1, OUT_PAD), full),               # b4
        ],
        out_specs=pl.BlockSpec((tm, OUT_PAD), lambda i: (i, 0)),
        compiler_params=pltpu.CompilerParams(
            dimension_semantics=("parallel",),
        ),
    )(xp, params["w1"], params["b1"], params["w2"], params["b2"],
      params["w3"], params["b3"], params["w4"], params["b4"])

    return out[:n, :OUT_DIM]


# ----------------------------------------------------------------------------
# Parameters: PyTorch nn.Linear default init, pre-packed for the kernel
# (pre-transposed (in, out); w1 zero-padded 784->896 rows; w4/b4 zero-padded
# 10->128 output columns).
# ----------------------------------------------------------------------------
def init_params(key):
    ks = jax.random.split(key, 8)

    def linear(kw, kb, fan_in, fan_out):
        bound = 1.0 / fan_in ** 0.5
        w = jax.random.uniform(kw, (fan_in, fan_out), jnp.float32, -bound, bound)
        b = jax.random.uniform(kb, (fan_out,), jnp.float32, -bound, bound)
        return w, b

    w1, b1 = linear(ks[0], ks[1], IN_DIM, HID)
    w2, b2 = linear(ks[2], ks[3], HID, HID)
    w3, b3 = linear(ks[4], ks[5], HID, HID)
    w4, b4 = linear(ks[6], ks[7], HID, OUT_DIM)

    return {
        "w1": jnp.pad(w1, ((0, IN_PAD - IN_DIM), (0, 0))),
        "b1": b1.reshape(1, HID),
        "w2": w2,
        "b2": b2.reshape(1, HID),
        "w3": w3,
        "b3": b3.reshape(1, HID),
        "w4": jnp.pad(w4, ((0, 0), (0, OUT_PAD - OUT_DIM))),
        "b4": jnp.pad(b4, (0, OUT_PAD - OUT_DIM)).reshape(1, OUT_PAD),
    }


# ----------------------------------------------------------------------------
# Pure-JAX reference (same math as the PyTorch module) for a sanity check
# ----------------------------------------------------------------------------
def _reference_forward(params, x):
    h = x.reshape(-1, IN_DIM).astype(jnp.float32)
    h = jnp.maximum(h @ params["w1"][:IN_DIM] + params["b1"][0], 0.0)
    h = jnp.maximum(h @ params["w2"] + params["b2"][0], 0.0)
    h = jnp.maximum(h @ params["w3"] + params["b3"][0], 0.0)
    return h @ params["w4"][:, :OUT_DIM] + params["b4"][0, :OUT_DIM]


if __name__ == "__main__":
    key = jax.random.PRNGKey(0)
    pkey, xkey = jax.random.split(key)
    params = init_params(pkey)

    # KMNIST-sized input, batch = 2 (PyTorch forward does x.view(-1, 784))
    x = jax.random.normal(xkey, (2, 1, 28, 28), jnp.float32)

    out = jax.jit(small_mlp_forward)(params, x)
    out = jax.block_until_ready(out)

    assert out.shape == (2, 10), out.shape
    assert out.dtype == jnp.float32
    assert bool(jnp.all(jnp.isfinite(out)))

    ref = _reference_forward(params, x)
    assert bool(jnp.allclose(out, ref, rtol=5e-2, atol=5e-2))

    print("KERNEL_OK")
</pallas_src>

<mosaic_0001>
module attributes {stable_mosaic.version = 11 : i64} {
  func.func @_mlp_kernel(%arg0: i32, %arg1: memref<8x896xf32, #tpu.memory_space<vmem>>, %arg2: memref<896x512xf32, #tpu.memory_space<vmem>>, %arg3: memref<1x512xf32, #tpu.memory_space<vmem>>, %arg4: memref<512x512xf32, #tpu.memory_space<vmem>>, %arg5: memref<1x512xf32, #tpu.memory_space<vmem>>, %arg6: memref<512x512xf32, #tpu.memory_space<vmem>>, %arg7: memref<1x512xf32, #tpu.memory_space<vmem>>, %arg8: memref<512x128xf32, #tpu.memory_space<vmem>>, %arg9: memref<1x128xf32, #tpu.memory_space<vmem>>, %arg10: memref<8x128xf32, #tpu.memory_space<vmem>>) attributes {dimension_semantics = [#tpu.dimension_semantics<parallel>], iteration_bounds = array<i64: 1>, scalar_prefetch = 0 : i64, scratch_operands = 0 : i64, tpu.core_type = #tpu.core_type<tc>, window_params = [{transform_indices = @transform_0, window_bounds = array<i64: 8, 896>}, {pipeline_mode = #tpu.pipeline_mode<synchronous>, transform_indices = @transform_1, window_bounds = array<i64: 896, 512>}, {pipeline_mode = #tpu.pipeline_mode<synchronous>, transform_indices = @transform_2, window_bounds = array<i64: 1, 512>}, {pipeline_mode = #tpu.pipeline_mode<synchronous>, transform_indices = @transform_3, window_bounds = array<i64: 512, 512>}, {pipeline_mode = #tpu.pipeline_mode<synchronous>, transform_indices = @transform_4, window_bounds = array<i64: 1, 512>}, {pipeline_mode = #tpu.pipeline_mode<synchronous>, transform_indices = @transform_5, window_bounds = array<i64: 512, 512>}, {pipeline_mode = #tpu.pipeline_mode<synchronous>, transform_indices = @transform_6, window_bounds = array<i64: 1, 512>}, {pipeline_mode = #tpu.pipeline_mode<synchronous>, transform_indices = @transform_7, window_bounds = array<i64: 512, 128>}, {pipeline_mode = #tpu.pipeline_mode<synchronous>, transform_indices = @transform_8, window_bounds = array<i64: 1, 128>}, {transform_indices = @transform_9, window_bounds = array<i64: 8, 128>}]} {
    %c0 = arith.constant 0 : index
    %c0_0 = arith.constant 0 : index
    %0 = vector.load %arg1[%c0, %c0_0] : memref<8x896xf32, #tpu.memory_space<vmem>>, vector<8x896xf32>
    %c0_1 = arith.constant 0 : index
    %c0_2 = arith.constant 0 : index
    %1 = vector.load %arg2[%c0_1, %c0_2] : memref<896x512xf32, #tpu.memory_space<vmem>>, vector<896x512xf32>
    %cst = arith.constant dense<0.000000e+00> : vector<8x512xf32>
    %2 = tpu.matmul %0, %1, %cst {dimension_numbers = #tpu.dot_dimension_numbers<[1], [0], [0], [1], [0, 0, 1, 1], [], []>} : vector<8x896xf32>, vector<896x512xf32>, vector<8x512xf32> -> vector<8x512xf32>
    %c0_3 = arith.constant 0 : index
    %c0_4 = arith.constant 0 : index
    %3 = vector.load %arg3[%c0_3, %c0_4] : memref<1x512xf32, #tpu.memory_space<vmem>>, vector<1x512xf32>
    %4 = vector.broadcast %3 : vector<1x512xf32> to vector<8x512xf32>
    %5 = arith.addf %2, %4 : vector<8x512xf32>
    %cst_5 = arith.constant 0.000000e+00 : f32
    %6 = vector.broadcast %cst_5 : f32 to vector<8x512xf32>
    %7 = arith.maximumf %5, %6 : vector<8x512xf32>
    %c0_6 = arith.constant 0 : index
    %c0_7 = arith.constant 0 : index
    %8 = vector.load %arg4[%c0_6, %c0_7] : memref<512x512xf32, #tpu.memory_space<vmem>>, vector<512x512xf32>
    %cst_8 = arith.constant dense<0.000000e+00> : vector<8x512xf32>
    %9 = tpu.matmul %7, %8, %cst_8 {dimension_numbers = #tpu.dot_dimension_numbers<[1], [0], [0], [1], [0, 0, 1, 1], [], []>} : vector<8x512xf32>, vector<512x512xf32>, vector<8x512xf32> -> vector<8x512xf32>
    %c0_9 = arith.constant 0 : index
    %c0_10 = arith.constant 0 : index
    %10 = vector.load %arg5[%c0_9, %c0_10] : memref<1x512xf32, #tpu.memory_space<vmem>>, vector<1x512xf32>
    %11 = vector.broadcast %10 : vector<1x512xf32> to vector<8x512xf32>
    %12 = arith.addf %9, %11 : vector<8x512xf32>
    %cst_11 = arith.constant 0.000000e+00 : f32
    %13 = vector.broadcast %cst_11 : f32 to vector<8x512xf32>
    %14 = arith.maximumf %12, %13 : vector<8x512xf32>
    %c0_12 = arith.constant 0 : index
    %c0_13 = arith.constant 0 : index
    %15 = vector.load %arg6[%c0_12, %c0_13] : memref<512x512xf32, #tpu.memory_space<vmem>>, vector<512x512xf32>
    %cst_14 = arith.constant dense<0.000000e+00> : vector<8x512xf32>
    %16 = tpu.matmul %14, %15, %cst_14 {dimension_numbers = #tpu.dot_dimension_numbers<[1], [0], [0], [1], [0, 0, 1, 1], [], []>} : vector<8x512xf32>, vector<512x512xf32>, vector<8x512xf32> -> vector<8x512xf32>
    %c0_15 = arith.constant 0 : index
    %c0_16 = arith.constant 0 : index
    %17 = vector.load %arg7[%c0_15, %c0_16] : memref<1x512xf32, #tpu.memory_space<vmem>>, vector<1x512xf32>
    %18 = vector.broadcast %17 : vector<1x512xf32> to vector<8x512xf32>
    %19 = arith.addf %16, %18 : vector<8x512xf32>
    %cst_17 = arith.constant 0.000000e+00 : f32
    %20 = vector.broadcast %cst_17 : f32 to vector<8x512xf32>
    %21 = arith.maximumf %19, %20 : vector<8x512xf32>
    %c0_18 = arith.constant 0 : index
    %c0_19 = arith.constant 0 : index
    %22 = vector.load %arg8[%c0_18, %c0_19] : memref<512x128xf32, #tpu.memory_space<vmem>>, vector<512x128xf32>
    %cst_20 = arith.constant dense<0.000000e+00> : vector<8x128xf32>
    %23 = tpu.matmul %21, %22, %cst_20 {dimension_numbers = #tpu.dot_dimension_numbers<[1], [0], [0], [1], [0, 0, 1, 1], [], []>} : vector<8x512xf32>, vector<512x128xf32>, vector<8x128xf32> -> vector<8x128xf32>
    %c0_21 = arith.constant 0 : index
    %c0_22 = arith.constant 0 : index
    %24 = vector.load %arg9[%c0_21, %c0_22] : memref<1x128xf32, #tpu.memory_space<vmem>>, vector<1x128xf32>
    %25 = vector.broadcast %24 : vector<1x128xf32> to vector<8x128xf32>
    %26 = arith.addf %23, %25 : vector<8x128xf32>
    %c0_23 = arith.constant 0 : index
    %c0_24 = arith.constant 0 : index
    %27 = vector.load %arg10[%c0_23, %c0_24] : memref<8x128xf32, #tpu.memory_space<vmem>>, vector<8x128xf32>
    tpu.vector_store %arg10[%c0_23, %c0_24], %26 {strides = array<i32>} : memref<8x128xf32, #tpu.memory_space<vmem>>, vector<8x128xf32>,
    return
  }
  func.func @transform_0(%arg0: i32) -> (i32, i32) {
    %c0_i32 = arith.constant 0 : i32
    %c0_i32_0 = arith.constant 0 : i32
    return %arg0, %c0_i32 : i32, i32
  }
  func.func @transform_1(%arg0: i32) -> (i32, i32) {
    %c0_i32 = arith.constant 0 : i32
    %c0_i32_0 = arith.constant 0 : i32
    %c0_i32_1 = arith.constant 0 : i32
    return %c0_i32, %c0_i32_0 : i32, i32
  }
  func.func @transform_2(%arg0: i32) -> (i32, i32) {
    %c0_i32 = arith.constant 0 : i32
    %c0_i32_0 = arith.constant 0 : i32
    %c0_i32_1 = arith.constant 0 : i32
    return %c0_i32, %c0_i32_0 : i32, i32
  }
  func.func @transform_3(%arg0: i32) -> (i32, i32) {
    %c0_i32 = arith.constant 0 : i32
    %c0_i32_0 = arith.constant 0 : i32
    %c0_i32_1 = arith.constant 0 : i32
    return %c0_i32, %c0_i32_0 : i32, i32
  }
  func.func @transform_4(%arg0: i32) -> (i32, i32) {
    %c0_i32 = arith.constant 0 : i32
    %c0_i32_0 = arith.constant 0 : i32
    %c0_i32_1 = arith.constant 0 : i32
    return %c0_i32, %c0_i32_0 : i32, i32
  }
  func.func @transform_5(%arg0: i32) -> (i32, i32) {
    %c0_i32 = arith.constant 0 : i32
    %c0_i32_0 = arith.constant 0 : i32
    %c0_i32_1 = arith.constant 0 : i32
    return %c0_i32, %c0_i32_0 : i32, i32
  }
  func.func @transform_6(%arg0: i32) -> (i32, i32) {
    %c0_i32 = arith.constant 0 : i32
    %c0_i32_0 = arith.constant 0 : i32
    %c0_i32_1 = arith.constant 0 : i32
    return %c0_i32, %c0_i32_0 : i32, i32
  }
  func.func @transform_7(%arg0: i32) -> (i32, i32) {
    %c0_i32 = arith.constant 0 : i32
    %c0_i32_0 = arith.constant 0 : i32
    %c0_i32_1 = arith.constant 0 : i32
    return %c0_i32, %c0_i32_0 : i32, i32
  }
  func.func @transform_8(%arg0: i32) -> (i32, i32) {
    %c0_i32 = arith.constant 0 : i32
    %c0_i32_0 = arith.constant 0 : i32
    %c0_i32_1 = arith.constant 0 : i32
    return %c0_i32, %c0_i32_0 : i32, i32
  }
  func.func @transform_9(%arg0: i32) -> (i32, i32) {
    %c0_i32 = arith.constant 0 : i32
    %c0_i32_0 = arith.constant 0 : i32
    return %arg0, %c0_i32 : i32, i32
  }
}

</mosaic_0001>

<bundles_post_ra>
// kernel: small_mlp_forward.1
= control target key start
LH: loop header
LB: loop body
LE: loop exit
PB: predicated region body
PF: predicated region fallthrough
CT: control target
= control target key end

     0   :  { %14 = vsyncpa [#allocation3], 0  ;;  %s4111_s0 = inlined_call_operand.vmem [shape: f32[8,896], index: 0, kind: input, shape index: {}]   ;;  %s4112_s1 = inlined_call_operand.hbm [shape: f32[896,512], index: 1, kind: input, shape index: {}]   ;;  %s4113_s2 = inlined_call_operand.hbm [shape: f32[1,512], index: 2, kind: input, shape index: {}]   ;;  %s4114_s3 = inlined_call_operand.hbm [shape: f32[512,512], index: 3, kind: input, shape index: {}]   ;;  %s4115_s4 = inlined_call_operand.hbm [shape: f32[1,512], index: 4, kind: input, shape index: {}]   ;;  %s4116_s5 = inlined_call_operand.hbm [shape: f32[512,512], index: 5, kind: input, shape index: {}]   ;;  %s4117_s6 = inlined_call_operand.hbm [shape: f32[1,512], index: 6, kind: input, shape index: {}]   ;;  %s4118_s7 = inlined_call_operand.hbm [shape: f32[512,128], index: 7, kind: input, shape index: {}]   ;;  %s4119_s8 = inlined_call_operand.hbm [shape: f32[1,128], index: 8, kind: input, shape index: {}]   ;;  %s4120_s9 = inlined_call_operand.vmem [shape: f32[8,128], index: 9, kind: output, shape index: {}]  }
   0x1   :  { %15 = vsyncpa [#allocation5], 0 }
   0x2   :  { %16 = vsyncpa [#allocation8], 0 }
   0x3   :  { %17 = vsyncpa [#allocation11], 0 }
   0x4   :  { %18 = vsyncpa [#allocation14], 0  ;;  %s3861_s30 = smov [#allocation4]   ;;  %s3862_s11 = smov [#allocation7]  }
   0x5   :  { %s39_s10 = sshll.u32 %s3861_s30, 4  ;;  %s61_s12 = sshll.u32 %s3862_s11, 4  ;;  %s40_s10 = int_to_ptr.vmem [resolvable:$true] %s39_s10  ;;  %s62_s12 = int_to_ptr.vmem [resolvable:$true] %s61_s12 }
   0x6   :  { %s3675_s15 = scalar_lea.hbm %s4113_s2, 64 }
   0x7   :  { %p3676_p0 = scmp.ne.s32.totalorder %s4113_s2, %s3675_s15  ;;  %p3679_p1 = scmp.lt.u32.totalorder %s3675_s15, %s4113_s2 }
   0x9   :  { %p3681_p2 = pnand %p3679_p1, %p3676_p0 }
   0xb   :  { %3684 = shalt.err (!%p3681_p2)
}
   0xc   :  { %s3685_s20 = scalar_lea.vmem %s40_s10, 64  ;;  %p3690_p4 = scmp.lt.s32.totalorder %s40_s10, %s40_s10 }
   0xd   :  { %p3686_p3 = scmp.ne.s32.totalorder %s40_s10, %s3685_s20  ;;  %p3691_p5 = scmp.lt.s32.totalorder %s3685_s20, %s3685_s20 }
   0xf   :  { %p3692_p6 = por %p3691_p5, %p3690_p4 }
  0x11   :  { %p3693_p7 = pnand %p3692_p6, %p3686_p3 }
  0x13   :  { %3696 = shalt.err (!%p3693_p7)
}
  0x14   :  { %42 = dma.hbm_to_vmem [thread:$0]  %s4113_s2, 64, %s40_s10, [#allocation5]  }
  0x15   :  { %s3697_s25 = scalar_lea.hbm %s4115_s4, 64 }
  0x16   :  { %p3698_p8 = scmp.ne.s32.totalorder %s4115_s4, %s3697_s25  ;;  %p3701_p9 = scmp.lt.u32.totalorder %s3697_s25, %s4115_s4 }
  0x18   :  { %p3703_p10 = pnand %p3701_p9, %p3698_p8 }
  0x1a   :  { %3706 = shalt.err (!%p3703_p10)
}
  0x1b   :  { %s3707_s30 = scalar_lea.vmem %s62_s12, 64  ;;  %p3712_p12 = scmp.lt.s32.totalorder %s62_s12, %s62_s12 }
  0x1c   :  { %p3708_p11 = scmp.ne.s32.totalorder %s62_s12, %s3707_s30  ;;  %p3713_p13 = scmp.lt.s32.totalorder %s3707_s30, %s3707_s30 }
  0x1e   :  { %p3714_p0 = por %p3713_p13, %p3712_p12 }
  0x20   :  { %p3715_p1 = pnand %p3714_p0, %p3708_p11 }
  0x22   :  { %3718 = shalt.err (!%p3715_p1)
}
  0x23   :  { %64 = dma.hbm_to_vmem [thread:$0]  %s4115_s4, 64, %s62_s12, [#allocation8]  }
  0x24   :  { %s3863_s11 = smov [#allocation10]   ;;  %s3864_s14 = smov [#allocation2]  }
  0x25   :  { %s83_s13 = sshll.u32 %s3863_s11, 4  ;;  %s26_s15 = sshll.u32 %s3864_s14, 4  ;;  %s84_s13 = int_to_ptr.vmem [resolvable:$true] %s83_s13  ;;  %s3948_s15 = int_to_ptr.vmem [resolvable:$true] %s26_s15 }
  0x26   :  { %s3719_s18 = scalar_lea.hbm %s4117_s6, 64 }
  0x27   :  { %p3720_p2 = scmp.ne.s32.totalorder %s4117_s6, %s3719_s18  ;;  %p3723_p3 = scmp.lt.u32.totalorder %s3719_s18, %s4117_s6 }
  0x29   :  { %p3725_p4 = pnand %p3723_p3, %p3720_p2 }
  0x2b   :  { %3728 = shalt.err (!%p3725_p4)
}
  0x2c   :  { %s3729_s4 = scalar_lea.vmem %s84_s13, 64  ;;  %p3734_p6 = scmp.lt.s32.totalorder %s84_s13, %s84_s13 }
  0x2d   :  { %p3730_p5 = scmp.ne.s32.totalorder %s84_s13, %s3729_s4  ;;  %p3735_p7 = scmp.lt.s32.totalorder %s3729_s4, %s3729_s4 }
  0x2f   :  { %p3736_p8 = por %p3735_p7, %p3734_p6 }
  0x31   :  { %p3737_p9 = pnand %p3736_p8, %p3730_p5 }
  0x33   :  { %3740 = shalt.err (!%p3737_p9)
}
  0x34   :  { %86 = dma.hbm_to_vmem [thread:$0]  %s4117_s6, 64, %s84_s13, [#allocation11]  }
  0x35   :  { %s3741_s26 = scalar_lea.hbm %s4112_s1, 57344 }
  0x36   :  { %p3742_p10 = scmp.ne.s32.totalorder %s4112_s1, %s3741_s26  ;;  %p3745_p11 = scmp.lt.u32.totalorder %s3741_s26, %s4112_s1 }
  0x38   :  { %p3747_p12 = pnand %p3745_p11, %p3742_p10 }
  0x3a   :  { %3750 = shalt.err (!%p3747_p12)
}
  0x3b   :  { %s3751_s2 = scalar_lea.vmem %s3948_s15, 57344  ;;  %p3756_p0 = scmp.lt.s32.totalorder %s3948_s15, %s3948_s15 }
  0x3c   :  { %p3752_p13 = scmp.ne.s32.totalorder %s3948_s15, %s3751_s2  ;;  %p3757_p1 = scmp.lt.s32.totalorder %s3751_s2, %s3751_s2 }
  0x3e   :  { %p3758_p2 = por %p3757_p1, %p3756_p0 }
  0x40   :  { %p3759_p3 = pnand %p3758_p2, %p3752_p13 }
  0x42   :  { %3762 = shalt.err (!%p3759_p3)
}
  0x43   :  { %s3865_s6 = smov 512   ;;  %s3866_s10 = smov 32  }
  0x44   :  { %32 = dma.hbm_to_vmem [thread:$0]  %s4112_s1, 57344, %s3948_s15, [#allocation3], %s3865_s6, %s3865_s6, %s3866_s10  }
  0x45   :  { %s3867_s14 = smov [#allocation6]   ;;  %s3868_s17 = smov [#allocation9]  }
  0x46   :  { %s48_s16 = sshll.u32 %s3867_s14, 4  ;;  %s70_s18 = sshll.u32 %s3868_s17, 4  ;;  %s49_s16 = int_to_ptr.vmem [resolvable:$true] %s48_s16  ;;  %s3982_s18 = int_to_ptr.vmem [resolvable:$true] %s70_s18 }
  0x47   :  { %s3763_s21 = scalar_lea.hbm %s4114_s3, 32768 }
  0x48   :  { %p3764_p4 = scmp.ne.s32.totalorder %s4114_s3, %s3763_s21  ;;  %p3767_p5 = scmp.lt.u32.totalorder %s3763_s21, %s4114_s3 }
  0x4a   :  { %p3769_p6 = pnand %p3767_p5, %p3764_p4 }
  0x4c   :  { %3772 = shalt.err (!%p3769_p6)
}
  0x4d   :  { %s3773_s1 = scalar_lea.vmem %s49_s16, 32768  ;;  %p3778_p8 = scmp.lt.s32.totalorder %s49_s16, %s49_s16 }
  0x4e   :  { %p3774_p7 = scmp.ne.s32.totalorder %s49_s16, %s3773_s1  ;;  %p3779_p9 = scmp.lt.s32.totalorder %s3773_s1, %s3773_s1 }
  0x50   :  { %p3780_p10 = por %p3779_p9, %p3778_p8 }
  0x52   :  { %p3781_p11 = pnand %p3780_p10, %p3774_p7 }
  0x54   :  { %3784 = shalt.err (!%p3781_p11)
}
  0x55   :  { %54 = dma.hbm_to_vmem [thread:$0]  %s4114_s3, 32768, %s49_s16, [#allocation5], %s3865_s6, %s3865_s6, %s3866_s10  }
  0x56   :  { %s3785_s27 = scalar_lea.hbm %s4116_s5, 32768 }
  0x57   :  { %p3786_p12 = scmp.ne.s32.totalorder %s4116_s5, %s3785_s27  ;;  %p3789_p13 = scmp.lt.u32.totalorder %s3785_s27, %s4116_s5 }
  0x59   :  { %p3791_p0 = pnand %p3789_p13, %p3786_p12 }
  0x5b   :  { %3794 = shalt.err (!%p3791_p0)
}
  0x5c   :  { %s3795_s11 = scalar_lea.vmem %s3982_s18, 32768  ;;  %p3800_p2 = scmp.lt.s32.totalorder %s3982_s18, %s3982_s18 }
  0x5d   :  { %p3796_p1 = scmp.ne.s32.totalorder %s3982_s18, %s3795_s11  ;;  %p3801_p3 = scmp.lt.s32.totalorder %s3795_s11, %s3795_s11 }
  0x5f   :  { %p3802_p4 = por %p3801_p3, %p3800_p2 }
  0x61   :  { %p3803_p5 = pnand %p3802_p4, %p3796_p1 }
  0x63   :  { %3806 = shalt.err (!%p3803_p5)
}
  0x64   :  { %76 = dma.hbm_to_vmem [thread:$0]  %s4116_s5, 32768, %s3982_s18, [#allocation8], %s3865_s6, %s3865_s6, %s3866_s10  }
  0x65   :  { %s3869_s14 = smov [#allocation12]   ;;  %s3807_s20 = scalar_lea.hbm %s4118_s7, 8192 }
  0x66   :  { %s92_s16 = sshll.u32 %s3869_s14, 4  ;;  %p3808_p6 = scmp.ne.s32.totalorder %s4118_s7, %s3807_s20  ;;  %s93_s16 = int_to_ptr.vmem [resolvable:$true] %s92_s16 }
  0x67   :  { %p3811_p7 = scmp.lt.u32.totalorder %s3807_s20, %s4118_s7 }
  0x69   :  { %p3813_p8 = pnand %p3811_p7, %p3808_p6 }
  0x6b   :  { %3816 = shalt.err (!%p3813_p8)
}
  0x6c   :  { %s3817_s23 = scalar_lea.vmem %s93_s16, 8192  ;;  %p3822_p10 = scmp.lt.s32.totalorder %s93_s16, %s93_s16 }
  0x6d   :  { %p3818_p9 = scmp.ne.s32.totalorder %s93_s16, %s3817_s23  ;;  %p3823_p11 = scmp.lt.s32.totalorder %s3817_s23, %s3817_s23 }
  0x6f   :  { %p3824_p12 = por %p3823_p11, %p3822_p10 }
  0x71   :  { %p3825_p13 = pnand %p3824_p12, %p3818_p9 }
  0x73   :  { %3828 = shalt.err (!%p3825_p13)
}
  0x74   :  { %s3870_s5 = smov 128   ;;  %s3871_s6 = smov 8  }
  0x75   :  { %98 = dma.hbm_to_vmem [thread:$0]  %s4118_s7, 8192, %s93_s16, [#allocation11], %s3870_s5, %s3870_s5, %s3871_s6  }
  0x76   :  { %s3872_s1 = smov [#allocation13]   ;;  %s3829_s26 = scalar_lea.hbm %s4119_s8, 16 }
  0x77   :  { %s105_s15 = sshll.u32 %s3872_s1, 4  ;;  %p3830_p0 = scmp.ne.s32.totalorder %s4119_s8, %s3829_s26  ;;  %s106_s15 = int_to_ptr.vmem [resolvable:$true] %s105_s15 }
  0x78   :  { %p3833_p1 = scmp.lt.u32.totalorder %s3829_s26, %s4119_s8 }
  0x7a   :  { %p3835_p2 = pnand %p3833_p1, %p3830_p0 }
  0x7c   :  { %3838 = shalt.err (!%p3835_p2)
}
  0x7d   :  { %s3839_s2 = scalar_lea.vmem %s106_s15, 16  ;;  %s3843_s7 = scalar_lea.vmem %s106_s15, 32 }
  0x7e   :  { %p3840_p3 = scmp.ne.s32.totalorder %s106_s15, %s3839_s2  ;;  %p3844_p4 = scmp.lt.s32.totalorder %s106_s15, %s106_s15 }
  0x7f   :  { %p3845_p5 = scmp.lt.s32.totalorder %s3843_s7, %s3839_s2 }
  0x81   :  { %p3846_p6 = por %p3845_p5, %p3844_p4 }
  0x83   :  { %p3847_p7 = pnand %p3846_p6, %p3840_p3 }
  0x85   :  { %3850 = shalt.err (!%p3847_p7)
}
  0x86   :  { %108 = dma.hbm_to_vmem [thread:$0]  %s4119_s8, 16, %s106_s15, [#allocation14]  }
  0x87   :  { %3851 = dma.done.wait [#allocation3], 57344  }
  0x88   :  { %3852 = vsyncadd [#allocation3], 4294909952 }
  0x89   :  { %3853 = dma.done.wait [#allocation5], 32832  }
  0x8a   :  { %3854 = vsyncadd [#allocation5], 4294934464 }
  0x8b   :  { %3855 = dma.done.wait [#allocation8], 32832  }
  0x8c   :  { %3856 = vsyncadd [#allocation8], 4294934464 }
  0x8d   :  { %3857 = dma.done.wait [#allocation11], 8256  }
  0x8e   :  { %3858 = vsyncadd [#allocation11], 4294959040 }
  0x8f   :  { %3859 = dma.done.wait [#allocation14], 16  }
  0x90   :  { %3860 = vsyncadd [#allocation14], 4294967280  ;;  %v141_v0 = vld [vmem:[#allocation2 + $0x8] sm:$0xff]  ;;  %v143_v2 = vld [vmem:[#allocation2 + $0x18] sm:$0xff] }
  0x91   :  { %v145_v1 = vld [vmem:[#allocation2 + $0x28] sm:$0xff]  ;;  %v147_v4 = vld [vmem:[#allocation2 + $0x38] sm:$0xff]  ;;  %v140_v5 = vld [vmem:[#allocation2] sm:$0xff] }
  0x92   :  { %v2606_v3 = vpack.c.bf16 %v145_v1, %v141_v0  ;;  %v144_v6 = vld [vmem:[#allocation2 + $0x20] sm:$0xff]  ;;  %v2830_v7 = vpack.c.bf16 %v147_v4, %v143_v2  ;;  %v142_v9 = vld [vmem:[#allocation2 + $0x10] sm:$0xff]  ;;  %v149_v11 = vld [vmem:[#allocation2 + $0x48] sm:$0xff] }
  0x93   :  { %v2608_v8 = vpack.c.bf16 %v144_v6, %v140_v5  ;;  %v146_v10 = vld [vmem:[#allocation2 + $0x30] sm:$0xff]  ;;  %v153_v13 = vld [vmem:[#allocation2 + $0x68] sm:$0xff]  ;;  %v151_v14 = vld [vmem:[#allocation2 + $0x58] sm:$0xff] }
  0x94   :  { %2607 = vmatprep.subr.bf16.mxu0 %v2606_v3  ;;  %v2832_v12 = vpack.c.bf16 %v146_v10, %v142_v9  ;;  %v155_v15 = vld [vmem:[#allocation2 + $0x78] sm:$0xff]  ;;  %2831 = vmatprep.subr.bf16.mxu1 %v2830_v7  ;;  %v2610_v16 = vpack.c.bf16 %v153_v13, %v149_v11  ;;  %v148_v18 = vld [vmem:[#allocation2 + $0x40] sm:$0xff]  ;;  %v150_v20 = vld [vmem:[#allocation2 + $0x50] sm:$0xff] }
  0x95   :  { %2609 = vmatpush1.bf16.msra.mxu0 %v2608_v8  ;;  %v2834_v17 = vpack.c.bf16 %v155_v15, %v151_v14  ;;  %v152_v19 = vld [vmem:[#allocation2 + $0x60] sm:$0xff]  ;;  %v154_v22 = vld [vmem:[#allocation2 + $0x70] sm:$0xff]  ;;  %v157_v23 = vld [vmem:[#allocation2 + $0x88] sm:$0xff] }
  0x96   :  { %2833 = vmatpush1.bf16.msra.mxu1 %v2832_v12  ;;  %v2612_v21 = vpack.c.bf16 %v152_v19, %v148_v18  ;;  %v161_v24 = vld [vmem:[#allocation2 + $0xa8] sm:$0xff]  ;;  %2611 = vmatprep.subr.bf16.mxu0 %v2610_v16  ;;  %v2836_v25 = vpack.c.bf16 %v154_v22, %v150_v20  ;;  %v159_v27 = vld [vmem:[#allocation2 + $0x98] sm:$0xff]  ;;  %v156_v29 = vld [vmem:[#allocation2 + $0x80] sm:$0xff] }
  0x97   :  { %2835 = vmatprep.subr.bf16.mxu1 %v2834_v17  ;;  %v2614_v26 = vpack.c.bf16 %v161_v24, %v157_v23  ;;  %v163_v28 = vld [vmem:[#allocation2 + $0xb8] sm:$0xff]  ;;  %v160_v31 = vld [vmem:[#allocation2 + $0xa0] sm:$0xff]  ;;  %v158_v32 = vld [vmem:[#allocation2 + $0x90] sm:$0xff] }
  0x98   :  { %v2838_v30 = vpack.c.bf16 %v163_v28, %v159_v27  ;;  %v162_v33 = vld [vmem:[#allocation2 + $0xb0] sm:$0xff]  ;;  %v2616_v34 = vpack.c.bf16 %v160_v31, %v156_v29  ;;  %v165_v35 = vld [vmem:[#allocation2 + $0xc8] sm:$0xff]  ;;  %v167_v37 = vld [vmem:[#allocation2 + $0xd8] sm:$0xff] }
  0x99   :  { %2613 = vmatpush1.bf16.msra.mxu0 %v2612_v21  ;;  %v169_v36 = vld [vmem:[#allocation2 + $0xe8] sm:$0xff]  ;;  %v2840_v38 = vpack.c.bf16 %v162_v33, %v158_v32  ;;  %v171_v40 = vld [vmem:[#allocation2 + $0xf8] sm:$0xff]  ;;  %v164_v41 = vld [vmem:[#allocation2 + $0xc0] sm:$0xff] }
  0x9a   :  { %2837 = vmatpush1.bf16.msra.mxu1 %v2836_v25  ;;  %2615 = vmatprep.subr.bf16.mxu0 %v2614_v26  ;;  %v2618_v39 = vpack.c.bf16 %v169_v36, %v165_v35  ;;  %v168_v42 = vld [vmem:[#allocation2 + $0xe0] sm:$0xff]  ;;  %v2842_v43 = vpack.c.bf16 %v171_v40, %v167_v37  ;;  %v166_v44 = vld [vmem:[#allocation2 + $0xd0] sm:$0xff]  ;;  %v173_v46 = vld [vmem:[#allocation2 + $0x108] sm:$0xff] }
  0x9b   :  { %2839 = vmatprep.subr.bf16.mxu1 %v2838_v30  ;;  %v170_v45 = vld [vmem:[#allocation2 + $0xf0] sm:$0xff]  ;;  %v177_v47 = vld [vmem:[#allocation2 + $0x128] sm:$0xff]  ;;  %v175_v48 = vld [vmem:[#allocation2 + $0x118] sm:$0xff]  ;;  %v2620_v50 = vpack.c.bf16 %v168_v42, %v164_v41 }
  0x9c   :  { %v179_v49 = vld [vmem:[#allocation2 + $0x138] sm:$0xff]  ;;  %v2844_v51 = vpack.c.bf16 %v170_v45, %v166_v44  ;;  %v2622_v52 = vpack.c.bf16 %v177_v47, %v173_v46  ;;  %v172_v53 = vld [vmem:[#allocation2 + $0x100] sm:$0xff]  ;;  %v174_v55 = vld [vmem:[#allocation2 + $0x110] sm:$0xff] }
  0x9d   :  { %2617 = vmatpush1.bf16.msra.mxu0 %v2616_v34  ;;  %v176_v54 = vld [vmem:[#allocation2 + $0x120] sm:$0xff]  ;;  %v2846_v56 = vpack.c.bf16 %v179_v49, %v175_v48  ;;  %v178_v57 = vld [vmem:[#allocation2 + $0x130] sm:$0xff]  ;;  %v181_v58 = vld [vmem:[#allocation2 + $0x148] sm:$0xff] }
  0x9e   :  { %2841 = vmatpush1.bf16.msra.mxu1 %v2840_v38  ;;  %2619 = vmatprep.subr.bf16.mxu0 %v2618_v39  ;;  %v185_v59 = vld [vmem:[#allocation2 + $0x168] sm:$0xff]  ;;  %v183_v60 = vld [vmem:[#allocation2 + $0x158] sm:$0xff]  ;;  %v2624_v62 = vpack.c.bf16 %v176_v54, %v172_v53  ;;  %v2848_v63 = vpack.c.bf16 %v178_v57, %v174_v55  ;;  %v180_v1 = vld [vmem:[#allocation2 + $0x140] sm:$0xff] }
  0x9f   :  { %2843 = vmatprep.subr.bf16.mxu1 %v2842_v43  ;;  %v187_v61 = vld [vmem:[#allocation2 + $0x178] sm:$0xff]  ;;  %v2626_v0 = vpack.c.bf16 %v185_v59, %v181_v58  ;;  %v184_v2 = vld [vmem:[#allocation2 + $0x160] sm:$0xff]  ;;  %v182_v3 = vld [vmem:[#allocation2 + $0x150] sm:$0xff] }
  0xa0   :  { %v2850_v4 = vpack.c.bf16 %v187_v61, %v183_v60  ;;  %v186_v5 = vld [vmem:[#allocation2 + $0x170] sm:$0xff]  ;;  %v189_v6 = vld [vmem:[#allocation2 + $0x188] sm:$0xff]  ;;  %v191_v8 = vld [vmem:[#allocation2 + $0x198] sm:$0xff]  ;;  %v2628_v10 = vpack.c.bf16 %v184_v2, %v180_v1 }
  0xa1   :  { %2621 = vmatpush1.bf16.msra.mxu0 %v2620_v50  ;;  %v193_v7 = vld [vmem:[#allocation2 + $0x1a8] sm:$0xff]  ;;  %v195_v9 = vld [vmem:[#allocation2 + $0x1b8] sm:$0xff]  ;;  %v2852_v11 = vpack.c.bf16 %v186_v5, %v182_v3  ;;  %v188_v13 = vld [vmem:[#allocation2 + $0x180] sm:$0xff] }
  0xa2   :  { %2845 = vmatpush1.bf16.msra.mxu1 %v2844_v51  ;;  %2623 = vmatprep.subr.bf16.mxu0 %v2622_v52  ;;  %v2630_v12 = vpack.c.bf16 %v193_v7, %v189_v6  ;;  %v192_v14 = vld [vmem:[#allocation2 + $0x1a0] sm:$0xff]  ;;  %v190_v15 = vld [vmem:[#allocation2 + $0x190] sm:$0xff]  ;;  %v2854_v16 = vpack.c.bf16 %v195_v9, %v191_v8  ;;  %v197_v18 = vld [vmem:[#allocation2 + $0x1c8] sm:$0xff] }
  0xa3   :  { %2847 = vmatprep.subr.bf16.mxu1 %v2846_v56  ;;  %v194_v17 = vld [vmem:[#allocation2 + $0x1b0] sm:$0xff]  ;;  %v201_v19 = vld [vmem:[#allocation2 + $0x1e8] sm:$0xff]  ;;  %v199_v20 = vld [vmem:[#allocation2 + $0x1d8] sm:$0xff]  ;;  %v2632_v22 = vpack.c.bf16 %v192_v14, %v188_v13 }
  0xa4   :  { %v203_v21 = vld [vmem:[#allocation2 + $0x1f8] sm:$0xff]  ;;  %v2856_v23 = vpack.c.bf16 %v194_v17, %v190_v15  ;;  %v2634_v24 = vpack.c.bf16 %v201_v19, %v197_v18  ;;  %v196_v25 = vld [vmem:[#allocation2 + $0x1c0] sm:$0xff]  ;;  %v198_v27 = vld [vmem:[#allocation2 + $0x1d0] sm:$0xff] }
  0xa5   :  { %2625 = vmatpush1.bf16.msra.mxu0 %v2624_v62  ;;  %v200_v26 = vld [vmem:[#allocation2 + $0x1e0] sm:$0xff]  ;;  %v2858_v28 = vpack.c.bf16 %v203_v21, %v199_v20  ;;  %v202_v29 = vld [vmem:[#allocation2 + $0x1f0] sm:$0xff]  ;;  %v205_v30 = vld [vmem:[#allocation2 + $0x208] sm:$0xff] }
  0xa6   :  { %2849 = vmatpush1.bf16.msra.mxu1 %v2848_v63  ;;  %2627 = vmatprep.subr.bf16.mxu0 %v2626_v0  ;;  %v209_v31 = vld [vmem:[#allocation2 + $0x228] sm:$0xff]  ;;  %v207_v32 = vld [vmem:[#allocation2 + $0x218] sm:$0xff]  ;;  %v2636_v34 = vpack.c.bf16 %v200_v26, %v196_v25  ;;  %v2860_v35 = vpack.c.bf16 %v202_v29, %v198_v27  ;;  %v204_v37 = vld [vmem:[#allocation2 + $0x200] sm:$0xff] }
  0xa7   :  { %2851 = vmatprep.subr.bf16.mxu1 %v2850_v4  ;;  %v211_v33 = vld [vmem:[#allocation2 + $0x238] sm:$0xff]  ;;  %v2638_v36 = vpack.c.bf16 %v209_v31, %v205_v30  ;;  %v208_v38 = vld [vmem:[#allocation2 + $0x220] sm:$0xff]  ;;  %v206_v39 = vld [vmem:[#allocation2 + $0x210] sm:$0xff] }
  0xa8   :  { %v2862_v40 = vpack.c.bf16 %v211_v33, %v207_v32  ;;  %v210_v41 = vld [vmem:[#allocation2 + $0x230] sm:$0xff]  ;;  %v213_v42 = vld [vmem:[#allocation2 + $0x248] sm:$0xff]  ;;  %v215_v44 = vld [vmem:[#allocation2 + $0x258] sm:$0xff]  ;;  %v2640_v46 = vpack.c.bf16 %v208_v38, %v204_v37 }
  0xa9   :  { %2629 = vmatpush1.bf16.msra.mxu0 %v2628_v10  ;;  %v217_v43 = vld [vmem:[#allocation2 + $0x268] sm:$0xff]  ;;  %v219_v45 = vld [vmem:[#allocation2 + $0x278] sm:$0xff]  ;;  %v2864_v47 = vpack.c.bf16 %v210_v41, %v206_v39  ;;  %v212_v49 = vld [vmem:[#allocation2 + $0x240] sm:$0xff] }
  0xaa   :  { %2853 = vmatpush1.bf16.msra.mxu1 %v2852_v11  ;;  %2631 = vmatprep.subr.bf16.mxu0 %v2630_v12  ;;  %v2642_v48 = vpack.c.bf16 %v217_v43, %v213_v42  ;;  %v216_v50 = vld [vmem:[#allocation2 + $0x260] sm:$0xff]  ;;  %v214_v51 = vld [vmem:[#allocation2 + $0x250] sm:$0xff]  ;;  %v2866_v52 = vpack.c.bf16 %v219_v45, %v215_v44  ;;  %v221_v54 = vld [vmem:[#allocation2 + $0x288] sm:$0xff] }
  0xab   :  { %2855 = vmatprep.subr.bf16.mxu1 %v2854_v16  ;;  %v218_v53 = vld [vmem:[#allocation2 + $0x270] sm:$0xff]  ;;  %v225_v55 = vld [vmem:[#allocation2 + $0x2a8] sm:$0xff]  ;;  %v223_v56 = vld [vmem:[#allocation2 + $0x298] sm:$0xff]  ;;  %v2644_v58 = vpack.c.bf16 %v216_v50, %v212_v49 }
  0xac   :  { %v227_v57 = vld [vmem:[#allocation2 + $0x2b8] sm:$0xff]  ;;  %v2868_v59 = vpack.c.bf16 %v218_v53, %v214_v51  ;;  %v2646_v60 = vpack.c.bf16 %v225_v55, %v221_v54  ;;  %v220_v61 = vld [vmem:[#allocation2 + $0x280] sm:$0xff]  ;;  %v222_v63 = vld [vmem:[#allocation2 + $0x290] sm:$0xff] }
  0xad   :  { %2633 = vmatpush1.bf16.msra.mxu0 %v2632_v22  ;;  %v224_v62 = vld [vmem:[#allocation2 + $0x2a0] sm:$0xff]  ;;  %v2870_v0 = vpack.c.bf16 %v227_v57, %v223_v56  ;;  %v226_v1 = vld [vmem:[#allocation2 + $0x2b0] sm:$0xff]  ;;  %v229_v2 = vld [vmem:[#allocation2 + $0x2c8] sm:$0xff] }
  0xae   :  { %2857 = vmatpush1.bf16.msra.mxu1 %v2856_v23  ;;  %2635 = vmatprep.subr.bf16.mxu0 %v2634_v24  ;;  %v233_v3 = vld [vmem:[#allocation2 + $0x2e8] sm:$0xff]  ;;  %v231_v4 = vld [vmem:[#allocation2 + $0x2d8] sm:$0xff]  ;;  %v2648_v6 = vpack.c.bf16 %v224_v62, %v220_v61  ;;  %v228_v7 = vld [vmem:[#allocation2 + $0x2c0] sm:$0xff]  ;;  %v2872_v8 = vpack.c.bf16 %v226_v1, %v222_v63 }
  0xaf   :  { %2859 = vmatprep.subr.bf16.mxu1 %v2858_v28  ;;  %v235_v5 = vld [vmem:[#allocation2 + $0x2f8] sm:$0xff]  ;;  %v2650_v9 = vpack.c.bf16 %v233_v3, %v229_v2  ;;  %v232_v10 = vld [vmem:[#allocation2 + $0x2e0] sm:$0xff]  ;;  %v230_v11 = vld [vmem:[#allocation2 + $0x2d0] sm:$0xff] }
  0xb0   :  { %v234_v12 = vld [vmem:[#allocation2 + $0x2f0] sm:$0xff]  ;;  %v2874_v13 = vpack.c.bf16 %v235_v5, %v231_v4  ;;  %v237_v14 = vld [vmem:[#allocation2 + $0x308] sm:$0xff]  ;;  %v239_v17 = vld [vmem:[#allocation2 + $0x318] sm:$0xff]  ;;  %v2652_v19 = vpack.c.bf16 %v232_v10, %v228_v7 }
  0xb1   :  { %2637 = vmatpush1.bf16.msra.mxu0 %v2636_v34  ;;  %v241_v15 = vld [vmem:[#allocation2 + $0x328] sm:$0xff]  ;;  %v243_v18 = vld [vmem:[#allocation2 + $0x338] sm:$0xff]  ;;  %v2876_v20 = vpack.c.bf16 %v234_v12, %v230_v11  ;;  %v236_v22 = vld [vmem:[#allocation2 + $0x300] sm:$0xff] }
  0xb2   :  { %2861 = vmatpush1.bf16.msra.mxu1 %v2860_v35  ;;  %2639 = vmatprep.subr.bf16.mxu0 %v2638_v36  ;;  %v134_v16 = vld [vmem:[%s4111_s0 + $0x8] sm:$0xff]  ;;  %v2654_v21 = vpack.c.bf16 %v241_v15, %v237_v14  ;;  %v240_v23 = vld [vmem:[#allocation2 + $0x320] sm:$0xff]  ;;  %v238_v24 = vld [vmem:[#allocation2 + $0x310] sm:$0xff]  ;;  %v2878_v25 = vpack.c.bf16 %v243_v18, %v239_v17 }
  0xb3   :  { %2863 = vmatprep.subr.bf16.mxu1 %v2862_v40  ;;  %674 = vmatprep.mubr.f32.mxu0 %v134_v16  ;;  %v242_v26 = vld [vmem:[#allocation2 + $0x330] sm:$0xff]  ;;  %v245_v27 = vld [vmem:[#allocation2 + $0x348] sm:$0xff]  ;;  %v247_v29 = vld [vmem:[#allocation2 + $0x358] sm:$0xff]  ;;  %v2656_v31 = vpack.c.bf16 %v240_v23, %v236_v22 }
  0xb4   :  { %958 = vmatprep.mubr.f32.mxu1 %v134_v16  ;;  %v249_v28 = vld [vmem:[#allocation2 + $0x368] sm:$0xff]  ;;  %v251_v30 = vld [vmem:[#allocation2 + $0x378] sm:$0xff]  ;;  %v2880_v32 = vpack.c.bf16 %v242_v26, %v238_v24  ;;  %v244_v34 = vld [vmem:[#allocation2 + $0x340] sm:$0xff] }
  0xb5   :  { %2641 = vmatpush1.bf16.msra.mxu0 %v2640_v46  ;;  %v2658_v33 = vpack.c.bf16 %v249_v28, %v245_v27  ;;  %v248_v35 = vld [vmem:[#allocation2 + $0x360] sm:$0xff]  ;;  %v246_v36 = vld [vmem:[#allocation2 + $0x350] sm:$0xff]  ;;  %v2882_v37 = vpack.c.bf16 %v251_v30, %v247_v29  ;;  %v253_v39 = vld [vmem:[#allocation2 + $0x388] sm:$0xff] }
  0xb6   :  { %2865 = vmatpush1.bf16.msra.mxu1 %v2864_v47  ;;  %2643 = vmatprep.subr.bf16.mxu0 %v2642_v48  ;;  %v250_v38 = vld [vmem:[#allocation2 + $0x370] sm:$0xff]  ;;  %v257_v40 = vld [vmem:[#allocation2 + $0x3a8] sm:$0xff]  ;;  %v255_v41 = vld [vmem:[#allocation2 + $0x398] sm:$0xff]  ;;  %v2660_v43 = vpack.c.bf16 %v248_v35, %v244_v34 }
  0xb7   :  { %2867 = vmatprep.subr.bf16.mxu1 %v2866_v52  ;;  %v259_v42 = vld [vmem:[#allocation2 + $0x3b8] sm:$0xff]  ;;  %v2884_v44 = vpack.c.bf16 %v250_v38, %v246_v36  ;;  %v2662_v45 = vpack.c.bf16 %v257_v40, %v253_v39  ;;  %v252_v46 = vld [vmem:[#allocation2 + $0x380] sm:$0xff]  ;;  %v254_v48 = vld [vmem:[#allocation2 + $0x390] sm:$0xff] }
  0xb8   :  { %v256_v47 = vld [vmem:[#allocation2 + $0x3a0] sm:$0xff]  ;;  %v2886_v49 = vpack.c.bf16 %v259_v42, %v255_v41  ;;  %v258_v50 = vld [vmem:[#allocation2 + $0x3b0] sm:$0xff]  ;;  %v261_v51 = vld [vmem:[#allocation2 + $0x3c8] sm:$0xff] }
  0xb9   :  { %2645 = vmatpush1.bf16.msra.mxu0 %v2644_v58  ;;  %v265_v52 = vld [vmem:[#allocation2 + $0x3e8] sm:$0xff]  ;;  %v263_v53 = vld [vmem:[#allocation2 + $0x3d8] sm:$0xff]  ;;  %v2664_v55 = vpack.c.bf16 %v256_v47, %v252_v46  ;;  %v2888_v56 = vpack.c.bf16 %v258_v50, %v254_v48  ;;  %v260_v58 = vld [vmem:[#allocation2 + $0x3c0] sm:$0xff] }
  0xba   :  { %2869 = vmatpush1.bf16.msra.mxu1 %v2868_v59  ;;  %2647 = vmatprep.subr.bf16.mxu0 %v2646_v60  ;;  %v267_v54 = vld [vmem:[#allocation2 + $0x3f8] sm:$0xff]  ;;  %v2666_v57 = vpack.c.bf16 %v265_v52, %v261_v51  ;;  %v264_v59 = vld [vmem:[#allocation2 + $0x3e0] sm:$0xff]  ;;  %v262_v60 = vld [vmem:[#allocation2 + $0x3d0] sm:$0xff] }
  0xbb   :  { %2871 = vmatprep.subr.bf16.mxu1 %v2870_v0  ;;  %v2890_v61 = vpack.c.bf16 %v267_v54, %v263_v53  ;;  %v266_v62 = vld [vmem:[#allocation2 + $0x3f0] sm:$0xff]  ;;  %v269_v63 = vld [vmem:[#allocation2 + $0x408] sm:$0xff]  ;;  %v271_v1 = vld [vmem:[#allocation2 + $0x418] sm:$0xff]  ;;  %v2668_v3 = vpack.c.bf16 %v264_v59, %v260_v58 }
  0xbc   :  { %v273_v0 = vld [vmem:[#allocation2 + $0x428] sm:$0xff]  ;;  %v275_v2 = vld [vmem:[#allocation2 + $0x438] sm:$0xff]  ;;  %v2892_v4 = vpack.c.bf16 %v266_v62, %v262_v60  ;;  %v272_v7 = vld [vmem:[#allocation2 + $0x420] sm:$0xff] }
  0xbd   :  { %2649 = vmatpush1.bf16.msra.mxu0 %v2648_v6  ;;  %v2670_v5 = vpack.c.bf16 %v273_v0, %v269_v63  ;;  %v268_v6 = vld [vmem:[#allocation2 + $0x400] sm:$0xff]  ;;  %v274_v10 = vld [vmem:[#allocation2 + $0x430] sm:$0xff]  ;;  %v277_v11 = vld [vmem:[#allocation2 + $0x448] sm:$0xff] }
  0xbe   :  { %2873 = vmatpush1.bf16.msra.mxu1 %v2872_v8  ;;  %2651 = vmatprep.subr.bf16.mxu0 %v2650_v9  ;;  %v270_v8 = vld [vmem:[#allocation2 + $0x410] sm:$0xff]  ;;  %v2894_v9 = vpack.c.bf16 %v275_v2, %v271_v1  ;;  %v281_v12 = vld [vmem:[#allocation2 + $0x468] sm:$0xff]  ;;  %v283_v14 = vld [vmem:[#allocation2 + $0x478] sm:$0xff]  ;;  %v2672_v16 = vpack.c.bf16 %v272_v7, %v268_v6 }
  0xbf   :  { %2875 = vmatprep.subr.bf16.mxu1 %v2874_v13  ;;  %v279_v13 = vld [vmem:[#allocation2 + $0x458] sm:$0xff]  ;;  %v133_v15 = vld [vmem:[%s4111_s0] sm:$0xff]  ;;  %v2896_v17 = vpack.c.bf16 %v274_v10, %v270_v8  ;;  %v2674_v18 = vpack.c.bf16 %v281_v12, %v277_v11  ;;  %v282_v23 = vld [vmem:[#allocation2 + $0x470] sm:$0xff] }
  0xc0   :  { %v2898_v22 = vpack.c.bf16 %v283_v14, %v279_v13  ;;  %v285_v24 = vld [vmem:[#allocation2 + $0x488] sm:$0xff]  ;;  %v287_v26 = vld [vmem:[#allocation2 + $0x498] sm:$0xff]  ;;  %v290_v35 = vld [vmem:[#allocation2 + $0x4b0] sm:$0xff] }
  0xc1   :  { %2653 = vmatpush1.bf16.msra.mxu0 %v2652_v19  ;;  %v276_v19 = vld [vmem:[#allocation2 + $0x440] sm:$0xff]  ;;  %v291_v27 = vld [vmem:[#allocation2 + $0x4b8] sm:$0xff]  ;;  %v293_v36 = vld [vmem:[#allocation2 + $0x4c8] sm:$0xff] }
  0xc2   :  { %2877 = vmatpush1.bf16.msra.mxu1 %v2876_v20  ;;  %2655 = vmatprep.subr.bf16.mxu0 %v2654_v21  ;;  %v280_v20 = vld [vmem:[#allocation2 + $0x460] sm:$0xff]  ;;  %v278_v21 = vld [vmem:[#allocation2 + $0x450] sm:$0xff]  ;;  %v2902_v34 = vpack.c.bf16 %v291_v27, %v287_v26  ;;  %v295_v38 = vld [vmem:[#allocation2 + $0x4d8] sm:$0xff] }
  0xc3   :  { %2879 = vmatprep.subr.bf16.mxu1 %v2878_v25  ;;  %v289_v25 = vld [vmem:[#allocation2 + $0x4a8] sm:$0xff]  ;;  %v2676_v28 = vpack.c.bf16 %v280_v20, %v276_v19  ;;  %v2900_v29 = vpack.c.bf16 %v282_v23, %v278_v21  ;;  %v299_v39 = vld [vmem:[#allocation2 + $0x4f8] sm:$0xff]  ;;  %v298_v47 = vld [vmem:[#allocation2 + $0x4f0] sm:$0xff] }
  0xc4   :  { %v2678_v30 = vpack.c.bf16 %v289_v25, %v285_v24  ;;  %v2906_v46 = vpack.c.bf16 %v299_v39, %v295_v38  ;;  %v301_v48 = vld [vmem:[#allocation2 + $0x508] sm:$0xff]  ;;  %v303_v50 = vld [vmem:[#allocation2 + $0x518] sm:$0xff]  ;;  %v306_v59 = vld [vmem:[#allocation2 + $0x530] sm:$0xff] }
  0xc5   :  { %2657 = vmatpush1.bf16.msra.mxu0 %v2656_v31  ;;  %v284_v31 = vld [vmem:[#allocation2 + $0x480] sm:$0xff]  ;;  %v307_v51 = vld [vmem:[#allocation2 + $0x538] sm:$0xff]  ;;  %v309_v60 = vld [vmem:[#allocation2 + $0x548] sm:$0xff] }
  0xc6   :  { %2881 = vmatpush1.bf16.msra.mxu1 %v2880_v32  ;;  %2659 = vmatprep.subr.bf16.mxu0 %v2658_v33  ;;  %v288_v32 = vld [vmem:[#allocation2 + $0x4a0] sm:$0xff]  ;;  %v286_v33 = vld [vmem:[#allocation2 + $0x490] sm:$0xff]  ;;  %v2910_v58 = vpack.c.bf16 %v307_v51, %v303_v50  ;;  %v311_v62 = vld [vmem:[#allocation2 + $0x558] sm:$0xff] }
  0xc7   :  { %2883 = vmatprep.subr.bf16.mxu1 %v2882_v37  ;;  %v297_v37 = vld [vmem:[#allocation2 + $0x4e8] sm:$0xff]  ;;  %v2680_v40 = vpack.c.bf16 %v288_v32, %v284_v31  ;;  %v2904_v41 = vpack.c.bf16 %v290_v35, %v286_v33  ;;  %v315_v63 = vld [vmem:[#allocation2 + $0x578] sm:$0xff]  ;;  %v314_v7 = vld [vmem:[#allocation2 + $0x570] sm:$0xff] }
  0xc8   :  { %v2682_v42 = vpack.c.bf16 %v297_v37, %v293_v36  ;;  %v2914_v6 = vpack.c.bf16 %v315_v63, %v311_v62  ;;  %v317_v8 = vld [vmem:[#allocation2 + $0x588] sm:$0xff]  ;;  %v319_v10 = vld [vmem:[#allocation2 + $0x598] sm:$0xff]  ;;  %v316_v13 = vld [vmem:[#allocation2 + $0x580] sm:$0xff] }
  0xc9   :  { %2661 = vmatpush1.bf16.msra.mxu0 %v2660_v43  ;;  %v292_v43 = vld [vmem:[#allocation2 + $0x4c0] sm:$0xff]  ;;  %v323_v11 = vld [vmem:[#allocation2 + $0x5b8] sm:$0xff]  ;;  %v325_v20 = vld [vmem:[#allocation2 + $0x5c8] sm:$0xff] }
  0xca   :  { %2885 = vmatpush1.bf16.msra.mxu1 %v2884_v44  ;;  %2663 = vmatprep.subr.bf16.mxu0 %v2662_v45  ;;  %v296_v44 = vld [vmem:[#allocation2 + $0x4e0] sm:$0xff]  ;;  %v294_v45 = vld [vmem:[#allocation2 + $0x4d0] sm:$0xff]  ;;  %v2918_v19 = vpack.c.bf16 %v323_v11, %v319_v10  ;;  %v329_v21 = vld [vmem:[#allocation2 + $0x5e8] sm:$0xff] }
  0xcb   :  { %2887 = vmatprep.subr.bf16.mxu1 %v2886_v49  ;;  %v305_v49 = vld [vmem:[#allocation2 + $0x528] sm:$0xff]  ;;  %v2684_v52 = vpack.c.bf16 %v296_v44, %v292_v43  ;;  %v2908_v53 = vpack.c.bf16 %v298_v47, %v294_v45  ;;  %v327_v23 = vld [vmem:[#allocation2 + $0x5d8] sm:$0xff]  ;;  %v2698_v27 = vpack.c.bf16 %v329_v21, %v325_v20  ;;  %v330_v32 = vld [vmem:[#allocation2 + $0x5f0] sm:$0xff] }
  0xcc   :  { %v2686_v54 = vpack.c.bf16 %v305_v49, %v301_v48  ;;  %v331_v24 = vld [vmem:[#allocation2 + $0x5f8] sm:$0xff]  ;;  %v333_v33 = vld [vmem:[#allocation2 + $0x608] sm:$0xff]  ;;  %v338_v44 = vld [vmem:[#allocation2 + $0x630] sm:$0xff] }
  0xcd   :  { %2665 = vmatpush1.bf16.msra.mxu0 %v2664_v55  ;;  %v300_v55 = vld [vmem:[#allocation2 + $0x500] sm:$0xff]  ;;  %v2922_v31 = vpack.c.bf16 %v331_v24, %v327_v23  ;;  %v335_v35 = vld [vmem:[#allocation2 + $0x618] sm:$0xff]  ;;  %v341_v45 = vld [vmem:[#allocation2 + $0x648] sm:$0xff] }
  0xce   :  { %2889 = vmatpush1.bf16.msra.mxu1 %v2888_v56  ;;  %2667 = vmatprep.subr.bf16.mxu0 %v2666_v57  ;;  %v304_v56 = vld [vmem:[#allocation2 + $0x520] sm:$0xff]  ;;  %v302_v57 = vld [vmem:[#allocation2 + $0x510] sm:$0xff]  ;;  %v339_v36 = vld [vmem:[#allocation2 + $0x638] sm:$0xff] }
  0xcf   :  { %2891 = vmatprep.subr.bf16.mxu1 %v2890_v61  ;;  %v313_v61 = vld [vmem:[#allocation2 + $0x568] sm:$0xff]  ;;  %v2688_v0 = vpack.c.bf16 %v304_v56, %v300_v55  ;;  %v2912_v1 = vpack.c.bf16 %v306_v59, %v302_v57  ;;  %v2926_v43 = vpack.c.bf16 %v339_v36, %v335_v35  ;;  %v343_v47 = vld [vmem:[#allocation2 + $0x658] sm:$0xff]  ;;  %v346_v56 = vld [vmem:[#allocation2 + $0x670] sm:$0xff] }
  0xd0   :  { %v2690_v2 = vpack.c.bf16 %v313_v61, %v309_v60  ;;  %v347_v48 = vld [vmem:[#allocation2 + $0x678] sm:$0xff]  ;;  %v349_v57 = vld [vmem:[#allocation2 + $0x688] sm:$0xff]  ;;  %v364_v24 = vld [vmem:[#allocation2 + $0x700] sm:$0xff] }
  0xd1   :  { %2669 = vmatpush1.bf16.msra.mxu0 %v2668_v3  ;;  %v308_v3 = vld [vmem:[#allocation2 + $0x540] sm:$0xff]  ;;  %v2930_v55 = vpack.c.bf16 %v347_v48, %v343_v47  ;;  %v351_v59 = vld [vmem:[#allocation2 + $0x698] sm:$0xff] }
  0xd2   :  { %2893 = vmatpush1.bf16.msra.mxu1 %v2892_v4  ;;  %2671 = vmatprep.subr.bf16.mxu0 %v2670_v5  ;;  %v312_v4 = vld [vmem:[#allocation2 + $0x560] sm:$0xff]  ;;  %v310_v5 = vld [vmem:[#allocation2 + $0x550] sm:$0xff]  ;;  %v355_v60 = vld [vmem:[#allocation2 + $0x6b8] sm:$0xff] }
  0xd3   :  { %2895 = vmatprep.subr.bf16.mxu1 %v2894_v9  ;;  %v321_v9 = vld [vmem:[#allocation2 + $0x5a8] sm:$0xff]  ;;  %v2692_v12 = vpack.c.bf16 %v312_v4, %v308_v3  ;;  %v2916_v14 = vpack.c.bf16 %v314_v7, %v310_v5  ;;  %v2934_v3 = vpack.c.bf16 %v355_v60, %v351_v59  ;;  %v354_v4 = vld [vmem:[#allocation2 + $0x6b0] sm:$0xff]  ;;  %v359_v7 = vld [vmem:[#allocation2 + $0x6d8] sm:$0xff] }
  0xd4   :  { %675 = vmatmul.mubr.f32.vlgmr.msra.gmra.mrb[0].mxu0 %v133_v15  ;;  %v357_v5 = vld [vmem:[#allocation2 + $0x6c8] sm:$0xff]  ;;  %v371_v20 = vld [vmem:[#allocation2 + $0x738] sm:$0xff]  ;;  %v372_v36 = vld [vmem:[#allocation2 + $0x740] sm:$0xff] }
  0xd5   :  { %2673 = vmatpush1.bf16.msra.mxu0 %v2672_v16  ;;  %959 = vmatmul.mubr.f32.vlgmr.msra.gmra.mrb[0].mxu1 %v133_v15  ;;  %v2694_v15 = vpack.c.bf16 %v321_v9, %v317_v8  ;;  %v320_v16 = vld [vmem:[#allocation2 + $0x5a0] sm:$0xff]  ;;  %v363_v8 = vld [vmem:[#allocation2 + $0x6f8] sm:$0xff] }
  0xd6   :  { %2897 = vmatpush1.bf16.msra.mxu1 %v2896_v17  ;;  %2675 = vmatprep.subr.bf16.mxu0 %v2674_v18  ;;  %v318_v17 = vld [vmem:[#allocation2 + $0x590] sm:$0xff]  ;;  %v2696_v25 = vpack.c.bf16 %v320_v16, %v316_v13  ;;  %v360_v13 = vld [vmem:[#allocation2 + $0x6e0] sm:$0xff] }
  0xd7   :  { %2899 = vmatprep.subr.bf16.mxu1 %v2898_v22  ;;  %v322_v18 = vld [vmem:[#allocation2 + $0x5b0] sm:$0xff]  ;;  %v136_v22 = vld [vmem:[%s4111_s0 + $0x18] sm:$0xff]  ;;  %v380_v48 = vld [vmem:[#allocation2 + $0x780] sm:$0xff] }
  0xd8   :  { %745 = vmatprep.mubr.f32.mxu0 %v136_v22  ;;  %1029 = vmatprep.mubr.f32.mxu1 %v136_v22  ;;  %v2920_v26 = vpack.c.bf16 %v322_v18, %v318_v17  ;;  %v362_v16 = vld [vmem:[#allocation2 + $0x6f0] sm:$0xff]  ;;  %v365_v17 = vld [vmem:[#allocation2 + $0x708] sm:$0xff]  ;;  %v388_v60 = vld [vmem:[#allocation2 + $0x7c0] sm:$0xff] }
  0xd9   :  { %2677 = vmatpush1.bf16.msra.mxu0 %v2676_v28  ;;  %v324_v28 = vld [vmem:[#allocation2 + $0x5c0] sm:$0xff]  ;;  %v369_v18 = vld [vmem:[#allocation2 + $0x728] sm:$0xff] }
  0xda   :  { %2901 = vmatpush1.bf16.msra.mxu1 %v2900_v29  ;;  %2679 = vmatprep.subr.bf16.mxu0 %v2678_v30  ;;  %v328_v29 = vld [vmem:[#allocation2 + $0x5e0] sm:$0xff]  ;;  %v326_v30 = vld [vmem:[#allocation2 + $0x5d0] sm:$0xff]  ;;  %v2718_v23 = vpack.c.bf16 %v369_v18, %v365_v17 }
  0xdb   :  { %2903 = vmatprep.subr.bf16.mxu1 %v2902_v34  ;;  %v337_v34 = vld [vmem:[#allocation2 + $0x628] sm:$0xff]  ;;  %v2700_v37 = vpack.c.bf16 %v328_v29, %v324_v28  ;;  %v2924_v38 = vpack.c.bf16 %v330_v32, %v326_v30  ;;  %v370_v28 = vld [vmem:[#allocation2 + $0x730] sm:$0xff]  ;;  %v379_v32 = vld [vmem:[#allocation2 + $0x778] sm:$0xff] }
  0xdc   :  { %v2702_v39 = vpack.c.bf16 %v337_v34, %v333_v33  ;;  %v373_v29 = vld [vmem:[#allocation2 + $0x748] sm:$0xff]  ;;  %v135_v17 = vld [vmem:[%s4111_s0 + $0x10] sm:$0xff] }
  0xdd   :  { %2681 = vmatpush1.bf16.msra.mxu0 %v2680_v40  ;;  %v332_v40 = vld [vmem:[#allocation2 + $0x600] sm:$0xff]  ;;  %v377_v30 = vld [vmem:[#allocation2 + $0x768] sm:$0xff] }
  0xde   :  { %2905 = vmatpush1.bf16.msra.mxu1 %v2904_v41  ;;  %2683 = vmatprep.subr.bf16.mxu0 %v2682_v42  ;;  %v336_v41 = vld [vmem:[#allocation2 + $0x620] sm:$0xff]  ;;  %v334_v42 = vld [vmem:[#allocation2 + $0x610] sm:$0xff]  ;;  %v2722_v35 = vpack.c.bf16 %v377_v30, %v373_v29  ;;  %v419_v29 = vld [vmem:[#allocation2 + $0x8b8] sm:$0xff] }
  0xdf   :  { %2907 = vmatprep.subr.bf16.mxu1 %v2906_v46  ;;  %v345_v46 = vld [vmem:[#allocation2 + $0x668] sm:$0xff]  ;;  %v2704_v49 = vpack.c.bf16 %v336_v41, %v332_v40  ;;  %v2928_v50 = vpack.c.bf16 %v338_v44, %v334_v42  ;;  %v378_v40 = vld [vmem:[#allocation2 + $0x770] sm:$0xff]  ;;  %v387_v44 = vld [vmem:[#allocation2 + $0x7b8] sm:$0xff] }
  0xe0   :  { %v2706_v51 = vpack.c.bf16 %v345_v46, %v341_v45  ;;  %v381_v41 = vld [vmem:[#allocation2 + $0x788] sm:$0xff] }
  0xe1   :  { %2685 = vmatpush1.bf16.msra.mxu0 %v2684_v52  ;;  %v340_v52 = vld [vmem:[#allocation2 + $0x640] sm:$0xff]  ;;  %v385_v42 = vld [vmem:[#allocation2 + $0x7a8] sm:$0xff] }
  0xe2   :  { %2909 = vmatpush1.bf16.msra.mxu1 %v2908_v53  ;;  %2687 = vmatprep.subr.bf16.mxu0 %v2686_v54  ;;  %v344_v53 = vld [vmem:[#allocation2 + $0x660] sm:$0xff]  ;;  %v342_v54 = vld [vmem:[#allocation2 + $0x650] sm:$0xff]  ;;  %v2726_v47 = vpack.c.bf16 %v385_v42, %v381_v41  ;;  %v138_v30 = vld [vmem:[%s4111_s0 + $0x28] sm:$0xff] }
  0xe3   :  { %2911 = vmatprep.subr.bf16.mxu1 %v2910_v58  ;;  %v353_v58 = vld [vmem:[#allocation2 + $0x6a8] sm:$0xff]  ;;  %v2708_v61 = vpack.c.bf16 %v344_v53, %v340_v52  ;;  %v2932_v62 = vpack.c.bf16 %v346_v56, %v342_v54  ;;  %v386_v52 = vld [vmem:[#allocation2 + $0x7b0] sm:$0xff]  ;;  %v395_v56 = vld [vmem:[#allocation2 + $0x7f8] sm:$0xff] }
  0xe4   :  { %v2710_v63 = vpack.c.bf16 %v353_v58, %v349_v57  ;;  %v389_v53 = vld [vmem:[#allocation2 + $0x7c8] sm:$0xff]  ;;  %v423_v41 = vld [vmem:[#allocation2 + $0x8d8] sm:$0xff] }
  0xe5   :  { %2689 = vmatpush1.bf16.msra.mxu0 %v2688_v0  ;;  %v348_v0 = vld [vmem:[#allocation2 + $0x680] sm:$0xff]  ;;  %v393_v54 = vld [vmem:[#allocation2 + $0x7e8] sm:$0xff]  ;;  %v427_v42 = vld [vmem:[#allocation2 + $0x8f8] sm:$0xff] }
  0xe6   :  { %2913 = vmatpush1.bf16.msra.mxu1 %v2912_v1  ;;  %2691 = vmatprep.subr.bf16.mxu0 %v2690_v2  ;;  %v352_v1 = vld [vmem:[#allocation2 + $0x6a0] sm:$0xff]  ;;  %v350_v2 = vld [vmem:[#allocation2 + $0x690] sm:$0xff]  ;;  %v2730_v59 = vpack.c.bf16 %v393_v54, %v389_v53  ;;  %v431_v53 = vld [vmem:[#allocation2 + $0x918] sm:$0xff] }
  0xe7   :  { %2915 = vmatprep.subr.bf16.mxu1 %v2914_v6  ;;  %v361_v6 = vld [vmem:[#allocation2 + $0x6e8] sm:$0xff]  ;;  %v2712_v9 = vpack.c.bf16 %v352_v1, %v348_v0  ;;  %v2936_v10 = vpack.c.bf16 %v354_v4, %v350_v2  ;;  %v394_v0 = vld [vmem:[#allocation2 + $0x7f0] sm:$0xff]  ;;  %v403_v4 = vld [vmem:[#allocation2 + $0x838] sm:$0xff] }
  0xe8   :  { %v2714_v11 = vpack.c.bf16 %v361_v6, %v357_v5  ;;  %v397_v1 = vld [vmem:[#allocation2 + $0x808] sm:$0xff]  ;;  %v435_v54 = vld [vmem:[#allocation2 + $0x938] sm:$0xff] }
  0xe9   :  { %2693 = vmatpush1.bf16.msra.mxu0 %v2692_v12  ;;  %v356_v12 = vld [vmem:[#allocation2 + $0x6c0] sm:$0xff]  ;;  %v401_v2 = vld [vmem:[#allocation2 + $0x828] sm:$0xff] }
  0xea   :  { %2917 = vmatpush1.bf16.msra.mxu1 %v2916_v14  ;;  %2695 = vmatprep.subr.bf16.mxu0 %v2694_v15  ;;  %v358_v14 = vld [vmem:[#allocation2 + $0x6d0] sm:$0xff]  ;;  %v2938_v15 = vpack.c.bf16 %v363_v8, %v359_v7  ;;  %v2716_v21 = vpack.c.bf16 %v360_v13, %v356_v12  ;;  %v2734_v7 = vpack.c.bf16 %v401_v2, %v397_v1  ;;  %v396_v8 = vld [vmem:[#allocation2 + $0x800] sm:$0xff]  ;;  %v405_v13 = vld [vmem:[#allocation2 + $0x848] sm:$0xff] }
  0xeb   :  { %2919 = vmatprep.subr.bf16.mxu1 %v2918_v19  ;;  %v367_v19 = vld [vmem:[#allocation2 + $0x718] sm:$0xff]  ;;  %v2940_v22 = vpack.c.bf16 %v362_v16, %v358_v14  ;;  %v402_v12 = vld [vmem:[#allocation2 + $0x830] sm:$0xff]  ;;  %v409_v14 = vld [vmem:[#allocation2 + $0x868] sm:$0xff] }
  0xec   :  { %v411_v16 = vld [vmem:[#allocation2 + $0x878] sm:$0xff] }
  0xed   :  { %2697 = vmatpush1.bf16.msra.mxu0 %v2696_v25  ;;  %v368_v25 = vld [vmem:[#allocation2 + $0x720] sm:$0xff]  ;;  %v439_v1 = vld [vmem:[#allocation2 + $0x958] sm:$0xff] }
  0xee   :  { %2921 = vmatpush1.bf16.msra.mxu1 %v2920_v26  ;;  %2699 = vmatprep.subr.bf16.mxu0 %v2698_v27  ;;  %v366_v26 = vld [vmem:[#allocation2 + $0x710] sm:$0xff]  ;;  %v2942_v27 = vpack.c.bf16 %v371_v20, %v367_v19  ;;  %v2720_v33 = vpack.c.bf16 %v368_v25, %v364_v24  ;;  %v2738_v20 = vpack.c.bf16 %v409_v14, %v405_v13  ;;  %v443_v2 = vld [vmem:[#allocation2 + $0x978] sm:$0xff] }
  0xef   :  { %2923 = vmatprep.subr.bf16.mxu1 %v2922_v31  ;;  %v375_v31 = vld [vmem:[#allocation2 + $0x758] sm:$0xff]  ;;  %v2944_v34 = vpack.c.bf16 %v370_v28, %v366_v26  ;;  %v410_v25 = vld [vmem:[#allocation2 + $0x870] sm:$0xff]  ;;  %v413_v26 = vld [vmem:[#allocation2 + $0x888] sm:$0xff] }
  0xf0   :  { %v415_v28 = vld [vmem:[#allocation2 + $0x898] sm:$0xff] }
  0xf1   :  { %2701 = vmatpush1.bf16.msra.mxu0 %v2700_v37  ;;  %v376_v37 = vld [vmem:[#allocation2 + $0x760] sm:$0xff]  ;;  %v447_v13 = vld [vmem:[#allocation2 + $0x998] sm:$0xff] }
  0xf2   :  { %2925 = vmatpush1.bf16.msra.mxu1 %v2924_v38  ;;  %2703 = vmatprep.subr.bf16.mxu0 %v2702_v39  ;;  %v374_v38 = vld [vmem:[#allocation2 + $0x750] sm:$0xff]  ;;  %v2946_v39 = vpack.c.bf16 %v379_v32, %v375_v31  ;;  %v2724_v45 = vpack.c.bf16 %v376_v37, %v372_v36  ;;  %v2966_v37 = vpack.c.bf16 %v419_v29, %v415_v28  ;;  %v451_v14 = vld [vmem:[#allocation2 + $0x9b8] sm:$0xff] }
  0xf3   :  { %2927 = vmatprep.subr.bf16.mxu1 %v2926_v43  ;;  %v383_v43 = vld [vmem:[#allocation2 + $0x798] sm:$0xff]  ;;  %v2948_v46 = vpack.c.bf16 %v378_v40, %v374_v38  ;;  %v414_v36 = vld [vmem:[#allocation2 + $0x890] sm:$0xff]  ;;  %v425_v40 = vld [vmem:[#allocation2 + $0x8e8] sm:$0xff] }
  0xf4   :  { %v418_v38 = vld [vmem:[#allocation2 + $0x8b0] sm:$0xff] }
  0xf5   :  { %2705 = vmatpush1.bf16.msra.mxu0 %v2704_v49  ;;  %v384_v49 = vld [vmem:[#allocation2 + $0x7a0] sm:$0xff] }
  0xf6   :  { %2929 = vmatpush1.bf16.msra.mxu1 %v2928_v50  ;;  %2707 = vmatprep.subr.bf16.mxu0 %v2706_v51  ;;  %v382_v50 = vld [vmem:[#allocation2 + $0x790] sm:$0xff]  ;;  %v2950_v51 = vpack.c.bf16 %v387_v44, %v383_v43  ;;  %v2728_v57 = vpack.c.bf16 %v384_v49, %v380_v48  ;;  %v2968_v44 = vpack.c.bf16 %v418_v38, %v414_v36  ;;  %v465_v36 = vld [vmem:[#allocation2 + $0xa28] sm:$0xff]  ;;  %v467_v38 = vld [vmem:[#allocation2 + $0xa38] sm:$0xff] }
  0xf7   :  { %2931 = vmatprep.subr.bf16.mxu1 %v2930_v55  ;;  %v391_v55 = vld [vmem:[#allocation2 + $0x7d8] sm:$0xff]  ;;  %v2952_v58 = vpack.c.bf16 %v386_v52, %v382_v50  ;;  %v422_v48 = vld [vmem:[#allocation2 + $0x8d0] sm:$0xff]  ;;  %v2970_v49 = vpack.c.bf16 %v427_v42, %v423_v41  ;;  %v433_v52 = vld [vmem:[#allocation2 + $0x928] sm:$0xff] }
  0xf8   :  { %v426_v50 = vld [vmem:[#allocation2 + $0x8f0] sm:$0xff]  ;;  %v460_v42 = vld [vmem:[#allocation2 + $0xa00] sm:$0xff] }
  0xf9   :  { %2709 = vmatpush1.bf16.msra.mxu0 %v2708_v61  ;;  %v392_v61 = vld [vmem:[#allocation2 + $0x7e0] sm:$0xff] }
  0xfa   :  { %2933 = vmatpush1.bf16.msra.mxu1 %v2932_v62  ;;  %2711 = vmatprep.subr.bf16.mxu0 %v2710_v63  ;;  %v390_v62 = vld [vmem:[#allocation2 + $0x7d0] sm:$0xff]  ;;  %v2954_v63 = vpack.c.bf16 %v395_v56, %v391_v55  ;;  %v2732_v5 = vpack.c.bf16 %v392_v61, %v388_v60  ;;  %v2972_v56 = vpack.c.bf16 %v426_v50, %v422_v48  ;;  %v473_v48 = vld [vmem:[#allocation2 + $0xa68] sm:$0xff]  ;;  %v475_v50 = vld [vmem:[#allocation2 + $0xa78] sm:$0xff] }
  0xfb   :  { %2935 = vmatprep.subr.bf16.mxu1 %v2934_v3  ;;  %v399_v3 = vld [vmem:[#allocation2 + $0x818] sm:$0xff]  ;;  %v2956_v6 = vpack.c.bf16 %v394_v0, %v390_v62  ;;  %v430_v60 = vld [vmem:[#allocation2 + $0x910] sm:$0xff]  ;;  %v2974_v61 = vpack.c.bf16 %v435_v54, %v431_v53  ;;  %v441_v0 = vld [vmem:[#allocation2 + $0x968] sm:$0xff] }
  0xfc   :  { %v434_v62 = vld [vmem:[#allocation2 + $0x930] sm:$0xff]  ;;  %v468_v54 = vld [vmem:[#allocation2 + $0xa40] sm:$0xff] }
  0xfd   :  { %2713 = vmatpush1.bf16.msra.mxu0 %v2712_v9  ;;  %v400_v9 = vld [vmem:[#allocation2 + $0x820] sm:$0xff] }
  0xfe   :  { %2937 = vmatpush1.bf16.msra.mxu1 %v2936_v10  ;;  %2715 = vmatprep.subr.bf16.mxu0 %v2714_v11  ;;  %v398_v10 = vld [vmem:[#allocation2 + $0x810] sm:$0xff]  ;;  %v2958_v11 = vpack.c.bf16 %v403_v4, %v399_v3  ;;  %v2736_v18 = vpack.c.bf16 %v400_v9, %v396_v8  ;;  %v2976_v4 = vpack.c.bf16 %v434_v62, %v430_v60  ;;  %v481_v60 = vld [vmem:[#allocation2 + $0xaa8] sm:$0xff]  ;;  %v483_v62 = vld [vmem:[#allocation2 + $0xab8] sm:$0xff] }
  0xff   :  { %2939 = vmatprep.subr.bf16.mxu1 %v2938_v15  ;;  %v407_v15 = vld [vmem:[#allocation2 + $0x858] sm:$0xff]  ;;  %v2960_v19 = vpack.c.bf16 %v402_v12, %v398_v10  ;;  %v438_v8 = vld [vmem:[#allocation2 + $0x950] sm:$0xff]  ;;  %v2978_v9 = vpack.c.bf16 %v443_v2, %v439_v1  ;;  %v449_v12 = vld [vmem:[#allocation2 + $0x9a8] sm:$0xff] }
 0x100   :  { %v2962_v24 = vpack.c.bf16 %v411_v16, %v407_v15  ;;  %v442_v10 = vld [vmem:[#allocation2 + $0x970] sm:$0xff]  ;;  %v476_v2 = vld [vmem:[#allocation2 + $0xa80] sm:$0xff] }
 0x101   :  { %2717 = vmatpush1.bf16.msra.mxu0 %v2716_v21  ;;  %v404_v21 = vld [vmem:[#allocation2 + $0x840] sm:$0xff]  ;;  %v2980_v16 = vpack.c.bf16 %v442_v10, %v438_v8  ;;  %v489_v8 = vld [vmem:[#allocation2 + $0xae8] sm:$0xff]  ;;  %v491_v10 = vld [vmem:[#allocation2 + $0xaf8] sm:$0xff] }
 0x102   :  { %2941 = vmatpush1.bf16.msra.mxu1 %v2940_v22  ;;  %2719 = vmatprep.subr.bf16.mxu0 %v2718_v23  ;;  %v408_v22 = vld [vmem:[#allocation2 + $0x860] sm:$0xff]  ;;  %v406_v23 = vld [vmem:[#allocation2 + $0x850] sm:$0xff] }
 0x103   :  { %2943 = vmatprep.subr.bf16.mxu1 %v2942_v27  ;;  %v417_v27 = vld [vmem:[#allocation2 + $0x8a8] sm:$0xff]  ;;  %v2740_v31 = vpack.c.bf16 %v408_v22, %v404_v21  ;;  %v2964_v32 = vpack.c.bf16 %v410_v25, %v406_v23  ;;  %v2982_v21 = vpack.c.bf16 %v451_v14, %v447_v13  ;;  %v450_v22 = vld [vmem:[#allocation2 + $0x9b0] sm:$0xff]  ;;  %v455_v25 = vld [vmem:[#allocation2 + $0x9d8] sm:$0xff] }
 0x104   :  { %v453_v23 = vld [vmem:[#allocation2 + $0x9c8] sm:$0xff]  ;;  %v484_v14 = vld [vmem:[#allocation2 + $0xac0] sm:$0xff] }
 0x105   :  { %2721 = vmatpush1.bf16.msra.mxu0 %v2720_v33  ;;  %v2742_v33 = vpack.c.bf16 %v417_v27, %v413_v26  ;;  %v459_v26 = vld [vmem:[#allocation2 + $0x9f8] sm:$0xff] }
 0x106   :  { %2945 = vmatpush1.bf16.msra.mxu1 %v2944_v34  ;;  %2723 = vmatprep.subr.bf16.mxu0 %v2722_v35  ;;  %v412_v34 = vld [vmem:[#allocation2 + $0x880] sm:$0xff] }
 0x107   :  { %2947 = vmatprep.subr.bf16.mxu1 %v2946_v39  ;;  %v416_v35 = vld [vmem:[#allocation2 + $0x8a0] sm:$0xff]  ;;  %v421_v39 = vld [vmem:[#allocation2 + $0x8c8] sm:$0xff] }
 0x108   :  { %v2744_v43 = vpack.c.bf16 %v416_v35, %v412_v34  ;;  %v458_v34 = vld [vmem:[#allocation2 + $0x9f0] sm:$0xff]  ;;  %v461_v35 = vld [vmem:[#allocation2 + $0xa08] sm:$0xff] }
 0x109   :  { %2725 = vmatpush1.bf16.msra.mxu0 %v2724_v45  ;;  %v2746_v45 = vpack.c.bf16 %v425_v40, %v421_v39  ;;  %v2766_v41 = vpack.c.bf16 %v465_v36, %v461_v35 }
 0x10a   :  { %2949 = vmatpush1.bf16.msra.mxu1 %v2948_v46  ;;  %2727 = vmatprep.subr.bf16.mxu0 %v2726_v47  ;;  %v420_v46 = vld [vmem:[#allocation2 + $0x8c0] sm:$0xff] }
 0x10b   :  { %2951 = vmatprep.subr.bf16.mxu1 %v2950_v51  ;;  %v424_v47 = vld [vmem:[#allocation2 + $0x8e0] sm:$0xff]  ;;  %v429_v51 = vld [vmem:[#allocation2 + $0x908] sm:$0xff] }
 0x10c   :  { %v2748_v55 = vpack.c.bf16 %v424_v47, %v420_v46  ;;  %v466_v46 = vld [vmem:[#allocation2 + $0xa30] sm:$0xff]  ;;  %v469_v47 = vld [vmem:[#allocation2 + $0xa48] sm:$0xff] }
 0x10d   :  { %2729 = vmatpush1.bf16.msra.mxu0 %v2728_v57  ;;  %v2750_v57 = vpack.c.bf16 %v433_v52, %v429_v51  ;;  %v2770_v53 = vpack.c.bf16 %v473_v48, %v469_v47 }
 0x10e   :  { %2953 = vmatpush1.bf16.msra.mxu1 %v2952_v58  ;;  %2731 = vmatprep.subr.bf16.mxu0 %v2730_v59  ;;  %v428_v58 = vld [vmem:[#allocation2 + $0x900] sm:$0xff] }
 0x10f   :  { %2955 = vmatprep.subr.bf16.mxu1 %v2954_v63  ;;  %v432_v59 = vld [vmem:[#allocation2 + $0x920] sm:$0xff]  ;;  %v437_v63 = vld [vmem:[#allocation2 + $0x948] sm:$0xff] }
 0x110   :  { %v2752_v3 = vpack.c.bf16 %v432_v59, %v428_v58  ;;  %v474_v58 = vld [vmem:[#allocation2 + $0xa70] sm:$0xff]  ;;  %v477_v59 = vld [vmem:[#allocation2 + $0xa88] sm:$0xff] }
 0x111   :  { %2733 = vmatpush1.bf16.msra.mxu0 %v2732_v5  ;;  %v2754_v5 = vpack.c.bf16 %v441_v0, %v437_v63  ;;  %v2774_v1 = vpack.c.bf16 %v481_v60, %v477_v59 }
 0x112   :  { %2957 = vmatpush1.bf16.msra.mxu1 %v2956_v6  ;;  %2735 = vmatprep.subr.bf16.mxu0 %v2734_v7  ;;  %v436_v6 = vld [vmem:[#allocation2 + $0x940] sm:$0xff] }
 0x113   :  { %2959 = vmatprep.subr.bf16.mxu1 %v2958_v11  ;;  %v440_v7 = vld [vmem:[#allocation2 + $0x960] sm:$0xff]  ;;  %v445_v11 = vld [vmem:[#allocation2 + $0x988] sm:$0xff] }
 0x114   :  { %746 = vmatmul.mubr.f32.vlgmr.msra.gmra.mrb[0].mxu0 %v135_v17  ;;  %v2756_v15 = vpack.c.bf16 %v440_v7, %v436_v6  ;;  %v482_v6 = vld [vmem:[#allocation2 + $0xab0] sm:$0xff]  ;;  %v485_v7 = vld [vmem:[#allocation2 + $0xac8] sm:$0xff] }
 0x115   :  { %2737 = vmatpush1.bf16.msra.mxu0 %v2736_v18  ;;  %1030 = vmatmul.mubr.f32.vlgmr.msra.gmra.mrb[0].mxu1 %v135_v17  ;;  %v2758_v17 = vpack.c.bf16 %v449_v12, %v445_v11  ;;  %v444_v18 = vld [vmem:[#allocation2 + $0x980] sm:$0xff]  ;;  %v2778_v13 = vpack.c.bf16 %v489_v8, %v485_v7 }
 0x116   :  { %2961 = vmatpush1.bf16.msra.mxu1 %v2960_v19  ;;  %2739 = vmatprep.subr.bf16.mxu0 %v2738_v20  ;;  %v448_v19 = vld [vmem:[#allocation2 + $0x9a0] sm:$0xff]  ;;  %v446_v20 = vld [vmem:[#allocation2 + $0x990] sm:$0xff] }
 0x117   :  { %2963 = vmatprep.subr.bf16.mxu1 %v2962_v24  ;;  %816 = vmatprep.mubr.f32.mxu0 %v138_v30  ;;  %v457_v24 = vld [vmem:[#allocation2 + $0x9e8] sm:$0xff]  ;;  %v2760_v27 = vpack.c.bf16 %v448_v19, %v444_v18  ;;  %v2984_v28 = vpack.c.bf16 %v450_v22, %v446_v20  ;;  %v490_v18 = vld [vmem:[#allocation2 + $0xaf0] sm:$0xff]  ;;  %v499_v22 = vld [vmem:[#allocation2 + $0xb38] sm:$0xff] }
 0x118   :  { %1100 = vmatprep.mubr.f32.mxu1 %v138_v30  ;;  %v2762_v29 = vpack.c.bf16 %v457_v24, %v453_v23  ;;  %v452_v30 = vld [vmem:[#allocation2 + $0x9c0] sm:$0xff]  ;;  %v493_v19 = vld [vmem:[#allocation2 + $0xb08] sm:$0xff] }
 0x119   :  { %2741 = vmatpush1.bf16.msra.mxu0 %v2740_v31  ;;  %v456_v31 = vld [vmem:[#allocation2 + $0x9e0] sm:$0xff]  ;;  %v497_v20 = vld [vmem:[#allocation2 + $0xb28] sm:$0xff] }
 0x11a   :  { %2965 = vmatpush1.bf16.msra.mxu1 %v2964_v32  ;;  %2743 = vmatprep.subr.bf16.mxu0 %v2742_v33  ;;  %v454_v32 = vld [vmem:[#allocation2 + $0x9d0] sm:$0xff]  ;;  %v2986_v33 = vpack.c.bf16 %v459_v26, %v455_v25  ;;  %v2764_v39 = vpack.c.bf16 %v456_v31, %v452_v30  ;;  %v2782_v25 = vpack.c.bf16 %v497_v20, %v493_v19  ;;  %v492_v26 = vld [vmem:[#allocation2 + $0xb00] sm:$0xff]  ;;  %v501_v31 = vld [vmem:[#allocation2 + $0xb48] sm:$0xff] }
 0x11b   :  { %2967 = vmatprep.subr.bf16.mxu1 %v2966_v37  ;;  %v463_v37 = vld [vmem:[#allocation2 + $0xa18] sm:$0xff]  ;;  %v2988_v40 = vpack.c.bf16 %v458_v34, %v454_v32  ;;  %v498_v30 = vld [vmem:[#allocation2 + $0xb30] sm:$0xff]  ;;  %v505_v32 = vld [vmem:[#allocation2 + $0xb68] sm:$0xff] }
 0x11c   :  { %v507_v34 = vld [vmem:[#allocation2 + $0xb78] sm:$0xff]  ;;  %v137_v19 = vld [vmem:[%s4111_s0 + $0x20] sm:$0xff] }
 0x11d   :  { %2745 = vmatpush1.bf16.msra.mxu0 %v2744_v43  ;;  %v464_v43 = vld [vmem:[#allocation2 + $0xa20] sm:$0xff] }
 0x11e   :  { %2969 = vmatpush1.bf16.msra.mxu1 %v2968_v44  ;;  %2747 = vmatprep.subr.bf16.mxu0 %v2746_v45  ;;  %v462_v44 = vld [vmem:[#allocation2 + $0xa10] sm:$0xff]  ;;  %v2990_v45 = vpack.c.bf16 %v467_v38, %v463_v37  ;;  %v2768_v51 = vpack.c.bf16 %v464_v43, %v460_v42  ;;  %v2786_v37 = vpack.c.bf16 %v505_v32, %v501_v31  ;;  %v500_v38 = vld [vmem:[#allocation2 + $0xb40] sm:$0xff]  ;;  %v509_v43 = vld [vmem:[#allocation2 + $0xb88] sm:$0xff] }
 0x11f   :  { %2971 = vmatprep.subr.bf16.mxu1 %v2970_v49  ;;  %v471_v49 = vld [vmem:[#allocation2 + $0xa58] sm:$0xff]  ;;  %v2992_v52 = vpack.c.bf16 %v466_v46, %v462_v44  ;;  %v506_v42 = vld [vmem:[#allocation2 + $0xb70] sm:$0xff]  ;;  %v513_v44 = vld [vmem:[#allocation2 + $0xba8] sm:$0xff] }
 0x120   :  { %v515_v46 = vld [vmem:[#allocation2 + $0xbb8] sm:$0xff] }
 0x121   :  { %2749 = vmatpush1.bf16.msra.mxu0 %v2748_v55  ;;  %v472_v55 = vld [vmem:[#allocation2 + $0xa60] sm:$0xff]  ;;  %v547_v31 = vld [vmem:[#allocation2 + $0xcb8] sm:$0xff] }
 0x122   :  { %2973 = vmatpush1.bf16.msra.mxu1 %v2972_v56  ;;  %2751 = vmatprep.subr.bf16.mxu0 %v2750_v57  ;;  %v470_v56 = vld [vmem:[#allocation2 + $0xa50] sm:$0xff]  ;;  %v2994_v57 = vpack.c.bf16 %v475_v50, %v471_v49  ;;  %v2772_v63 = vpack.c.bf16 %v472_v55, %v468_v54  ;;  %v2790_v49 = vpack.c.bf16 %v513_v44, %v509_v43  ;;  %v508_v50 = vld [vmem:[#allocation2 + $0xb80] sm:$0xff]  ;;  %v517_v55 = vld [vmem:[#allocation2 + $0xbc8] sm:$0xff] }
 0x123   :  { %2975 = vmatprep.subr.bf16.mxu1 %v2974_v61  ;;  %v479_v61 = vld [vmem:[#allocation2 + $0xa98] sm:$0xff]  ;;  %v2996_v0 = vpack.c.bf16 %v474_v58, %v470_v56  ;;  %v514_v54 = vld [vmem:[#allocation2 + $0xbb0] sm:$0xff]  ;;  %v521_v56 = vld [vmem:[#allocation2 + $0xbe8] sm:$0xff] }
 0x124   :  { %v523_v58 = vld [vmem:[#allocation2 + $0xbf8] sm:$0xff] }
 0x125   :  { %2753 = vmatpush1.bf16.msra.mxu0 %v2752_v3  ;;  %v480_v3 = vld [vmem:[#allocation2 + $0xaa0] sm:$0xff]  ;;  %v551_v43 = vld [vmem:[#allocation2 + $0xcd8] sm:$0xff] }
 0x126   :  { %2977 = vmatpush1.bf16.msra.mxu1 %v2976_v4  ;;  %2755 = vmatprep.subr.bf16.mxu0 %v2754_v5  ;;  %v478_v4 = vld [vmem:[#allocation2 + $0xa90] sm:$0xff]  ;;  %v2998_v5 = vpack.c.bf16 %v483_v62, %v479_v61  ;;  %v2776_v11 = vpack.c.bf16 %v480_v3, %v476_v2  ;;  %v2794_v61 = vpack.c.bf16 %v521_v56, %v517_v55  ;;  %v516_v62 = vld [vmem:[#allocation2 + $0xbc0] sm:$0xff]  ;;  %v525_v3 = vld [vmem:[#allocation2 + $0xc08] sm:$0xff] }
 0x127   :  { %2979 = vmatprep.subr.bf16.mxu1 %v2978_v9  ;;  %v487_v9 = vld [vmem:[#allocation2 + $0xad8] sm:$0xff]  ;;  %v3000_v12 = vpack.c.bf16 %v482_v6, %v478_v4  ;;  %v522_v2 = vld [vmem:[#allocation2 + $0xbf0] sm:$0xff]  ;;  %v529_v4 = vld [vmem:[#allocation2 + $0xc28] sm:$0xff] }
 0x128   :  { %v531_v6 = vld [vmem:[#allocation2 + $0xc38] sm:$0xff] }
 0x129   :  { %2757 = vmatpush1.bf16.msra.mxu0 %v2756_v15  ;;  %v488_v15 = vld [vmem:[#allocation2 + $0xae0] sm:$0xff]  ;;  %v555_v44 = vld [vmem:[#allocation2 + $0xcf8] sm:$0xff] }
 0x12a   :  { %2981 = vmatpush1.bf16.msra.mxu1 %v2980_v16  ;;  %2759 = vmatprep.subr.bf16.mxu0 %v2758_v17  ;;  %v486_v16 = vld [vmem:[#allocation2 + $0xad0] sm:$0xff]  ;;  %v3002_v17 = vpack.c.bf16 %v491_v10, %v487_v9  ;;  %v2780_v23 = vpack.c.bf16 %v488_v15, %v484_v14  ;;  %v2798_v9 = vpack.c.bf16 %v529_v4, %v525_v3  ;;  %v524_v10 = vld [vmem:[#allocation2 + $0xc00] sm:$0xff]  ;;  %v533_v15 = vld [vmem:[#allocation2 + $0xc48] sm:$0xff] }
 0x12b   :  { %2983 = vmatprep.subr.bf16.mxu1 %v2982_v21  ;;  %v495_v21 = vld [vmem:[#allocation2 + $0xb18] sm:$0xff]  ;;  %v3004_v24 = vpack.c.bf16 %v490_v18, %v486_v16  ;;  %v530_v14 = vld [vmem:[#allocation2 + $0xc30] sm:$0xff]  ;;  %v537_v16 = vld [vmem:[#allocation2 + $0xc68] sm:$0xff] }
 0x12c   :  { %v539_v18 = vld [vmem:[#allocation2 + $0xc78] sm:$0xff] }
 0x12d   :  { %2761 = vmatpush1.bf16.msra.mxu0 %v2760_v27  ;;  %v496_v27 = vld [vmem:[#allocation2 + $0xb20] sm:$0xff]  ;;  %v559_v55 = vld [vmem:[#allocation2 + $0xd18] sm:$0xff] }
 0x12e   :  { %2985 = vmatpush1.bf16.msra.mxu1 %v2984_v28  ;;  %2763 = vmatprep.subr.bf16.mxu0 %v2762_v29  ;;  %v494_v28 = vld [vmem:[#allocation2 + $0xb10] sm:$0xff]  ;;  %v3006_v29 = vpack.c.bf16 %v499_v22, %v495_v21  ;;  %v2784_v35 = vpack.c.bf16 %v496_v27, %v492_v26  ;;  %v2802_v22 = vpack.c.bf16 %v537_v16, %v533_v15  ;;  %v563_v56 = vld [vmem:[#allocation2 + $0xd38] sm:$0xff] }
 0x12f   :  { %2987 = vmatprep.subr.bf16.mxu1 %v2986_v33  ;;  %v503_v33 = vld [vmem:[#allocation2 + $0xb58] sm:$0xff]  ;;  %v3008_v36 = vpack.c.bf16 %v498_v30, %v494_v28  ;;  %v538_v27 = vld [vmem:[#allocation2 + $0xc70] sm:$0xff]  ;;  %v541_v28 = vld [vmem:[#allocation2 + $0xc88] sm:$0xff] }
 0x130   :  { %v543_v30 = vld [vmem:[#allocation2 + $0xc98] sm:$0xff] }
 0x131   :  { %2765 = vmatpush1.bf16.msra.mxu0 %v2764_v39  ;;  %v504_v39 = vld [vmem:[#allocation2 + $0xb60] sm:$0xff]  ;;  %v567_v3 = vld [vmem:[#allocation2 + $0xd58] sm:$0xff] }
 0x132   :  { %2989 = vmatpush1.bf16.msra.mxu1 %v2988_v40  ;;  %2767 = vmatprep.subr.bf16.mxu0 %v2766_v41  ;;  %v502_v40 = vld [vmem:[#allocation2 + $0xb50] sm:$0xff]  ;;  %v3010_v41 = vpack.c.bf16 %v507_v34, %v503_v33  ;;  %v2788_v47 = vpack.c.bf16 %v504_v39, %v500_v38  ;;  %v3030_v38 = vpack.c.bf16 %v547_v31, %v543_v30  ;;  %v571_v4 = vld [vmem:[#allocation2 + $0xd78] sm:$0xff] }
 0x133   :  { %2991 = vmatprep.subr.bf16.mxu1 %v2990_v45  ;;  %v511_v45 = vld [vmem:[#allocation2 + $0xb98] sm:$0xff]  ;;  %v3012_v48 = vpack.c.bf16 %v506_v42, %v502_v40  ;;  %v546_v39 = vld [vmem:[#allocation2 + $0xcb0] sm:$0xff]  ;;  %v549_v40 = vld [vmem:[#allocation2 + $0xcc8] sm:$0xff]  ;;  %v3873_v42 = vmov 0.0  }
 0x134   :  { %v575_v15 = vld [vmem:[#allocation2 + $0xd98] sm:$0xff] }
 0x135   :  { %2769 = vmatpush1.bf16.msra.mxu0 %v2768_v51  ;;  %v512_v51 = vld [vmem:[#allocation2 + $0xba0] sm:$0xff]  ;;  %v579_v16 = vld [vmem:[#allocation2 + $0xdb8] sm:$0xff] }
 0x136   :  { %2993 = vmatpush1.bf16.msra.mxu1 %v2992_v52  ;;  %2771 = vmatprep.subr.bf16.mxu0 %v2770_v53  ;;  %v510_v52 = vld [vmem:[#allocation2 + $0xb90] sm:$0xff]  ;;  %v3014_v53 = vpack.c.bf16 %v515_v46, %v511_v45  ;;  %v2792_v59 = vpack.c.bf16 %v512_v51, %v508_v50  ;;  %v3034_v51 = vpack.c.bf16 %v555_v44, %v551_v43  ;;  %v1182_v44 = vld [vmem:[#allocation6] sm:$0xff] }
 0x137   :  { %2995 = vmatprep.subr.bf16.mxu1 %v2994_v57  ;;  %v519_v57 = vld [vmem:[#allocation2 + $0xbd8] sm:$0xff]  ;;  %v3016_v60 = vpack.c.bf16 %v514_v54, %v510_v52  ;;  %v550_v50 = vld [vmem:[#allocation2 + $0xcd0] sm:$0xff]  ;;  %v561_v54 = vld [vmem:[#allocation2 + $0xd28] sm:$0xff] }
 0x138   :  { %v554_v52 = vld [vmem:[#allocation2 + $0xcf0] sm:$0xff] }
 0x139   :  { %2773 = vmatpush1.bf16.msra.mxu0 %v2772_v63  ;;  %v520_v63 = vld [vmem:[#allocation2 + $0xbe0] sm:$0xff] }
 0x13a   :  { %2997 = vmatpush1.bf16.msra.mxu1 %v2996_v0  ;;  %2775 = vmatprep.subr.bf16.mxu0 %v2774_v1  ;;  %v518_v0 = vld [vmem:[#allocation2 + $0xbd0] sm:$0xff]  ;;  %v3018_v1 = vpack.c.bf16 %v523_v58, %v519_v57  ;;  %v2796_v7 = vpack.c.bf16 %v520_v63, %v516_v62  ;;  %v3036_v58 = vpack.c.bf16 %v554_v52, %v550_v50  ;;  %v1197_v52 = vld [vmem:[#allocation6 + $0x78] sm:$0xff] }
 0x13b   :  { %2999 = vmatprep.subr.bf16.mxu1 %v2998_v5  ;;  %v527_v5 = vld [vmem:[#allocation2 + $0xc18] sm:$0xff]  ;;  %v3020_v8 = vpack.c.bf16 %v522_v2, %v518_v0  ;;  %v558_v62 = vld [vmem:[#allocation2 + $0xd10] sm:$0xff]  ;;  %v3038_v63 = vpack.c.bf16 %v563_v56, %v559_v55  ;;  %v569_v2 = vld [vmem:[#allocation2 + $0xd68] sm:$0xff] }
 0x13c   :  { %v562_v0 = vld [vmem:[#allocation2 + $0xd30] sm:$0xff] }
 0x13d   :  { %2777 = vmatpush1.bf16.msra.mxu0 %v2776_v11  ;;  %v528_v11 = vld [vmem:[#allocation2 + $0xc20] sm:$0xff]  ;;  %v1195_v50 = vld [vmem:[#allocation6 + $0x68] sm:$0xff] }
 0x13e   :  { %3001 = vmatpush1.bf16.msra.mxu1 %v3000_v12  ;;  %2779 = vmatprep.subr.bf16.mxu0 %v2778_v13  ;;  %v526_v12 = vld [vmem:[#allocation2 + $0xc10] sm:$0xff]  ;;  %v3022_v13 = vpack.c.bf16 %v531_v6, %v527_v5  ;;  %v2800_v20 = vpack.c.bf16 %v528_v11, %v524_v10  ;;  %v3040_v6 = vpack.c.bf16 %v562_v0, %v558_v62  ;;  %v1201_v0 = vld [vmem:[#allocation6 + $0x98] sm:$0xff] }
 0x13f   :  { %3003 = vmatprep.subr.bf16.mxu1 %v3002_v17  ;;  %v535_v17 = vld [vmem:[#allocation2 + $0xc58] sm:$0xff]  ;;  %v3024_v21 = vpack.c.bf16 %v530_v14, %v526_v12  ;;  %v566_v10 = vld [vmem:[#allocation2 + $0xd50] sm:$0xff]  ;;  %v3042_v11 = vpack.c.bf16 %v571_v4, %v567_v3  ;;  %v577_v14 = vld [vmem:[#allocation2 + $0xda8] sm:$0xff] }
 0x140   :  { %v3026_v26 = vpack.c.bf16 %v539_v18, %v535_v17  ;;  %v570_v12 = vld [vmem:[#allocation2 + $0xd70] sm:$0xff] }
 0x141   :  { %2781 = vmatpush1.bf16.msra.mxu0 %v2780_v23  ;;  %v532_v23 = vld [vmem:[#allocation2 + $0xc40] sm:$0xff]  ;;  %v3044_v18 = vpack.c.bf16 %v570_v12, %v566_v10  ;;  %v1199_v62 = vld [vmem:[#allocation6 + $0x88] sm:$0xff] }
 0x142   :  { %3005 = vmatpush1.bf16.msra.mxu1 %v3004_v24  ;;  %2783 = vmatprep.subr.bf16.mxu0 %v2782_v25  ;;  %v536_v24 = vld [vmem:[#allocation2 + $0xc60] sm:$0xff]  ;;  %v534_v25 = vld [vmem:[#allocation2 + $0xc50] sm:$0xff] }
 0x143   :  { %3007 = vmatprep.subr.bf16.mxu1 %v3006_v29  ;;  %v545_v29 = vld [vmem:[#allocation2 + $0xca8] sm:$0xff]  ;;  %v2804_v32 = vpack.c.bf16 %v536_v24, %v532_v23  ;;  %v3028_v33 = vpack.c.bf16 %v538_v27, %v534_v25  ;;  %v3046_v23 = vpack.c.bf16 %v579_v16, %v575_v15  ;;  %v578_v24 = vld [vmem:[#allocation2 + $0xdb0] sm:$0xff]  ;;  %v583_v27 = vld [vmem:[#allocation2 + $0xdd8] sm:$0xff] }
 0x144   :  { %v2806_v34 = vpack.c.bf16 %v545_v29, %v541_v28  ;;  %v581_v25 = vld [vmem:[#allocation2 + $0xdc8] sm:$0xff]  ;;  %v587_v28 = vld [vmem:[#allocation2 + $0xdf8] sm:$0xff] }
 0x145   :  { %2785 = vmatpush1.bf16.msra.mxu0 %v2784_v35  ;;  %v540_v35 = vld [vmem:[#allocation2 + $0xc80] sm:$0xff]  ;;  %v1207_v10 = vld [vmem:[#allocation6 + $0xc8] sm:$0xff] }
 0x146   :  { %3009 = vmatpush1.bf16.msra.mxu1 %v3008_v36  ;;  %2787 = vmatprep.subr.bf16.mxu0 %v2786_v37  ;;  %v544_v36 = vld [vmem:[#allocation2 + $0xca0] sm:$0xff]  ;;  %v542_v37 = vld [vmem:[#allocation2 + $0xc90] sm:$0xff] }
 0x147   :  { %3011 = vmatprep.subr.bf16.mxu1 %v3010_v41  ;;  %v553_v41 = vld [vmem:[#allocation2 + $0xce8] sm:$0xff]  ;;  %v2808_v45 = vpack.c.bf16 %v544_v36, %v540_v35  ;;  %v3032_v46 = vpack.c.bf16 %v546_v39, %v542_v37  ;;  %v3050_v35 = vpack.c.bf16 %v587_v28, %v583_v27  ;;  %v586_v36 = vld [vmem:[#allocation2 + $0xdf0] sm:$0xff]  ;;  %v1185_v39 = vld [vmem:[#allocation6 + $0x18] sm:$0xff] }
 0x148   :  { %v1183_v37 = vld [vmem:[#allocation6 + $0x8] sm:$0xff]  ;;  %v1209_v12 = vld [vmem:[#allocation6 + $0xd8] sm:$0xff] }
 0x149   :  { %2789 = vmatpush1.bf16.msra.mxu0 %v2788_v47  ;;  %v2810_v47 = vpack.c.bf16 %v553_v41, %v549_v40  ;;  %v1189_v40 = vld [vmem:[#allocation6 + $0x38] sm:$0xff] }
 0x14a   :  { %3013 = vmatpush1.bf16.msra.mxu1 %v3012_v48  ;;  %2791 = vmatprep.subr.bf16.mxu0 %v2790_v49  ;;  %v548_v48 = vld [vmem:[#allocation2 + $0xcc0] sm:$0xff] }
 0x14b   :  { %3015 = vmatprep.subr.bf16.mxu1 %v3014_v53  ;;  %v552_v49 = vld [vmem:[#allocation2 + $0xce0] sm:$0xff]  ;;  %v557_v53 = vld [vmem:[#allocation2 + $0xd08] sm:$0xff] }
 0x14c   :  { %v2812_v57 = vpack.c.bf16 %v552_v49, %v548_v48  ;;  %v1188_v48 = vld [vmem:[#allocation6 + $0x30] sm:$0xff]  ;;  %v1191_v49 = vld [vmem:[#allocation6 + $0x48] sm:$0xff] }
 0x14d   :  { %2793 = vmatpush1.bf16.msra.mxu0 %v2792_v59  ;;  %v2814_v59 = vpack.c.bf16 %v561_v54, %v557_v53  ;;  %v139_v53 = vld [vmem:[%s4111_s0 + $0x30] sm:$0xff]  ;;  %v3058_v56 = vpack.c.bf16 %v1195_v50, %v1191_v49  ;;  %v1237_v49 = vld [vmem:[#allocation6 + $0x1b8] sm:$0xff] }
 0x14e   :  { %3017 = vmatpush1.bf16.msra.mxu1 %v3016_v60  ;;  %2795 = vmatprep.subr.bf16.mxu0 %v2794_v61  ;;  %v556_v60 = vld [vmem:[#allocation2 + $0xd00] sm:$0xff] }
 0x14f   :  { %3019 = vmatprep.subr.bf16.mxu1 %v3018_v1  ;;  %v560_v61 = vld [vmem:[#allocation2 + $0xd20] sm:$0xff]  ;;  %v565_v1 = vld [vmem:[#allocation2 + $0xd48] sm:$0xff] }
 0x150   :  { %v2816_v5 = vpack.c.bf16 %v560_v61, %v556_v60  ;;  %v1196_v61 = vld [vmem:[#allocation6 + $0x70] sm:$0xff] }
 0x151   :  { %2797 = vmatpush1.bf16.msra.mxu0 %v2796_v7  ;;  %v2818_v7 = vpack.c.bf16 %v569_v2, %v565_v1  ;;  %v1205_v1 = vld [vmem:[#allocation6 + $0xb8] sm:$0xff] }
 0x152   :  { %3021 = vmatpush1.bf16.msra.mxu1 %v3020_v8  ;;  %2799 = vmatprep.subr.bf16.mxu0 %v2798_v9  ;;  %v564_v8 = vld [vmem:[#allocation2 + $0xd40] sm:$0xff] }
 0x153   :  { %3023 = vmatprep.subr.bf16.mxu1 %v3022_v13  ;;  %v568_v9 = vld [vmem:[#allocation2 + $0xd60] sm:$0xff]  ;;  %v573_v13 = vld [vmem:[#allocation2 + $0xd88] sm:$0xff] }
 0x154   :  { %817 = vmatmul.mubr.f32.vlgmr.msra.gmra.mrb[0].mxu0 %v137_v19  ;;  %v2820_v17 = vpack.c.bf16 %v568_v9, %v564_v8  ;;  %v3190_v8 = vpack.c.bf16 %v1205_v1, %v1201_v0  ;;  %v1204_v9 = vld [vmem:[#allocation6 + $0xb0] sm:$0xff]  ;;  %v1238_v1 = vld [vmem:[#allocation6 + $0x1c0] sm:$0xff] }
 0x155   :  { %2801 = vmatpush1.bf16.msra.mxu0 %v2800_v20  ;;  %1101 = vmatmul.mubr.f32.vlgmr.msra.gmra.mrb[0].mxu1 %v137_v19  ;;  %v2822_v19 = vpack.c.bf16 %v577_v14, %v573_v13  ;;  %v572_v20 = vld [vmem:[#allocation2 + $0xd80] sm:$0xff] }
 0x156   :  { %3025 = vmatpush1.bf16.msra.mxu1 %v3024_v21  ;;  %2803 = vmatprep.subr.bf16.mxu0 %v2802_v22  ;;  %v576_v21 = vld [vmem:[#allocation2 + $0xda0] sm:$0xff]  ;;  %v574_v22 = vld [vmem:[#allocation2 + $0xd90] sm:$0xff] }
 0x157   :  { %3027 = vmatprep.subr.bf16.mxu1 %v3026_v26  ;;  %887 = vmatprep.mubr.f32.mxu0 %v3873_v42  ;;  %v585_v26 = vld [vmem:[#allocation2 + $0xde8] sm:$0xff]  ;;  %v2824_v29 = vpack.c.bf16 %v576_v21, %v572_v20  ;;  %v3048_v30 = vpack.c.bf16 %v578_v24, %v574_v22  ;;  %v1213_v13 = vld [vmem:[#allocation6 + $0xf8] sm:$0xff]  ;;  %v1212_v21 = vld [vmem:[#allocation6 + $0xf0] sm:$0xff] }
 0x158   :  { %1171 = vmatprep.mubr.f32.mxu1 %v3873_v42  ;;  %v2826_v31 = vpack.c.bf16 %v585_v26, %v581_v25  ;;  %v3194_v20 = vpack.c.bf16 %v1213_v13, %v1209_v12  ;;  %v1215_v22 = vld [vmem:[#allocation6 + $0x108] sm:$0xff]  ;;  %v1217_v24 = vld [vmem:[#allocation6 + $0x118] sm:$0xff]  ;;  %v1246_v13 = vld [vmem:[#allocation6 + $0x200] sm:$0xff] }
 0x159   :  { %2805 = vmatpush1.bf16.msra.mxu0 %v2804_v32  ;;  %v580_v32 = vld [vmem:[#allocation2 + $0xdc0] sm:$0xff] }
 0x15a   :  { %3029 = vmatpush1.bf16.msra.mxu1 %v3028_v33  ;;  %2807 = vmatprep.subr.bf16.mxu0 %v2806_v34  ;;  %v584_v33 = vld [vmem:[#allocation2 + $0xde0] sm:$0xff]  ;;  %v582_v34 = vld [vmem:[#allocation2 + $0xdd0] sm:$0xff] }
 0x15b   :  { %3031 = vmatprep.subr.bf16.mxu1 %v3030_v38  ;;  %v1187_v38 = vld [vmem:[#allocation6 + $0x28] sm:$0xff]  ;;  %v2828_v41 = vpack.c.bf16 %v584_v33, %v580_v32  ;;  %v3052_v42 = vpack.c.bf16 %v586_v36, %v582_v34  ;;  %v1221_v25 = vld [vmem:[#allocation6 + $0x138] sm:$0xff]  ;;  %v1220_v33 = vld [vmem:[#allocation6 + $0x130] sm:$0xff] }
 0x15c   :  { %v3054_v43 = vpack.c.bf16 %v1187_v38, %v1183_v37  ;;  %v3198_v32 = vpack.c.bf16 %v1221_v25, %v1217_v24  ;;  %v1223_v34 = vld [vmem:[#allocation6 + $0x148] sm:$0xff]  ;;  %v1225_v36 = vld [vmem:[#allocation6 + $0x158] sm:$0xff]  ;;  %v1254_v25 = vld [vmem:[#allocation6 + $0x240] sm:$0xff] }
 0x15d   :  { %2809 = vmatpush1.bf16.msra.mxu0 %v2808_v45  ;;  %v1186_v45 = vld [vmem:[#allocation6 + $0x20] sm:$0xff]  ;;  %v1229_v37 = vld [vmem:[#allocation6 + $0x178] sm:$0xff] }
 0x15e   :  { %3033 = vmatpush1.bf16.msra.mxu1 %v3032_v46  ;;  %2811 = vmatprep.subr.bf16.mxu0 %v2810_v47  ;;  %v1184_v46 = vld [vmem:[#allocation6 + $0x10] sm:$0xff]  ;;  %v3182_v47 = vpack.c.bf16 %v1189_v40, %v1185_v39  ;;  %v3056_v54 = vpack.c.bf16 %v1186_v45, %v1182_v44  ;;  %v3202_v44 = vpack.c.bf16 %v1229_v37, %v1225_v36  ;;  %v1262_v37 = vld [vmem:[#allocation6 + $0x280] sm:$0xff] }
 0x15f   :  { %3035 = vmatprep.subr.bf16.mxu1 %v3034_v51  ;;  %v1193_v51 = vld [vmem:[#allocation6 + $0x58] sm:$0xff]  ;;  %v3184_v55 = vpack.c.bf16 %v1188_v48, %v1184_v46  ;;  %v1228_v45 = vld [vmem:[#allocation6 + $0x170] sm:$0xff]  ;;  %v1231_v46 = vld [vmem:[#allocation6 + $0x188] sm:$0xff] }
 0x160   :  { %v3186_v60 = vpack.c.bf16 %v1197_v52, %v1193_v51  ;;  %v1233_v48 = vld [vmem:[#allocation6 + $0x198] sm:$0xff] }
 0x161   :  { %2813 = vmatpush1.bf16.msra.mxu0 %v2812_v57  ;;  %v1190_v57 = vld [vmem:[#allocation6 + $0x40] sm:$0xff] }
 0x162   :  { %3037 = vmatpush1.bf16.msra.mxu1 %v3036_v58  ;;  %2815 = vmatprep.subr.bf16.mxu0 %v2814_v59  ;;  %v1194_v58 = vld [vmem:[#allocation6 + $0x60] sm:$0xff]  ;;  %v1192_v59 = vld [vmem:[#allocation6 + $0x50] sm:$0xff] }
 0x163   :  { %3039 = vmatprep.subr.bf16.mxu1 %v3038_v63  ;;  %v1203_v63 = vld [vmem:[#allocation6 + $0xa8] sm:$0xff]  ;;  %v3060_v2 = vpack.c.bf16 %v1194_v58, %v1190_v57  ;;  %v3188_v3 = vpack.c.bf16 %v1196_v61, %v1192_v59  ;;  %v1236_v57 = vld [vmem:[#allocation6 + $0x1b0] sm:$0xff]  ;;  %v1245_v61 = vld [vmem:[#allocation6 + $0x1f8] sm:$0xff] }
 0x164   :  { %v3062_v4 = vpack.c.bf16 %v1203_v63, %v1199_v62  ;;  %v1239_v58 = vld [vmem:[#allocation6 + $0x1c8] sm:$0xff] }
 0x165   :  { %2817 = vmatpush1.bf16.msra.mxu0 %v2816_v5  ;;  %v1198_v5 = vld [vmem:[#allocation6 + $0x80] sm:$0xff]  ;;  %v1243_v59 = vld [vmem:[#allocation6 + $0x1e8] sm:$0xff] }
 0x166   :  { %3041 = vmatpush1.bf16.msra.mxu1 %v3040_v6  ;;  %2819 = vmatprep.subr.bf16.mxu0 %v2818_v7  ;;  %v1202_v6 = vld [vmem:[#allocation6 + $0xa0] sm:$0xff]  ;;  %v1200_v7 = vld [vmem:[#allocation6 + $0x90] sm:$0xff]  ;;  %v3082_v0 = vpack.c.bf16 %v1243_v59, %v1239_v58 }
 0x167   :  { %3043 = vmatprep.subr.bf16.mxu1 %v3042_v11  ;;  %v1211_v11 = vld [vmem:[#allocation6 + $0xe8] sm:$0xff]  ;;  %v3064_v14 = vpack.c.bf16 %v1202_v6, %v1198_v5  ;;  %v3192_v15 = vpack.c.bf16 %v1204_v9, %v1200_v7  ;;  %v1244_v5 = vld [vmem:[#allocation6 + $0x1f0] sm:$0xff]  ;;  %v1253_v9 = vld [vmem:[#allocation6 + $0x238] sm:$0xff] }
 0x168   :  { %v3066_v16 = vpack.c.bf16 %v1211_v11, %v1207_v10  ;;  %v1247_v6 = vld [vmem:[#allocation6 + $0x208] sm:$0xff] }
 0x169   :  { %2821 = vmatpush1.bf16.msra.mxu0 %v2820_v17  ;;  %v1206_v17 = vld [vmem:[#allocation6 + $0xc0] sm:$0xff]  ;;  %v1251_v7 = vld [vmem:[#allocation6 + $0x228] sm:$0xff] }
 0x16a   :  { %3045 = vmatpush1.bf16.msra.mxu1 %v3044_v18  ;;  %2823 = vmatprep.subr.bf16.mxu0 %v2822_v19  ;;  %v1210_v18 = vld [vmem:[#allocation6 + $0xe0] sm:$0xff]  ;;  %v1208_v19 = vld [vmem:[#allocation6 + $0xd0] sm:$0xff]  ;;  %v3086_v12 = vpack.c.bf16 %v1251_v7, %v1247_v6 }
 0x16b   :  { %3047 = vmatprep.subr.bf16.mxu1 %v3046_v23  ;;  %v1219_v23 = vld [vmem:[#allocation6 + $0x128] sm:$0xff]  ;;  %v3068_v26 = vpack.c.bf16 %v1210_v18, %v1206_v17  ;;  %v3196_v27 = vpack.c.bf16 %v1212_v21, %v1208_v19  ;;  %v1252_v17 = vld [vmem:[#allocation6 + $0x230] sm:$0xff]  ;;  %v1261_v21 = vld [vmem:[#allocation6 + $0x278] sm:$0xff] }
 0x16c   :  { %v3070_v28 = vpack.c.bf16 %v1219_v23, %v1215_v22  ;;  %v1255_v18 = vld [vmem:[#allocation6 + $0x248] sm:$0xff] }
 0x16d   :  { %2825 = vmatpush1.bf16.msra.mxu0 %v2824_v29  ;;  %v1214_v29 = vld [vmem:[#allocation6 + $0x100] sm:$0xff]  ;;  %v1259_v19 = vld [vmem:[#allocation6 + $0x268] sm:$0xff] }
 0x16e   :  { %3049 = vmatpush1.bf16.msra.mxu1 %v3048_v30  ;;  %2827 = vmatprep.subr.bf16.mxu0 %v2826_v31  ;;  %v1218_v30 = vld [vmem:[#allocation6 + $0x120] sm:$0xff]  ;;  %v1216_v31 = vld [vmem:[#allocation6 + $0x110] sm:$0xff]  ;;  %v3090_v24 = vpack.c.bf16 %v1259_v19, %v1255_v18 }
 0x16f   :  { %3051 = vmatprep.subr.bf16.mxu1 %v3050_v35  ;;  %v1227_v35 = vld [vmem:[#allocation6 + $0x168] sm:$0xff]  ;;  %v3072_v38 = vpack.c.bf16 %v1218_v30, %v1214_v29  ;;  %v3200_v39 = vpack.c.bf16 %v1220_v33, %v1216_v31  ;;  %v1260_v29 = vld [vmem:[#allocation6 + $0x270] sm:$0xff]  ;;  %v1269_v33 = vld [vmem:[#allocation6 + $0x2b8] sm:$0xff] }
 0x170   :  { %v3074_v40 = vpack.c.bf16 %v1227_v35, %v1223_v34  ;;  %v1263_v30 = vld [vmem:[#allocation6 + $0x288] sm:$0xff] }
 0x171   :  { %2829 = vmatpush1.bf16.msra.mxu0 %v2828_v41  ;;  %v1222_v41 = vld [vmem:[#allocation6 + $0x140] sm:$0xff]  ;;  %v1267_v31 = vld [vmem:[#allocation6 + $0x2a8] sm:$0xff] }
 0x172   :  { %3053 = vmatpush1.bf16.msra.mxu1 %v3052_v42  ;;  %3055 = vmatprep.subr.bf16.mxu0 %v3054_v43  ;;  %v1226_v42 = vld [vmem:[#allocation6 + $0x160] sm:$0xff]  ;;  %v1224_v43 = vld [vmem:[#allocation6 + $0x150] sm:$0xff]  ;;  %v3094_v36 = vpack.c.bf16 %v1267_v31, %v1263_v30  ;;  %v1305_v30 = vld [vmem:[#allocation6 + $0x3d8] sm:$0xff] }
 0x173   :  { %3183 = vmatprep.subr.bf16.mxu1 %v3182_v47  ;;  %v1235_v47 = vld [vmem:[#allocation6 + $0x1a8] sm:$0xff]  ;;  %v3076_v50 = vpack.c.bf16 %v1226_v42, %v1222_v41  ;;  %v3204_v51 = vpack.c.bf16 %v1228_v45, %v1224_v43  ;;  %v1268_v41 = vld [vmem:[#allocation6 + $0x2b0] sm:$0xff]  ;;  %v1277_v45 = vld [vmem:[#allocation6 + $0x2f8] sm:$0xff] }
 0x174   :  { %888 = vmatmul.mubr.f32.vlgmr.msra.gmra.mrb[0].mxu0 %v139_v53  ;;  %v3078_v52 = vpack.c.bf16 %v1235_v47, %v1231_v46  ;;  %v1271_v42 = vld [vmem:[#allocation6 + $0x2c8] sm:$0xff] }
 0x175   :  { %1172 = vmatmul.mubr.f32.vlgmr.msra.gmra.mrb[0].mxu1 %v139_v53  ;;  %3057 = vmatpush1.bf16.msra.mxu0 %v3056_v54  ;;  %v1230_v53 = vld [vmem:[#allocation6 + $0x180] sm:$0xff]  ;;  %v1275_v43 = vld [vmem:[#allocation6 + $0x2e8] sm:$0xff] }
 0x176   :  { %3185 = vmatpush1.bf16.msra.mxu1 %v3184_v55  ;;  %3059 = vmatprep.subr.bf16.mxu0 %v3058_v56  ;;  %v1234_v54 = vld [vmem:[#allocation6 + $0x1a0] sm:$0xff]  ;;  %v1232_v55 = vld [vmem:[#allocation6 + $0x190] sm:$0xff]  ;;  %v3206_v56 = vpack.c.bf16 %v1237_v49, %v1233_v48  ;;  %v3098_v48 = vpack.c.bf16 %v1275_v43, %v1271_v42  ;;  %v1313_v42 = vld [vmem:[#allocation6 + $0x418] sm:$0xff] }
 0x177   :  { %3187 = vmatprep.subr.bf16.mxu1 %v3186_v60  ;;  %v1241_v60 = vld [vmem:[#allocation6 + $0x1d8] sm:$0xff]  ;;  %v3080_v62 = vpack.c.bf16 %v1234_v54, %v1230_v53  ;;  %v3208_v63 = vpack.c.bf16 %v1236_v57, %v1232_v55  ;;  %v1270_v49 = vld [vmem:[#allocation6 + $0x2c0] sm:$0xff]  ;;  %v1276_v53 = vld [vmem:[#allocation6 + $0x2f0] sm:$0xff] }
 0x178   :  { %v1279_v54 = vld [vmem:[#allocation6 + $0x308] sm:$0xff]  ;;  %v1285_v57 = vld [vmem:[#allocation6 + $0x338] sm:$0xff] }
 0x179   :  { %3061 = vmatpush1.bf16.msra.mxu0 %v3060_v2  ;;  %v1242_v2 = vld [vmem:[#allocation6 + $0x1e0] sm:$0xff]  ;;  %v1283_v55 = vld [vmem:[#allocation6 + $0x328] sm:$0xff] }
 0x17a   :  { %3189 = vmatpush1.bf16.msra.mxu1 %v3188_v3  ;;  %3063 = vmatprep.subr.bf16.mxu0 %v3062_v4  ;;  %v1240_v3 = vld [vmem:[#allocation6 + $0x1d0] sm:$0xff]  ;;  %v3210_v4 = vpack.c.bf16 %v1245_v61, %v1241_v60  ;;  %v3084_v10 = vpack.c.bf16 %v1242_v2, %v1238_v1  ;;  %v3102_v60 = vpack.c.bf16 %v1283_v55, %v1279_v54  ;;  %v1278_v61 = vld [vmem:[#allocation6 + $0x300] sm:$0xff]  ;;  %v1287_v2 = vld [vmem:[#allocation6 + $0x348] sm:$0xff] }
 0x17b   :  { %3191 = vmatprep.subr.bf16.mxu1 %v3190_v8  ;;  %v1249_v8 = vld [vmem:[#allocation6 + $0x218] sm:$0xff]  ;;  %v3212_v11 = vpack.c.bf16 %v1244_v5, %v1240_v3  ;;  %v1284_v1 = vld [vmem:[#allocation6 + $0x330] sm:$0xff]  ;;  %v1291_v3 = vld [vmem:[#allocation6 + $0x368] sm:$0xff] }
 0x17c   :  { %v1293_v5 = vld [vmem:[#allocation6 + $0x378] sm:$0xff] }
 0x17d   :  { %3065 = vmatpush1.bf16.msra.mxu0 %v3064_v14  ;;  %v1250_v14 = vld [vmem:[#allocation6 + $0x220] sm:$0xff] }
 0x17e   :  { %3193 = vmatpush1.bf16.msra.mxu1 %v3192_v15  ;;  %3067 = vmatprep.subr.bf16.mxu0 %v3066_v16  ;;  %v1248_v15 = vld [vmem:[#allocation6 + $0x210] sm:$0xff]  ;;  %v3214_v16 = vpack.c.bf16 %v1253_v9, %v1249_v8  ;;  %v3088_v22 = vpack.c.bf16 %v1250_v14, %v1246_v13  ;;  %v3106_v8 = vpack.c.bf16 %v1291_v3, %v1287_v2  ;;  %v1286_v9 = vld [vmem:[#allocation6 + $0x340] sm:$0xff]  ;;  %v1295_v14 = vld [vmem:[#allocation6 + $0x388] sm:$0xff] }
 0x17f   :  { %3195 = vmatprep.subr.bf16.mxu1 %v3194_v20  ;;  %v1257_v20 = vld [vmem:[#allocation6 + $0x258] sm:$0xff]  ;;  %v3216_v23 = vpack.c.bf16 %v1252_v17, %v1248_v15  ;;  %v1292_v13 = vld [vmem:[#allocation6 + $0x370] sm:$0xff]  ;;  %v1299_v15 = vld [vmem:[#allocation6 + $0x3a8] sm:$0xff] }
 0x180   :  { %v1301_v17 = vld [vmem:[#allocation6 + $0x3b8] sm:$0xff]  ;;  %v1323_v3 = vld [vmem:[#allocation6 + $0x468] sm:$0xff] }
 0x181   :  { %3069 = vmatpush1.bf16.msra.mxu0 %v3068_v26  ;;  %v1258_v26 = vld [vmem:[#allocation6 + $0x260] sm:$0xff] }
 0x182   :  { %3197 = vmatpush1.bf16.msra.mxu1 %v3196_v27  ;;  %3071 = vmatprep.subr.bf16.mxu0 %v3070_v28  ;;  %v1256_v27 = vld [vmem:[#allocation6 + $0x250] sm:$0xff]  ;;  %v3218_v28 = vpack.c.bf16 %v1261_v21, %v1257_v20  ;;  %v3092_v34 = vpack.c.bf16 %v1258_v26, %v1254_v25  ;;  %v3110_v20 = vpack.c.bf16 %v1299_v15, %v1295_v14  ;;  %v1294_v21 = vld [vmem:[#allocation6 + $0x380] sm:$0xff]  ;;  %v1327_v14 = vld [vmem:[#allocation6 + $0x488] sm:$0xff] }
 0x183   :  { %3199 = vmatprep.subr.bf16.mxu1 %v3198_v32  ;;  %v1265_v32 = vld [vmem:[#allocation6 + $0x298] sm:$0xff]  ;;  %v3220_v35 = vpack.c.bf16 %v1260_v29, %v1256_v27  ;;  %v1300_v25 = vld [vmem:[#allocation6 + $0x3b0] sm:$0xff]  ;;  %v1307_v29 = vld [vmem:[#allocation6 + $0x3e8] sm:$0xff] }
 0x185   :  { %3073 = vmatpush1.bf16.msra.mxu0 %v3072_v38  ;;  %v1266_v38 = vld [vmem:[#allocation6 + $0x2a0] sm:$0xff] }
 0x186   :  { %3201 = vmatpush1.bf16.msra.mxu1 %v3200_v39  ;;  %3075 = vmatprep.subr.bf16.mxu0 %v3074_v40  ;;  %v1264_v39 = vld [vmem:[#allocation6 + $0x290] sm:$0xff]  ;;  %v3222_v40 = vpack.c.bf16 %v1269_v33, %v1265_v32  ;;  %v3096_v46 = vpack.c.bf16 %v1266_v38, %v1262_v37  ;;  %v1309_v32 = vld [vmem:[#allocation6 + $0x3f8] sm:$0xff]  ;;  %v1302_v33 = vld [vmem:[#allocation6 + $0x3c0] sm:$0xff] }
 0x187   :  { %3203 = vmatprep.subr.bf16.mxu1 %v3202_v44  ;;  %v1273_v44 = vld [vmem:[#allocation6 + $0x2d8] sm:$0xff]  ;;  %v3224_v47 = vpack.c.bf16 %v1268_v41, %v1264_v39  ;;  %v1304_v37 = vld [vmem:[#allocation6 + $0x3d0] sm:$0xff]  ;;  %v1315_v41 = vld [vmem:[#allocation6 + $0x428] sm:$0xff] }
 0x188   :  { %v1308_v38 = vld [vmem:[#allocation6 + $0x3f0] sm:$0xff] }
 0x189   :  { %3077 = vmatpush1.bf16.msra.mxu0 %v3076_v50  ;;  %v1274_v50 = vld [vmem:[#allocation6 + $0x2e0] sm:$0xff]  ;;  %v3244_v39 = vpack.c.bf16 %v1308_v38, %v1304_v37 }
 0x18a   :  { %3205 = vmatpush1.bf16.msra.mxu1 %v3204_v51  ;;  %3079 = vmatprep.subr.bf16.mxu0 %v3078_v52  ;;  %v1272_v51 = vld [vmem:[#allocation6 + $0x2d0] sm:$0xff]  ;;  %v3226_v52 = vpack.c.bf16 %v1277_v45, %v1273_v44  ;;  %v3100_v58 = vpack.c.bf16 %v1274_v50, %v1270_v49  ;;  %v1317_v44 = vld [vmem:[#allocation6 + $0x438] sm:$0xff] }
 0x18b   :  { %3207 = vmatprep.subr.bf16.mxu1 %v3206_v56  ;;  %v1281_v56 = vld [vmem:[#allocation6 + $0x318] sm:$0xff]  ;;  %v3228_v59 = vpack.c.bf16 %v1276_v53, %v1272_v51  ;;  %v3246_v45 = vpack.c.bf16 %v1317_v44, %v1313_v42  ;;  %v1347_v42 = vld [vmem:[#allocation6 + $0x528] sm:$0xff] }
 0x18c   :  { %v4069_v49 = vld [vmem:[#allocation4] sm:$0xf] }
 0x18d   :  { %3081 = vmatpush1.bf16.msra.mxu0 %v3080_v62  ;;  %v1282_v62 = vld [vmem:[#allocation6 + $0x320] sm:$0xff]  ;;  %v1349_v44 = vld [vmem:[#allocation6 + $0x538] sm:$0xff] }
 0x18e   :  { %3209 = vmatpush1.bf16.msra.mxu1 %v3208_v63  ;;  %3083 = vmatprep.subr.bf16.mxu0 %v3082_v0  ;;  %v1280_v63 = vld [vmem:[#allocation6 + $0x310] sm:$0xff]  ;;  %v3230_v0 = vpack.c.bf16 %v1285_v57, %v1281_v56  ;;  %v3104_v6 = vpack.c.bf16 %v1282_v62, %v1278_v61  ;;  %v1310_v56 = vld [vmem:[#allocation6 + $0x400] sm:$0xff] }
 0x18f   :  { %3211 = vmatprep.subr.bf16.mxu1 %v3210_v4  ;;  %v1289_v4 = vld [vmem:[#allocation6 + $0x358] sm:$0xff]  ;;  %v3232_v7 = vpack.c.bf16 %v1284_v1, %v1280_v63  ;;  %v1312_v61 = vld [vmem:[#allocation6 + $0x410] sm:$0xff]  ;;  %v1319_v1 = vld [vmem:[#allocation6 + $0x448] sm:$0xff] }
 0x190   :  { %v1316_v62 = vld [vmem:[#allocation6 + $0x430] sm:$0xff]  ;;  %v3122_v15 = vpack.c.bf16 %v1323_v3, %v1319_v1  ;;  %v1350_v1 = vld [vmem:[#allocation6 + $0x540] sm:$0xff] }
 0x191   :  { %3085 = vmatpush1.bf16.msra.mxu0 %v3084_v10  ;;  %v1290_v10 = vld [vmem:[#allocation6 + $0x360] sm:$0xff] }
 0x192   :  { %3213 = vmatpush1.bf16.msra.mxu1 %v3212_v11  ;;  %3087 = vmatprep.subr.bf16.mxu0 %v3086_v12  ;;  %v1288_v11 = vld [vmem:[#allocation6 + $0x350] sm:$0xff]  ;;  %v3234_v12 = vpack.c.bf16 %v1293_v5, %v1289_v4  ;;  %v3108_v18 = vpack.c.bf16 %v1290_v10, %v1286_v9  ;;  %v1321_v4 = vld [vmem:[#allocation6 + $0x458] sm:$0xff]  ;;  %v1318_v9 = vld [vmem:[#allocation6 + $0x440] sm:$0xff] }
 0x193   :  { %3215 = vmatprep.subr.bf16.mxu1 %v3214_v16  ;;  %v1297_v16 = vld [vmem:[#allocation6 + $0x398] sm:$0xff]  ;;  %v3236_v19 = vpack.c.bf16 %v1292_v13, %v1288_v11  ;;  %v1322_v10 = vld [vmem:[#allocation6 + $0x460] sm:$0xff]  ;;  %v1324_v13 = vld [vmem:[#allocation6 + $0x470] sm:$0xff] }
 0x194   :  { %v1325_v5 = vld [vmem:[#allocation6 + $0x478] sm:$0xff] }
 0x195   :  { %3089 = vmatpush1.bf16.msra.mxu0 %v3088_v22  ;;  %v1298_v22 = vld [vmem:[#allocation6 + $0x3a0] sm:$0xff] }
 0x196   :  { %3217 = vmatpush1.bf16.msra.mxu1 %v3216_v23  ;;  %3091 = vmatprep.subr.bf16.mxu0 %v3090_v24  ;;  %v3238_v23 = vpack.c.bf16 %v1301_v17, %v1297_v16  ;;  %v1296_v24 = vld [vmem:[#allocation6 + $0x390] sm:$0xff]  ;;  %v3112_v26 = vpack.c.bf16 %v1298_v22, %v1294_v21  ;;  %v3250_v16 = vpack.c.bf16 %v1325_v5, %v1321_v4  ;;  %v1331_v17 = vld [vmem:[#allocation6 + $0x4a8] sm:$0xff] }
 0x197   :  { %3219 = vmatprep.subr.bf16.mxu1 %v3218_v28  ;;  %v3240_v27 = vpack.c.bf16 %v1300_v25, %v1296_v24  ;;  %v1303_v28 = vld [vmem:[#allocation6 + $0x3c8] sm:$0xff]  ;;  %v3124_v21 = vpack.c.bf16 %v1322_v10, %v1318_v9  ;;  %v1330_v24 = vld [vmem:[#allocation6 + $0x4a0] sm:$0xff]  ;;  %v3126_v25 = vpack.c.bf16 %v1331_v17, %v1327_v14  ;;  %v1352_v5 = vld [vmem:[#allocation6 + $0x550] sm:$0xff] }
 0x198   :  { %v3114_v31 = vpack.c.bf16 %v1307_v29, %v1303_v28  ;;  %v1332_v28 = vld [vmem:[#allocation6 + $0x4b0] sm:$0xff]  ;;  %v1335_v29 = vld [vmem:[#allocation6 + $0x4c8] sm:$0xff]  ;;  %v1361_v9 = vld [vmem:[#allocation6 + $0x598] sm:$0xff] }
 0x199   :  { %3093 = vmatpush1.bf16.msra.mxu0 %v3092_v34  ;;  %v1306_v34 = vld [vmem:[#allocation6 + $0x3e0] sm:$0xff]  ;;  %v1365_v10 = vld [vmem:[#allocation6 + $0x5b8] sm:$0xff]  ;;  %v1360_v17 = vld [vmem:[#allocation6 + $0x590] sm:$0xff] }
 0x19a   :  { %3221 = vmatpush1.bf16.msra.mxu1 %v3220_v35  ;;  %3095 = vmatprep.subr.bf16.mxu0 %v3094_v36  ;;  %v3242_v35 = vpack.c.bf16 %v1309_v32, %v1305_v30  ;;  %v3116_v36 = vpack.c.bf16 %v1306_v34, %v1302_v33  ;;  %v1339_v30 = vld [vmem:[#allocation6 + $0x4e8] sm:$0xff]  ;;  %v1341_v32 = vld [vmem:[#allocation6 + $0x4f8] sm:$0xff]  ;;  %v1362_v14 = vld [vmem:[#allocation6 + $0x5a0] sm:$0xff] }
 0x19b   :  { %3223 = vmatprep.subr.bf16.mxu1 %v3222_v40  ;;  %v1311_v40 = vld [vmem:[#allocation6 + $0x408] sm:$0xff]  ;;  %v3130_v37 = vpack.c.bf16 %v1339_v30, %v1335_v29  ;;  %v1368_v29 = vld [vmem:[#allocation6 + $0x5d0] sm:$0xff] }
 0x19c   :  { %v3118_v43 = vpack.c.bf16 %v1315_v41, %v1311_v40  ;;  %v1340_v40 = vld [vmem:[#allocation6 + $0x4f0] sm:$0xff]  ;;  %v1343_v41 = vld [vmem:[#allocation6 + $0x508] sm:$0xff] }
 0x19d   :  { %3097 = vmatpush1.bf16.msra.mxu0 %v3096_v46  ;;  %v590_v46 = vlaneseq  ;;  %v1372_v30 = vld [vmem:[#allocation6 + $0x5f0] sm:$0xff] }
 0x19e   :  { %3225 = vmatpush1.bf16.msra.mxu1 %v3224_v47  ;;  %3099 = vmatprep.subr.bf16.mxu0 %v3098_v48 }
 0x19f   :  { %3227 = vmatprep.subr.bf16.mxu1 %v3226_v52  ;;  %v4064_v47 = vshrl.u32 %v590_v46, 7 }
 0x1a1   :  { %3101 = vmatpush1.bf16.msra.mxu0 %v3100_v58  ;;  %v4067_v48 = vsub.s32 0, %v4064_v47  ;;  %v4072_v50 = vsub.s32 1, %v4064_v47  ;;  %v4075_v51 = vsub.s32 3, %v4064_v47 }
 0x1a2   :  { %3229 = vmatpush1.bf16.msra.mxu1 %v3228_v59  ;;  %3103 = vmatprep.subr.bf16.mxu0 %v3102_v60  ;;  %v1314_v60 = vld [vmem:[#allocation6 + $0x420] sm:$0xff] }
 0x1a3   :  { %3231 = vmatprep.subr.bf16.mxu1 %v3230_v0  ;;  %v593_v52 = vrot.slane %v4069_v49, %v4067_v48  ;;  %v597_v53 = vrot.slane %v4069_v49, %v4072_v50  ;;  %v605_v54 = vrot.slane %v4069_v49, %v4075_v51 }
 0x1a5   :  { %3105 = vmatpush1.bf16.msra.mxu0 %v3104_v6 }
 0x1a6   :  { %3233 = vmatpush1.bf16.msra.mxu1 %v3232_v7  ;;  %3107 = vmatprep.subr.bf16.mxu0 %v3106_v8  ;;  %v3120_v7 = vpack.c.bf16 %v1314_v60, %v1310_v56  ;;  %v3248_v8 = vpack.c.bf16 %v1316_v62, %v1312_v61  ;;  %v1344_v56 = vld [vmem:[#allocation6 + $0x510] sm:$0xff]  ;;  %v1355_v60 = vld [vmem:[#allocation6 + $0x568] sm:$0xff]  ;;  %v1353_v61 = vld [vmem:[#allocation6 + $0x558] sm:$0xff] }
 0x1a7   :  { %3235 = vmatprep.subr.bf16.mxu1 %v3234_v12  ;;  %v1320_v12 = vld [vmem:[#allocation6 + $0x450] sm:$0xff]  ;;  %v1357_v62 = vld [vmem:[#allocation6 + $0x578] sm:$0xff] }
 0x1a8   :  { %v3252_v22 = vpack.c.bf16 %v1324_v13, %v1320_v12  ;;  %v3266_v4 = vpack.c.bf16 %v1357_v62, %v1353_v61  ;;  %v1358_v13 = vld [vmem:[#allocation6 + $0x580] sm:$0xff]  ;;  %v1391_v61 = vld [vmem:[#allocation6 + $0x688] sm:$0xff] }
 0x1a9   :  { %3109 = vmatpush1.bf16.msra.mxu0 %v3108_v18  ;;  %v1329_v18 = vld [vmem:[#allocation6 + $0x498] sm:$0xff]  ;;  %v1395_v62 = vld [vmem:[#allocation6 + $0x6a8] sm:$0xff] }
 0x1aa   :  { %3237 = vmatpush1.bf16.msra.mxu1 %v3236_v19  ;;  %3111 = vmatprep.subr.bf16.mxu0 %v3110_v20  ;;  %v1333_v19 = vld [vmem:[#allocation6 + $0x4b8] sm:$0xff] }
 0x1ab   :  { %3239 = vmatprep.subr.bf16.mxu1 %v3238_v23  ;;  %v1326_v23 = vld [vmem:[#allocation6 + $0x480] sm:$0xff] }
 0x1ac   :  { %v3128_v33 = vpack.c.bf16 %v1330_v24, %v1326_v23  ;;  %v3144_v23 = vpack.c.bf16 %v1362_v14, %v1358_v13 }
 0x1ad   :  { %3113 = vmatpush1.bf16.msra.mxu0 %v3112_v26  ;;  %v3254_v26 = vpack.c.bf16 %v1333_v19, %v1329_v18  ;;  %v1364_v18 = vld [vmem:[#allocation6 + $0x5b0] sm:$0xff]  ;;  %v1367_v19 = vld [vmem:[#allocation6 + $0x5c8] sm:$0xff] }
 0x1ae   :  { %3241 = vmatpush1.bf16.msra.mxu1 %v3240_v27  ;;  %3115 = vmatprep.subr.bf16.mxu0 %v3114_v31  ;;  %v1328_v27 = vld [vmem:[#allocation6 + $0x490] sm:$0xff]  ;;  %v1337_v31 = vld [vmem:[#allocation6 + $0x4d8] sm:$0xff]  ;;  %v3272_v24 = vpack.c.bf16 %v1364_v18, %v1360_v17 }
 0x1af   :  { %3243 = vmatprep.subr.bf16.mxu1 %v3242_v35  ;;  %v3256_v34 = vpack.c.bf16 %v1332_v28, %v1328_v27  ;;  %v1334_v35 = vld [vmem:[#allocation6 + $0x4c0] sm:$0xff]  ;;  %v3258_v38 = vpack.c.bf16 %v1341_v32, %v1337_v31  ;;  %v1375_v31 = vld [vmem:[#allocation6 + $0x608] sm:$0xff] }
 0x1b0   :  { %v1379_v32 = vld [vmem:[#allocation6 + $0x628] sm:$0xff] }
 0x1b1   :  { %3117 = vmatpush1.bf16.msra.mxu0 %v3116_v36  ;;  %v1338_v36 = vld [vmem:[#allocation6 + $0x4e0] sm:$0xff] }
 0x1b2   :  { %3245 = vmatpush1.bf16.msra.mxu1 %v3244_v39  ;;  %3119 = vmatprep.subr.bf16.mxu0 %v3118_v43  ;;  %v1336_v39 = vld [vmem:[#allocation6 + $0x4d0] sm:$0xff]  ;;  %v1345_v43 = vld [vmem:[#allocation6 + $0x518] sm:$0xff] }
 0x1b3   :  { %3247 = vmatprep.subr.bf16.mxu1 %v3246_v45  ;;  %v3132_v45 = vpack.c.bf16 %v1338_v36, %v1334_v35  ;;  %v3260_v46 = vpack.c.bf16 %v1340_v40, %v1336_v39  ;;  %v3276_v36 = vpack.c.bf16 %v1372_v30, %v1368_v29  ;;  %v3150_v39 = vpack.c.bf16 %v1379_v32, %v1375_v31  ;;  %v1408_v31 = vld [vmem:[#allocation6 + $0x710] sm:$0xff] }
 0x1b4   :  { %v1412_v32 = vld [vmem:[#allocation6 + $0x730] sm:$0xff] }
 0x247   :  { %v889_v55 = vpop.f32.mrb[0].mxu0 }
 0x248   :  { %v3630_v57 = vadd.f32 %v889_v55, %v593_v52  ;;  %v4083_v58 = vpop.f32.mrb[0].mxu1  ;;  %v891_v59 = vpop.f32.mrb[1].mxu0  ;;  %v1342_v52 = vld [vmem:[#allocation6 + $0x500] sm:$0xff]  ;;  %v3262_v55 = vpack.c.bf16 %v1349_v44, %v1345_v43  ;;  %v1383_v43 = vld [vmem:[#allocation6 + $0x648] sm:$0xff] }
 0x249   :  { %v3631_v63 = vadd.f32 %v891_v59, %v597_v53  ;;  %v1175_v0 = vpop.f32.mrb[1].mxu1  ;;  %v1346_v53 = vld [vmem:[#allocation6 + $0x520] sm:$0xff]  ;;  %v1351_v59 = vld [vmem:[#allocation6 + $0x548] sm:$0xff] }
 0x24a   :  { %v3633_v2 = vadd.f32 %v1175_v0, %v605_v54  ;;  %v1178_v11 = vmax.f32 %v3630_v57, 0.0  ;;  %v3134_v54 = vpack.c.bf16 %v1347_v42, %v1343_v41  ;;  %v1348_v57 = vld [vmem:[#allocation6 + $0x530] sm:$0xff]  ;;  %v3138_v3 = vpack.c.bf16 %v1355_v60, %v1351_v59  ;;  %v1387_v44 = vld [vmem:[#allocation6 + $0x668] sm:$0xff] }
 0x24b   :  { %v1179_v6 = vmax.f32 %v3631_v63, 0.0  ;;  %v3136_v63 = vpack.c.bf16 %v1346_v53, %v1342_v52  ;;  %v3264_v0 = vpack.c.bf16 %v1348_v57, %v1344_v56  ;;  %v1376_v41 = vld [vmem:[#allocation6 + $0x610] sm:$0xff]  ;;  %v3154_v56 = vpack.c.bf16 %v1387_v44, %v1383_v43 }
 0x24c   :  { %v1181_v20 = vmax.f32 %v3633_v2, 0.0  ;;  %v1354_v2 = vld [vmem:[#allocation6 + $0x560] sm:$0xff]  ;;  %v1380_v42 = vld [vmem:[#allocation6 + $0x630] sm:$0xff] }
 0x24d   :  { %1524 = vmatprep.mubr.f32.mxu0 %v1179_v6  ;;  %1666 = vmatprep.mubr.f32.mxu1 %v1179_v6  ;;  %v1356_v6 = vld [vmem:[#allocation6 + $0x570] sm:$0xff]  ;;  %v3280_v53 = vpack.c.bf16 %v1380_v42, %v1376_v41 }
 0x24e   :  { %1525 = vmatmul.mubr.f32.vlgmr.msra.gmra.mrb[2].mxu0 %v1178_v11  ;;  %1667 = vmatmul.mubr.f32.vlgmr.msra.gmra.mrb[2].mxu1 %v1178_v11  ;;  %v3140_v11 = vpack.c.bf16 %v1354_v2, %v1350_v1  ;;  %v3268_v12 = vpack.c.bf16 %v1356_v6, %v1352_v5  ;;  %v1384_v59 = vld [vmem:[#allocation6 + $0x650] sm:$0xff]  ;;  %v3158_v5 = vpack.c.bf16 %v1395_v62, %v1391_v61 }
 0x24f   :  { %3121 = vmatpush1.bf16.msra.mxu0 %v3120_v7  ;;  %3249 = vmatpush1.bf16.msra.mxu1 %v3248_v8  ;;  %v1359_v7 = vld [vmem:[#allocation6 + $0x588] sm:$0xff]  ;;  %v1388_v60 = vld [vmem:[#allocation6 + $0x670] sm:$0xff] }
 0x250   :  { %1595 = vmatprep.mubr.f32.mxu0 %v1181_v20  ;;  %1737 = vmatprep.mubr.f32.mxu1 %v1181_v20  ;;  %v1363_v8 = vld [vmem:[#allocation6 + $0x5a8] sm:$0xff]  ;;  %v3284_v2 = vpack.c.bf16 %v1388_v60, %v1384_v59  ;;  %v1416_v43 = vld [vmem:[#allocation6 + $0x750] sm:$0xff]  ;;  %v4086_v59 = vsub.s32 2, %v4064_v47 }
 0x251   :  { %3123 = vmatprep.subr.bf16.mxu0 %v3122_v15  ;;  %3251 = vmatprep.subr.bf16.mxu1 %v3250_v16  ;;  %v3142_v15 = vpack.c.bf16 %v1363_v8, %v1359_v7  ;;  %v3270_v16 = vpack.c.bf16 %v1365_v10, %v1361_v9  ;;  %v1371_v20 = vld [vmem:[#allocation6 + $0x5e8] sm:$0xff]  ;;  %v1392_v7 = vld [vmem:[#allocation6 + $0x690] sm:$0xff] }
 0x252   :  { %v3146_v27 = vpack.c.bf16 %v1371_v20, %v1367_v19  ;;  %v1396_v8 = vld [vmem:[#allocation6 + $0x6b0] sm:$0xff]  ;;  %v1399_v9 = vld [vmem:[#allocation6 + $0x6c8] sm:$0xff]  ;;  %v601_v47 = vrot.slane %v4069_v49, %v4086_v59 }
 0x253   :  { %3125 = vmatpush1.bf16.msra.mxu0 %v3124_v21  ;;  %3253 = vmatpush1.bf16.msra.mxu1 %v3252_v22  ;;  %v1369_v21 = vld [vmem:[#allocation6 + $0x5d8] sm:$0xff]  ;;  %v1403_v10 = vld [vmem:[#allocation6 + $0x6e8] sm:$0xff]  ;;  %v3288_v14 = vpack.c.bf16 %v1396_v8, %v1392_v7  ;;  %v1400_v19 = vld [vmem:[#allocation6 + $0x6d0] sm:$0xff] }
 0x254   :  { %3127 = vmatprep.subr.bf16.mxu0 %v3126_v25  ;;  %3255 = vmatprep.subr.bf16.mxu1 %v3254_v26  ;;  %v1373_v22 = vld [vmem:[#allocation6 + $0x5f8] sm:$0xff]  ;;  %v1366_v25 = vld [vmem:[#allocation6 + $0x5c0] sm:$0xff]  ;;  %v3162_v17 = vpack.c.bf16 %v1403_v10, %v1399_v9  ;;  %v1404_v20 = vld [vmem:[#allocation6 + $0x6f0] sm:$0xff] }
 0x255   :  { %v1370_v26 = vld [vmem:[#allocation6 + $0x5e0] sm:$0xff]  ;;  %v3274_v28 = vpack.c.bf16 %v1373_v22, %v1369_v21  ;;  %v1407_v21 = vld [vmem:[#allocation6 + $0x708] sm:$0xff]  ;;  %v1420_v44 = vld [vmem:[#allocation6 + $0x770] sm:$0xff] }
 0x256   :  { %v3148_v35 = vpack.c.bf16 %v1370_v26, %v1366_v25  ;;  %v1411_v22 = vld [vmem:[#allocation6 + $0x728] sm:$0xff]  ;;  %v3292_v26 = vpack.c.bf16 %v1404_v20, %v1400_v19  ;;  %v1424_v62 = vld [vmem:[#allocation6 + $0x790] sm:$0xff]  ;;  %v1434_v7 = vld [vmem:[#allocation6 + $0x7e0] sm:$0xff]  ;;  %v3632_v20 = vadd.f32 %v4083_v58, %v601_v47 }
 0x257   :  { %3129 = vmatpush1.bf16.msra.mxu0 %v3128_v33  ;;  %3257 = vmatpush1.bf16.msra.mxu1 %v3256_v34  ;;  %v1377_v33 = vld [vmem:[#allocation6 + $0x618] sm:$0xff]  ;;  %v3166_v29 = vpack.c.bf16 %v1411_v22, %v1407_v21  ;;  %v1432_v10 = vld [vmem:[#allocation6 + $0x7d0] sm:$0xff]  ;;  %v1752_v19 = vld [vmem:[#allocation9 + $0x20] sm:$0xff] }
 0x258   :  { %3131 = vmatprep.subr.bf16.mxu0 %v3130_v37  ;;  %3259 = vmatprep.subr.bf16.mxu1 %v3258_v38  ;;  %v1381_v34 = vld [vmem:[#allocation6 + $0x638] sm:$0xff]  ;;  %v1374_v37 = vld [vmem:[#allocation6 + $0x600] sm:$0xff] }
 0x259   :  { %v1378_v38 = vld [vmem:[#allocation6 + $0x620] sm:$0xff]  ;;  %v3278_v40 = vpack.c.bf16 %v1381_v34, %v1377_v33  ;;  %v1415_v33 = vld [vmem:[#allocation6 + $0x748] sm:$0xff]  ;;  %v1750_v22 = vld [vmem:[#allocation9 + $0x10] sm:$0xff] }
 0x25a   :  { %v3152_v52 = vpack.c.bf16 %v1378_v38, %v1374_v37  ;;  %v1419_v34 = vld [vmem:[#allocation6 + $0x768] sm:$0xff]  ;;  %v3296_v38 = vpack.c.bf16 %v1412_v32, %v1408_v31  ;;  %v1180_v32 = vmax.f32 %v3632_v20, 0.0 }
 0x25b   :  { %3133 = vmatpush1.bf16.msra.mxu0 %v3132_v45  ;;  %3261 = vmatpush1.bf16.msra.mxu1 %v3260_v46  ;;  %v1385_v45 = vld [vmem:[#allocation6 + $0x658] sm:$0xff]  ;;  %v3170_v41 = vpack.c.bf16 %v1419_v34, %v1415_v33  ;;  %v1760_v31 = vld [vmem:[#allocation9 + $0x60] sm:$0xff] }
 0x25c   :  { %3135 = vmatprep.subr.bf16.mxu0 %v3134_v54  ;;  %3263 = vmatprep.subr.bf16.mxu1 %v3262_v55  ;;  %v1389_v46 = vld [vmem:[#allocation6 + $0x678] sm:$0xff]  ;;  %v1382_v54 = vld [vmem:[#allocation6 + $0x640] sm:$0xff] }
 0x25d   :  { %v1386_v55 = vld [vmem:[#allocation6 + $0x660] sm:$0xff]  ;;  %v3282_v57 = vpack.c.bf16 %v1389_v46, %v1385_v45  ;;  %v1423_v45 = vld [vmem:[#allocation6 + $0x788] sm:$0xff]  ;;  %v1758_v34 = vld [vmem:[#allocation9 + $0x50] sm:$0xff] }
 0x25e   :  { %v3156_v1 = vpack.c.bf16 %v1386_v55, %v1382_v54  ;;  %v1427_v46 = vld [vmem:[#allocation6 + $0x7a8] sm:$0xff]  ;;  %v3300_v55 = vpack.c.bf16 %v1420_v44, %v1416_v43 }
 0x25f   :  { %3137 = vmatpush1.bf16.msra.mxu0 %v3136_v63  ;;  %3265 = vmatpush1.bf16.msra.mxu1 %v3264_v0  ;;  %v1393_v63 = vld [vmem:[#allocation6 + $0x698] sm:$0xff]  ;;  %v3174_v60 = vpack.c.bf16 %v1427_v46, %v1423_v45  ;;  %v1768_v43 = vld [vmem:[#allocation9 + $0xa0] sm:$0xff] }
 0x260   :  { %3139 = vmatprep.subr.bf16.mxu0 %v3138_v3  ;;  %3267 = vmatprep.subr.bf16.mxu1 %v3266_v4  ;;  %v1397_v0 = vld [vmem:[#allocation6 + $0x6b8] sm:$0xff]  ;;  %v1390_v3 = vld [vmem:[#allocation6 + $0x680] sm:$0xff] }
 0x261   :  { %v1394_v4 = vld [vmem:[#allocation6 + $0x6a0] sm:$0xff]  ;;  %v3286_v6 = vpack.c.bf16 %v1397_v0, %v1393_v63  ;;  %v1428_v63 = vld [vmem:[#allocation6 + $0x7b0] sm:$0xff]  ;;  %v1431_v0 = vld [vmem:[#allocation6 + $0x7c8] sm:$0xff] }
 0x262   :  { %v3160_v13 = vpack.c.bf16 %v1394_v4, %v1390_v3  ;;  %v1437_v3 = vld [vmem:[#allocation6 + $0x7f8] sm:$0xff]  ;;  %v1788_v20 = vld [vmem:[#allocation9 + $0x140] sm:$0xff] }
 0x263   :  { %3141 = vmatpush1.bf16.msra.mxu0 %v3140_v11  ;;  %3269 = vmatpush1.bf16.msra.mxu1 %v3268_v12  ;;  %v1401_v11 = vld [vmem:[#allocation6 + $0x6d8] sm:$0xff] }
 0x264   :  { %3143 = vmatprep.subr.bf16.mxu0 %v3142_v15  ;;  %3271 = vmatprep.subr.bf16.mxu1 %v3270_v16  ;;  %v1405_v12 = vld [vmem:[#allocation6 + $0x6f8] sm:$0xff]  ;;  %v1398_v15 = vld [vmem:[#allocation6 + $0x6c0] sm:$0xff] }
 0x265   :  { %v1402_v16 = vld [vmem:[#allocation6 + $0x6e0] sm:$0xff]  ;;  %v3290_v18 = vpack.c.bf16 %v1405_v12, %v1401_v11  ;;  %v1436_v11 = vld [vmem:[#allocation6 + $0x7f0] sm:$0xff] }
 0x266   :  { %v3164_v25 = vpack.c.bf16 %v1402_v16, %v1398_v15  ;;  %v1749_v12 = vld [vmem:[#allocation9 + $0x8] sm:$0xff]  ;;  %v1755_v15 = vld [vmem:[#allocation9 + $0x38] sm:$0xff]  ;;  %v1766_v46 = vld [vmem:[#allocation9 + $0x90] sm:$0xff] }
 0x267   :  { %3145 = vmatpush1.bf16.msra.mxu0 %v3144_v23  ;;  %3273 = vmatpush1.bf16.msra.mxu1 %v3272_v24  ;;  %v1409_v23 = vld [vmem:[#allocation6 + $0x718] sm:$0xff] }
 0x268   :  { %3147 = vmatprep.subr.bf16.mxu0 %v3146_v27  ;;  %3275 = vmatprep.subr.bf16.mxu1 %v3274_v28  ;;  %v1413_v24 = vld [vmem:[#allocation6 + $0x738] sm:$0xff]  ;;  %v1406_v27 = vld [vmem:[#allocation6 + $0x700] sm:$0xff] }
 0x269   :  { %v1410_v28 = vld [vmem:[#allocation6 + $0x720] sm:$0xff]  ;;  %v3294_v30 = vpack.c.bf16 %v1413_v24, %v1409_v23  ;;  %v1754_v23 = vld [vmem:[#allocation9 + $0x30] sm:$0xff]  ;;  %v1757_v24 = vld [vmem:[#allocation9 + $0x48] sm:$0xff] }
 0x26a   :  { %v3168_v37 = vpack.c.bf16 %v1410_v28, %v1406_v27  ;;  %v1763_v27 = vld [vmem:[#allocation9 + $0x78] sm:$0xff] }
 0x26b   :  { %3149 = vmatpush1.bf16.msra.mxu0 %v3148_v35  ;;  %3277 = vmatpush1.bf16.msra.mxu1 %v3276_v36  ;;  %v1417_v35 = vld [vmem:[#allocation6 + $0x758] sm:$0xff] }
 0x26c   :  { %3151 = vmatprep.subr.bf16.mxu0 %v3150_v39  ;;  %3279 = vmatprep.subr.bf16.mxu1 %v3278_v40  ;;  %v1421_v36 = vld [vmem:[#allocation6 + $0x778] sm:$0xff]  ;;  %v1414_v39 = vld [vmem:[#allocation6 + $0x740] sm:$0xff] }
 0x26d   :  { %v1418_v40 = vld [vmem:[#allocation6 + $0x760] sm:$0xff]  ;;  %v3298_v42 = vpack.c.bf16 %v1421_v36, %v1417_v35  ;;  %v1762_v35 = vld [vmem:[#allocation9 + $0x70] sm:$0xff]  ;;  %v1765_v36 = vld [vmem:[#allocation9 + $0x88] sm:$0xff] }
 0x26e   :  { %v3172_v54 = vpack.c.bf16 %v1418_v40, %v1414_v39  ;;  %v1771_v39 = vld [vmem:[#allocation9 + $0xb8] sm:$0xff] }
 0x26f   :  { %3153 = vmatpush1.bf16.msra.mxu0 %v3152_v52  ;;  %3281 = vmatpush1.bf16.msra.mxu1 %v3280_v53  ;;  %v1425_v52 = vld [vmem:[#allocation6 + $0x798] sm:$0xff] }
 0x270   :  { %3155 = vmatprep.subr.bf16.mxu0 %v3154_v56  ;;  %3283 = vmatprep.subr.bf16.mxu1 %v3282_v57  ;;  %v1429_v53 = vld [vmem:[#allocation6 + $0x7b8] sm:$0xff]  ;;  %v1422_v56 = vld [vmem:[#allocation6 + $0x780] sm:$0xff] }
 0x271   :  { %v1426_v57 = vld [vmem:[#allocation6 + $0x7a0] sm:$0xff]  ;;  %v3302_v61 = vpack.c.bf16 %v1429_v53, %v1425_v52  ;;  %v1770_v52 = vld [vmem:[#allocation9 + $0xb0] sm:$0xff]  ;;  %v1773_v53 = vld [vmem:[#allocation9 + $0xc8] sm:$0xff] }
 0x272   :  { %v3176_v4 = vpack.c.bf16 %v1426_v57, %v1422_v56  ;;  %v1779_v56 = vld [vmem:[#allocation9 + $0xf8] sm:$0xff] }
 0x273   :  { %3157 = vmatpush1.bf16.msra.mxu0 %v3156_v1  ;;  %3285 = vmatpush1.bf16.msra.mxu1 %v3284_v2  ;;  %v1435_v1 = vld [vmem:[#allocation6 + $0x7e8] sm:$0xff]  ;;  %v1433_v2 = vld [vmem:[#allocation6 + $0x7d8] sm:$0xff] }
 0x274   :  { %3159 = vmatprep.subr.bf16.mxu0 %v3158_v5  ;;  %3287 = vmatprep.subr.bf16.mxu1 %v3286_v6  ;;  %v3304_v5 = vpack.c.bf16 %v1428_v63, %v1424_v62  ;;  %v1430_v6 = vld [vmem:[#allocation6 + $0x7c0] sm:$0xff]  ;;  %v3178_v8 = vpack.c.bf16 %v1435_v1, %v1431_v0  ;;  %v3306_v9 = vpack.c.bf16 %v1437_v3, %v1433_v2  ;;  %v1774_v1 = vld [vmem:[#allocation9 + $0xd0] sm:$0xff]  ;;  %v1781_v3 = vld [vmem:[#allocation9 + $0x108] sm:$0xff] }
 0x275   :  { %v3180_v16 = vpack.c.bf16 %v1434_v7, %v1430_v6  ;;  %v1776_v62 = vld [vmem:[#allocation9 + $0xe0] sm:$0xff]  ;;  %v1778_v2 = vld [vmem:[#allocation9 + $0xf0] sm:$0xff]  ;;  %v1787_v6 = vld [vmem:[#allocation9 + $0x138] sm:$0xff] }
 0x276   :  { %v3452_v47 = vpack.c.bf16 %v1778_v2, %v1774_v1  ;;  %v1814_v1 = vld [vmem:[#allocation9 + $0x210] sm:$0xff] }
 0x277   :  { %3161 = vmatpush1.bf16.msra.mxu0 %v3160_v13  ;;  %3289 = vmatpush1.bf16.msra.mxu1 %v3288_v14  ;;  %v1753_v13 = vld [vmem:[#allocation9 + $0x28] sm:$0xff]  ;;  %v1751_v14 = vld [vmem:[#allocation9 + $0x18] sm:$0xff]  ;;  %v1818_v2 = vld [vmem:[#allocation9 + $0x230] sm:$0xff] }
 0x278   :  { %3163 = vmatprep.subr.bf16.mxu0 %v3162_v17  ;;  %3291 = vmatprep.subr.bf16.mxu1 %v3290_v18  ;;  %v3308_v17 = vpack.c.bf16 %v1436_v11, %v1432_v10  ;;  %v1748_v18 = vld [vmem:[#allocation9] sm:$0xff]  ;;  %v3310_v49 = vpack.c.bf16 %v1753_v13, %v1749_v12  ;;  %v3438_v21 = vpack.c.bf16 %v1755_v15, %v1751_v14  ;;  %v1782_v12 = vld [vmem:[#allocation9 + $0x110] sm:$0xff]  ;;  %v1789_v14 = vld [vmem:[#allocation9 + $0x148] sm:$0xff] }
 0x279   :  { %v3312_v28 = vpack.c.bf16 %v1752_v19, %v1748_v18  ;;  %v1786_v13 = vld [vmem:[#allocation9 + $0x130] sm:$0xff]  ;;  %v1793_v15 = vld [vmem:[#allocation9 + $0x168] sm:$0xff] }
 0x27a   :  { %v3456_v19 = vpack.c.bf16 %v1786_v13, %v1782_v12  ;;  %v1822_v12 = vld [vmem:[#allocation9 + $0x250] sm:$0xff] }
 0x27b   :  { %3165 = vmatpush1.bf16.msra.mxu0 %v3164_v25  ;;  %3293 = vmatpush1.bf16.msra.mxu1 %v3292_v26  ;;  %v1761_v25 = vld [vmem:[#allocation9 + $0x68] sm:$0xff]  ;;  %v1759_v26 = vld [vmem:[#allocation9 + $0x58] sm:$0xff]  ;;  %v1826_v13 = vld [vmem:[#allocation9 + $0x270] sm:$0xff] }
 0x27c   :  { %3167 = vmatprep.subr.bf16.mxu0 %v3166_v29  ;;  %3295 = vmatprep.subr.bf16.mxu1 %v3294_v30  ;;  %v3440_v29 = vpack.c.bf16 %v1754_v23, %v1750_v22  ;;  %v1756_v30 = vld [vmem:[#allocation9 + $0x40] sm:$0xff]  ;;  %v3314_v58 = vpack.c.bf16 %v1761_v25, %v1757_v24  ;;  %v3442_v33 = vpack.c.bf16 %v1763_v27, %v1759_v26  ;;  %v1790_v23 = vld [vmem:[#allocation9 + $0x150] sm:$0xff]  ;;  %v1797_v25 = vld [vmem:[#allocation9 + $0x188] sm:$0xff] }
 0x27d   :  { %v3316_v40 = vpack.c.bf16 %v1760_v31, %v1756_v30  ;;  %v1794_v24 = vld [vmem:[#allocation9 + $0x170] sm:$0xff]  ;;  %v1801_v26 = vld [vmem:[#allocation9 + $0x1a8] sm:$0xff]  ;;  %v1799_v27 = vld [vmem:[#allocation9 + $0x198] sm:$0xff] }
 0x27e   :  { %v3460_v30 = vpack.c.bf16 %v1794_v24, %v1790_v23  ;;  %v1796_v31 = vld [vmem:[#allocation9 + $0x180] sm:$0xff]  ;;  %v1830_v23 = vld [vmem:[#allocation9 + $0x290] sm:$0xff] }
 0x27f   :  { %3169 = vmatpush1.bf16.msra.mxu0 %v3168_v37  ;;  %3297 = vmatpush1.bf16.msra.mxu1 %v3296_v38  ;;  %v1769_v37 = vld [vmem:[#allocation9 + $0xa8] sm:$0xff]  ;;  %v1767_v38 = vld [vmem:[#allocation9 + $0x98] sm:$0xff]  ;;  %v1834_v24 = vld [vmem:[#allocation9 + $0x2b0] sm:$0xff] }
 0x280   :  { %3171 = vmatprep.subr.bf16.mxu0 %v3170_v41  ;;  %3299 = vmatprep.subr.bf16.mxu1 %v3298_v42  ;;  %v3444_v41 = vpack.c.bf16 %v1762_v35, %v1758_v34  ;;  %v1764_v42 = vld [vmem:[#allocation9 + $0x80] sm:$0xff]  ;;  %v3318_v44 = vpack.c.bf16 %v1769_v37, %v1765_v36  ;;  %v3446_v45 = vpack.c.bf16 %v1771_v39, %v1767_v38  ;;  %v1798_v34 = vld [vmem:[#allocation9 + $0x190] sm:$0xff]  ;;  %v1805_v36 = vld [vmem:[#allocation9 + $0x1c8] sm:$0xff] }
 0x281   :  { %v3320_v57 = vpack.c.bf16 %v1768_v43, %v1764_v42  ;;  %v1802_v35 = vld [vmem:[#allocation9 + $0x1b0] sm:$0xff]  ;;  %v1809_v37 = vld [vmem:[#allocation9 + $0x1e8] sm:$0xff]  ;;  %v1807_v38 = vld [vmem:[#allocation9 + $0x1d8] sm:$0xff] }
 0x282   :  { %v1811_v39 = vld [vmem:[#allocation9 + $0x1f8] sm:$0xff]  ;;  %v1804_v42 = vld [vmem:[#allocation9 + $0x1c0] sm:$0xff] }
 0x283   :  { %3173 = vmatpush1.bf16.msra.mxu0 %v3172_v54  ;;  %3301 = vmatpush1.bf16.msra.mxu1 %v3300_v55  ;;  %v1777_v54 = vld [vmem:[#allocation9 + $0xe8] sm:$0xff]  ;;  %v1775_v55 = vld [vmem:[#allocation9 + $0xd8] sm:$0xff]  ;;  %v1808_v43 = vld [vmem:[#allocation9 + $0x1e0] sm:$0xff] }
 0x284   :  { %3175 = vmatprep.subr.bf16.mxu0 %v3174_v60  ;;  %3303 = vmatprep.subr.bf16.mxu1 %v3302_v61  ;;  %v3448_v60 = vpack.c.bf16 %v1770_v52, %v1766_v46  ;;  %v1772_v61 = vld [vmem:[#allocation9 + $0xc0] sm:$0xff]  ;;  %v3322_v63 = vpack.c.bf16 %v1777_v54, %v1773_v53  ;;  %v3450_v0 = vpack.c.bf16 %v1779_v56, %v1775_v55  ;;  %v1806_v46 = vld [vmem:[#allocation9 + $0x1d0] sm:$0xff]  ;;  %v1813_v53 = vld [vmem:[#allocation9 + $0x208] sm:$0xff] }
 0x285   :  { %v3324_v7 = vpack.c.bf16 %v1776_v62, %v1772_v61  ;;  %v1810_v52 = vld [vmem:[#allocation9 + $0x1f0] sm:$0xff]  ;;  %v1817_v54 = vld [vmem:[#allocation9 + $0x228] sm:$0xff]  ;;  %v1815_v55 = vld [vmem:[#allocation9 + $0x218] sm:$0xff] }
 0x286   :  { %v1819_v56 = vld [vmem:[#allocation9 + $0x238] sm:$0xff]  ;;  %v1812_v61 = vld [vmem:[#allocation9 + $0x200] sm:$0xff] }
 0x287   :  { %3177 = vmatpush1.bf16.msra.mxu0 %v3176_v4  ;;  %3305 = vmatpush1.bf16.msra.mxu1 %v3304_v5  ;;  %v1785_v4 = vld [vmem:[#allocation9 + $0x128] sm:$0xff]  ;;  %v1783_v5 = vld [vmem:[#allocation9 + $0x118] sm:$0xff]  ;;  %v1816_v62 = vld [vmem:[#allocation9 + $0x220] sm:$0xff] }
 0x288   :  { %3179 = vmatprep.subr.bf16.mxu0 %v3178_v8  ;;  %3307 = vmatprep.subr.bf16.mxu1 %v3306_v9  ;;  %v1780_v8 = vld [vmem:[#allocation9 + $0x100] sm:$0xff]  ;;  %v3326_v10 = vpack.c.bf16 %v1785_v4, %v1781_v3  ;;  %v3454_v11 = vpack.c.bf16 %v1787_v6, %v1783_v5  ;;  %v1821_v3 = vld [vmem:[#allocation9 + $0x248] sm:$0xff]  ;;  %v1823_v5 = vld [vmem:[#allocation9 + $0x258] sm:$0xff] }
 0x289   :  { %v1784_v9 = vld [vmem:[#allocation9 + $0x120] sm:$0xff]  ;;  %v1825_v4 = vld [vmem:[#allocation9 + $0x268] sm:$0xff]  ;;  %v1827_v6 = vld [vmem:[#allocation9 + $0x278] sm:$0xff] }
 0x28a   :  { %v3328_v18 = vpack.c.bf16 %v1784_v9, %v1780_v8  ;;  %v1820_v8 = vld [vmem:[#allocation9 + $0x240] sm:$0xff] }
 0x28b   :  { %3181 = vmatpush1.bf16.msra.mxu0 %v3180_v16  ;;  %3309 = vmatpush1.bf16.msra.mxu1 %v3308_v17  ;;  %v1791_v16 = vld [vmem:[#allocation9 + $0x158] sm:$0xff]  ;;  %v1824_v9 = vld [vmem:[#allocation9 + $0x260] sm:$0xff] }
 0x28c   :  { %3311 = vmatprep.subr.bf16.mxu0 %v3310_v49  ;;  %3439 = vmatprep.subr.bf16.mxu1 %v3438_v21  ;;  %v1795_v17 = vld [vmem:[#allocation9 + $0x178] sm:$0xff]  ;;  %v1792_v49 = vld [vmem:[#allocation9 + $0x160] sm:$0xff]  ;;  %v3330_v21 = vpack.c.bf16 %v1793_v15, %v1789_v14  ;;  %v1829_v14 = vld [vmem:[#allocation9 + $0x288] sm:$0xff] }
 0x28d   :  { %v3458_v22 = vpack.c.bf16 %v1795_v17, %v1791_v16  ;;  %v1833_v15 = vld [vmem:[#allocation9 + $0x2a8] sm:$0xff]  ;;  %v1831_v16 = vld [vmem:[#allocation9 + $0x298] sm:$0xff] }
 0x28e   :  { %1596 = vmatmul.mubr.f32.vlgmr.msra.gmra.mrb[2].mxu0 %v1180_v32  ;;  %1738 = vmatmul.mubr.f32.vlgmr.msra.gmra.mrb[2].mxu1 %v1180_v32  ;;  %v1800_v32 = vld [vmem:[#allocation9 + $0x1a0] sm:$0xff]  ;;  %v1835_v17 = vld [vmem:[#allocation9 + $0x2b8] sm:$0xff] }
 0x28f   :  { %3313 = vmatpush1.bf16.msra.mxu0 %v3312_v28  ;;  %3441 = vmatpush1.bf16.msra.mxu1 %v3440_v29  ;;  %v1803_v28 = vld [vmem:[#allocation9 + $0x1b8] sm:$0xff]  ;;  %v3332_v29 = vpack.c.bf16 %v1792_v49, %v1788_v20  ;;  %v1828_v20 = vld [vmem:[#allocation9 + $0x280] sm:$0xff] }
 0x290   :  { %3315 = vmatprep.subr.bf16.mxu0 %v3314_v58  ;;  %3443 = vmatprep.subr.bf16.mxu1 %v3442_v33  ;;  %v3334_v58 = vpack.c.bf16 %v1801_v26, %v1797_v25  ;;  %v3462_v33 = vpack.c.bf16 %v1803_v28, %v1799_v27  ;;  %v1832_v49 = vld [vmem:[#allocation9 + $0x2a0] sm:$0xff]  ;;  %v1837_v25 = vld [vmem:[#allocation9 + $0x2c8] sm:$0xff]  ;;  %v1839_v27 = vld [vmem:[#allocation9 + $0x2d8] sm:$0xff] }
 0x291   :  { %v1841_v26 = vld [vmem:[#allocation9 + $0x2e8] sm:$0xff]  ;;  %v1843_v28 = vld [vmem:[#allocation9 + $0x2f8] sm:$0xff] }
 0x293   :  { %3317 = vmatpush1.bf16.msra.mxu0 %v3316_v40  ;;  %3445 = vmatpush1.bf16.msra.mxu1 %v3444_v41  ;;  %v3336_v40 = vpack.c.bf16 %v1800_v32, %v1796_v31  ;;  %v3464_v41 = vpack.c.bf16 %v1802_v35, %v1798_v34  ;;  %v1836_v31 = vld [vmem:[#allocation9 + $0x2c0] sm:$0xff]  ;;  %v1838_v34 = vld [vmem:[#allocation9 + $0x2d0] sm:$0xff] }
 0x294   :  { %3319 = vmatprep.subr.bf16.mxu0 %v3318_v44  ;;  %3447 = vmatprep.subr.bf16.mxu1 %v3446_v45  ;;  %v3338_v44 = vpack.c.bf16 %v1809_v37, %v1805_v36  ;;  %v3466_v45 = vpack.c.bf16 %v1811_v39, %v1807_v38  ;;  %v1840_v32 = vld [vmem:[#allocation9 + $0x2e0] sm:$0xff]  ;;  %v1842_v35 = vld [vmem:[#allocation9 + $0x2f0] sm:$0xff]  ;;  %v1845_v36 = vld [vmem:[#allocation9 + $0x308] sm:$0xff] }
 0x295   :  { %v1849_v37 = vld [vmem:[#allocation9 + $0x328] sm:$0xff]  ;;  %v1847_v38 = vld [vmem:[#allocation9 + $0x318] sm:$0xff] }
 0x296   :  { %v1851_v39 = vld [vmem:[#allocation9 + $0x338] sm:$0xff] }
 0x297   :  { %3321 = vmatpush1.bf16.msra.mxu0 %v3320_v57  ;;  %3449 = vmatpush1.bf16.msra.mxu1 %v3448_v60  ;;  %v3340_v57 = vpack.c.bf16 %v1808_v43, %v1804_v42  ;;  %v3468_v60 = vpack.c.bf16 %v1810_v52, %v1806_v46  ;;  %v1844_v42 = vld [vmem:[#allocation9 + $0x300] sm:$0xff]  ;;  %v1846_v46 = vld [vmem:[#allocation9 + $0x310] sm:$0xff] }
 0x298   :  { %3323 = vmatprep.subr.bf16.mxu0 %v3322_v63  ;;  %3451 = vmatprep.subr.bf16.mxu1 %v3450_v0  ;;  %v3342_v63 = vpack.c.bf16 %v1817_v54, %v1813_v53  ;;  %v3470_v0 = vpack.c.bf16 %v1819_v56, %v1815_v55  ;;  %v1848_v43 = vld [vmem:[#allocation9 + $0x320] sm:$0xff]  ;;  %v1850_v52 = vld [vmem:[#allocation9 + $0x330] sm:$0xff]  ;;  %v1853_v53 = vld [vmem:[#allocation9 + $0x348] sm:$0xff] }
 0x299   :  { %v1857_v54 = vld [vmem:[#allocation9 + $0x368] sm:$0xff]  ;;  %v1855_v55 = vld [vmem:[#allocation9 + $0x358] sm:$0xff] }
 0x29a   :  { %v1859_v56 = vld [vmem:[#allocation9 + $0x378] sm:$0xff] }
 0x29b   :  { %3325 = vmatpush1.bf16.msra.mxu0 %v3324_v7  ;;  %3453 = vmatpush1.bf16.msra.mxu1 %v3452_v47  ;;  %v3344_v7 = vpack.c.bf16 %v1816_v62, %v1812_v61  ;;  %v3472_v47 = vpack.c.bf16 %v1818_v2, %v1814_v1  ;;  %v1852_v61 = vld [vmem:[#allocation9 + $0x340] sm:$0xff]  ;;  %v1854_v1 = vld [vmem:[#allocation9 + $0x350] sm:$0xff] }
 0x29c   :  { %3327 = vmatprep.subr.bf16.mxu0 %v3326_v10  ;;  %3455 = vmatprep.subr.bf16.mxu1 %v3454_v11  ;;  %v3346_v10 = vpack.c.bf16 %v1825_v4, %v1821_v3  ;;  %v3474_v11 = vpack.c.bf16 %v1827_v6, %v1823_v5  ;;  %v1856_v62 = vld [vmem:[#allocation9 + $0x360] sm:$0xff]  ;;  %v1858_v2 = vld [vmem:[#allocation9 + $0x370] sm:$0xff]  ;;  %v1861_v3 = vld [vmem:[#allocation9 + $0x388] sm:$0xff] }
 0x29d   :  { %v1865_v4 = vld [vmem:[#allocation9 + $0x3a8] sm:$0xff]  ;;  %v1863_v5 = vld [vmem:[#allocation9 + $0x398] sm:$0xff] }
 0x29e   :  { %v1867_v6 = vld [vmem:[#allocation9 + $0x3b8] sm:$0xff] }
 0x29f   :  { %3329 = vmatpush1.bf16.msra.mxu0 %v3328_v18  ;;  %3457 = vmatpush1.bf16.msra.mxu1 %v3456_v19  ;;  %v3348_v18 = vpack.c.bf16 %v1824_v9, %v1820_v8  ;;  %v3476_v19 = vpack.c.bf16 %v1826_v13, %v1822_v12  ;;  %v1860_v8 = vld [vmem:[#allocation9 + $0x380] sm:$0xff]  ;;  %v3366_v9 = vpack.c.bf16 %v1865_v4, %v1861_v3  ;;  %v1862_v12 = vld [vmem:[#allocation9 + $0x390] sm:$0xff] }
 0x2a0   :  { %3331 = vmatprep.subr.bf16.mxu0 %v3330_v21  ;;  %3459 = vmatprep.subr.bf16.mxu1 %v3458_v22  ;;  %v3350_v21 = vpack.c.bf16 %v1833_v15, %v1829_v14  ;;  %v3478_v22 = vpack.c.bf16 %v1835_v17, %v1831_v16  ;;  %v1866_v13 = vld [vmem:[#allocation9 + $0x3b0] sm:$0xff]  ;;  %v1869_v16 = vld [vmem:[#allocation9 + $0x3c8] sm:$0xff] }
 0x2a1   :  { %v3496_v15 = vpack.c.bf16 %v1866_v13, %v1862_v12  ;;  %v1873_v17 = vld [vmem:[#allocation9 + $0x3e8] sm:$0xff] }
 0x2a3   :  { %3333 = vmatpush1.bf16.msra.mxu0 %v3332_v29  ;;  %3461 = vmatpush1.bf16.msra.mxu1 %v3460_v30  ;;  %v3352_v29 = vpack.c.bf16 %v1832_v49, %v1828_v20  ;;  %v3480_v30 = vpack.c.bf16 %v1834_v24, %v1830_v23  ;;  %v1875_v20 = vld [vmem:[#allocation9 + $0x3f8] sm:$0xff]  ;;  %v1868_v49 = vld [vmem:[#allocation9 + $0x3c0] sm:$0xff]  ;;  %v1870_v24 = vld [vmem:[#allocation9 + $0x3d0] sm:$0xff] }
 0x2a4   :  { %3335 = vmatprep.subr.bf16.mxu0 %v3334_v58  ;;  %3463 = vmatprep.subr.bf16.mxu1 %v3462_v33  ;;  %v3354_v58 = vpack.c.bf16 %v1841_v26, %v1837_v25  ;;  %v3482_v33 = vpack.c.bf16 %v1843_v28, %v1839_v27  ;;  %v1874_v25 = vld [vmem:[#allocation9 + $0x3f0] sm:$0xff]  ;;  %v1877_v27 = vld [vmem:[#allocation9 + $0x408] sm:$0xff] }
 0x2a5   :  { %v3500_v26 = vpack.c.bf16 %v1874_v25, %v1870_v24  ;;  %v1881_v28 = vld [vmem:[#allocation9 + $0x428] sm:$0xff]  ;;  %v1902_v25 = vld [vmem:[#allocation9 + $0x4d0] sm:$0xff] }
 0x2a7   :  { %3337 = vmatpush1.bf16.msra.mxu0 %v3336_v40  ;;  %3465 = vmatpush1.bf16.msra.mxu1 %v3464_v41  ;;  %v3356_v40 = vpack.c.bf16 %v1840_v32, %v1836_v31  ;;  %v3484_v41 = vpack.c.bf16 %v1842_v35, %v1838_v34  ;;  %v1883_v31 = vld [vmem:[#allocation9 + $0x438] sm:$0xff] }
 0x2a8   :  { %3339 = vmatprep.subr.bf16.mxu0 %v3338_v44  ;;  %3467 = vmatprep.subr.bf16.mxu1 %v3466_v45  ;;  %v3358_v44 = vpack.c.bf16 %v1849_v37, %v1845_v36  ;;  %v3486_v45 = vpack.c.bf16 %v1851_v39, %v1847_v38  ;;  %v1876_v38 = vld [vmem:[#allocation9 + $0x400] sm:$0xff] }
 0x2ab   :  { %3341 = vmatpush1.bf16.msra.mxu0 %v3340_v57  ;;  %3469 = vmatpush1.bf16.msra.mxu1 %v3468_v60  ;;  %v3360_v57 = vpack.c.bf16 %v1848_v43, %v1844_v42  ;;  %v3488_v60 = vpack.c.bf16 %v1850_v52, %v1846_v46  ;;  %v1880_v42 = vld [vmem:[#allocation9 + $0x420] sm:$0xff]  ;;  %v1878_v43 = vld [vmem:[#allocation9 + $0x410] sm:$0xff]  ;;  %v1885_v46 = vld [vmem:[#allocation9 + $0x448] sm:$0xff] }
 0x2ac   :  { %3343 = vmatprep.subr.bf16.mxu0 %v3342_v63  ;;  %3471 = vmatprep.subr.bf16.mxu1 %v3470_v0  ;;  %v3362_v63 = vpack.c.bf16 %v1857_v54, %v1853_v53  ;;  %v3490_v0 = vpack.c.bf16 %v1859_v56, %v1855_v55  ;;  %v1889_v53 = vld [vmem:[#allocation9 + $0x468] sm:$0xff]  ;;  %v1887_v54 = vld [vmem:[#allocation9 + $0x458] sm:$0xff] }
 0x2ad   :  { %v1891_v55 = vld [vmem:[#allocation9 + $0x478] sm:$0xff]  ;;  %v3378_v3 = vpack.c.bf16 %v1889_v53, %v1885_v46  ;;  %v1916_v46 = vld [vmem:[#allocation9 + $0x540] sm:$0xff] }
 0x2ae   :  { %v3506_v4 = vpack.c.bf16 %v1891_v55, %v1887_v54  ;;  %v1918_v55 = vld [vmem:[#allocation9 + $0x550] sm:$0xff] }
 0x2af   :  { %3345 = vmatpush1.bf16.msra.mxu0 %v3344_v7  ;;  %3473 = vmatpush1.bf16.msra.mxu1 %v3472_v47  ;;  %v3364_v7 = vpack.c.bf16 %v1856_v62, %v1852_v61  ;;  %v3492_v47 = vpack.c.bf16 %v1858_v2, %v1854_v1  ;;  %v1884_v61 = vld [vmem:[#allocation9 + $0x440] sm:$0xff]  ;;  %v1890_v1 = vld [vmem:[#allocation9 + $0x470] sm:$0xff]  ;;  %v1893_v2 = vld [vmem:[#allocation9 + $0x488] sm:$0xff] }
 0x2b0   :  { %3347 = vmatprep.subr.bf16.mxu0 %v3346_v10  ;;  %3475 = vmatprep.subr.bf16.mxu1 %v3474_v11  ;;  %v3494_v10 = vpack.c.bf16 %v1867_v6, %v1863_v5  ;;  %v1864_v11 = vld [vmem:[#allocation9 + $0x3a0] sm:$0xff]  ;;  %v1897_v5 = vld [vmem:[#allocation9 + $0x4a8] sm:$0xff]  ;;  %v1895_v6 = vld [vmem:[#allocation9 + $0x498] sm:$0xff] }
 0x2b1   :  { %v3368_v14 = vpack.c.bf16 %v1864_v11, %v1860_v8  ;;  %v1888_v62 = vld [vmem:[#allocation9 + $0x460] sm:$0xff]  ;;  %v3382_v12 = vpack.c.bf16 %v1897_v5, %v1893_v2  ;;  %v1926_v5 = vld [vmem:[#allocation9 + $0x590] sm:$0xff] }
 0x2b2   :  { %v3380_v8 = vpack.c.bf16 %v1888_v62, %v1884_v61  ;;  %v1896_v11 = vld [vmem:[#allocation9 + $0x4a0] sm:$0xff]  ;;  %v1927_v61 = vld [vmem:[#allocation9 + $0x598] sm:$0xff] }
 0x2b3   :  { %3349 = vmatpush1.bf16.msra.mxu0 %v3348_v18  ;;  %3477 = vmatpush1.bf16.msra.mxu1 %v3476_v19  ;;  %v1871_v18 = vld [vmem:[#allocation9 + $0x3d8] sm:$0xff]  ;;  %v3370_v19 = vpack.c.bf16 %v1873_v17, %v1869_v16  ;;  %v1901_v16 = vld [vmem:[#allocation9 + $0x4c8] sm:$0xff]  ;;  %v1928_v2 = vld [vmem:[#allocation9 + $0x5a0] sm:$0xff] }
 0x2b4   :  { %3351 = vmatprep.subr.bf16.mxu0 %v3350_v21  ;;  %3479 = vmatprep.subr.bf16.mxu1 %v3478_v22  ;;  %v1872_v21 = vld [vmem:[#allocation9 + $0x3e0] sm:$0xff]  ;;  %v3498_v22 = vpack.c.bf16 %v1875_v20, %v1871_v18  ;;  %v1905_v17 = vld [vmem:[#allocation9 + $0x4e8] sm:$0xff]  ;;  %v1903_v18 = vld [vmem:[#allocation9 + $0x4d8] sm:$0xff] }
 0x2b5   :  { %v3372_v23 = vpack.c.bf16 %v1872_v21, %v1868_v49  ;;  %v1900_v21 = vld [vmem:[#allocation9 + $0x4c0] sm:$0xff]  ;;  %v1931_v62 = vld [vmem:[#allocation9 + $0x5b8] sm:$0xff] }
 0x2b7   :  { %3353 = vmatpush1.bf16.msra.mxu0 %v3352_v29  ;;  %3481 = vmatpush1.bf16.msra.mxu1 %v3480_v30  ;;  %v1879_v29 = vld [vmem:[#allocation9 + $0x418] sm:$0xff]  ;;  %v3374_v30 = vpack.c.bf16 %v1881_v28, %v1877_v27  ;;  %v1909_v27 = vld [vmem:[#allocation9 + $0x508] sm:$0xff] }
 0x2b8   :  { %3355 = vmatprep.subr.bf16.mxu0 %v3354_v58  ;;  %3483 = vmatprep.subr.bf16.mxu1 %v3482_v33  ;;  %v3502_v32 = vpack.c.bf16 %v1883_v31, %v1879_v29  ;;  %v4091_v58 = vld [vmem:[#allocation7] sm:$0xf]  ;;  %v1913_v28 = vld [vmem:[#allocation9 + $0x528] sm:$0xff] }
 0x2b9   :  { %v1443_v33 = vrot.slane %v4091_v58, %v4067_v48  ;;  %v1447_v34 = vrot.slane %v4091_v58, %v4072_v50  ;;  %v1455_v35 = vrot.slane %v4091_v58, %v4075_v51  ;;  %v1911_v29 = vld [vmem:[#allocation9 + $0x518] sm:$0xff] }
 0x2bb   :  { %3357 = vmatpush1.bf16.msra.mxu0 %v3356_v40  ;;  %3485 = vmatpush1.bf16.msra.mxu1 %v3484_v41 }
 0x2bc   :  { %3359 = vmatprep.subr.bf16.mxu0 %v3358_v44  ;;  %3487 = vmatprep.subr.bf16.mxu1 %v3486_v45  ;;  %v1882_v44 = vld [vmem:[#allocation9 + $0x430] sm:$0xff] }
 0x2bf   :  { %3361 = vmatpush1.bf16.msra.mxu0 %v3360_v57  ;;  %3489 = vmatpush1.bf16.msra.mxu1 %v3488_v60  ;;  %v3376_v57 = vpack.c.bf16 %v1880_v42, %v1876_v38  ;;  %v3504_v60 = vpack.c.bf16 %v1882_v44, %v1878_v43  ;;  %v1910_v38 = vld [vmem:[#allocation9 + $0x510] sm:$0xff]  ;;  %v1919_v42 = vld [vmem:[#allocation9 + $0x558] sm:$0xff] }
 0x2c0   :  { %3363 = vmatprep.subr.bf16.mxu0 %v3362_v63  ;;  %3491 = vmatprep.subr.bf16.mxu1 %v3490_v0  ;;  %v1886_v0 = vld [vmem:[#allocation9 + $0x450] sm:$0xff]  ;;  %v1923_v43 = vld [vmem:[#allocation9 + $0x578] sm:$0xff] }
 0x2c1   :  { %v3522_v54 = vpack.c.bf16 %v1923_v43, %v1919_v42  ;;  %v1957_v42 = vld [vmem:[#allocation9 + $0x688] sm:$0xff] }
 0x2c2   :  { %v1961_v43 = vld [vmem:[#allocation9 + $0x6a8] sm:$0xff] }
 0x2c3   :  { %3365 = vmatpush1.bf16.msra.mxu0 %v3364_v7  ;;  %3493 = vmatpush1.bf16.msra.mxu1 %v3492_v47  ;;  %v1899_v7 = vld [vmem:[#allocation9 + $0x4b8] sm:$0xff] }
 0x2c4   :  { %3367 = vmatprep.subr.bf16.mxu0 %v3366_v9  ;;  %3495 = vmatprep.subr.bf16.mxu1 %v3494_v10  ;;  %v3508_v9 = vpack.c.bf16 %v1890_v1, %v1886_v0  ;;  %v1892_v10 = vld [vmem:[#allocation9 + $0x480] sm:$0xff]  ;;  %v3510_v13 = vpack.c.bf16 %v1899_v7, %v1895_v6  ;;  %v1930_v6 = vld [vmem:[#allocation9 + $0x5b0] sm:$0xff]  ;;  %v1933_v7 = vld [vmem:[#allocation9 + $0x5c8] sm:$0xff] }
 0x2c5   :  { %v3384_v20 = vpack.c.bf16 %v1896_v11, %v1892_v10  ;;  %v1924_v1 = vld [vmem:[#allocation9 + $0x580] sm:$0xff]  ;;  %v3528_v11 = vpack.c.bf16 %v1930_v6, %v1926_v5 }
 0x2c6   :  { %v3400_v10 = vpack.c.bf16 %v1928_v2, %v1924_v1 }
 0x2c7   :  { %3369 = vmatpush1.bf16.msra.mxu0 %v3368_v14  ;;  %3497 = vmatpush1.bf16.msra.mxu1 %v3496_v15  ;;  %v1894_v14 = vld [vmem:[#allocation9 + $0x490] sm:$0xff] }
 0x2c8   :  { %3371 = vmatprep.subr.bf16.mxu0 %v3370_v19  ;;  %3499 = vmatprep.subr.bf16.mxu1 %v3498_v22  ;;  %v1898_v15 = vld [vmem:[#allocation9 + $0x4b0] sm:$0xff]  ;;  %v1907_v19 = vld [vmem:[#allocation9 + $0x4f8] sm:$0xff]  ;;  %v1904_v22 = vld [vmem:[#allocation9 + $0x4e0] sm:$0xff] }
 0x2c9   :  { %v3512_v49 = vpack.c.bf16 %v1898_v15, %v1894_v14  ;;  %v3514_v24 = vpack.c.bf16 %v1907_v19, %v1903_v18  ;;  %v3388_v31 = vpack.c.bf16 %v1904_v22, %v1900_v21  ;;  %v1941_v18 = vld [vmem:[#allocation9 + $0x608] sm:$0xff] }
 0x2ca   :  { %v1945_v19 = vld [vmem:[#allocation9 + $0x628] sm:$0xff] }
 0x2cb   :  { %3373 = vmatpush1.bf16.msra.mxu0 %v3372_v23  ;;  %3501 = vmatpush1.bf16.msra.mxu1 %v3500_v26  ;;  %v3386_v23 = vpack.c.bf16 %v1905_v17, %v1901_v16  ;;  %v1906_v26 = vld [vmem:[#allocation9 + $0x4f0] sm:$0xff] }
 0x2cc   :  { %3375 = vmatprep.subr.bf16.mxu0 %v3374_v30  ;;  %3503 = vmatprep.subr.bf16.mxu1 %v3502_v32  ;;  %v1915_v30 = vld [vmem:[#allocation9 + $0x538] sm:$0xff]  ;;  %v3516_v32 = vpack.c.bf16 %v1906_v26, %v1902_v25  ;;  %v1934_v16 = vld [vmem:[#allocation9 + $0x5d0] sm:$0xff]  ;;  %v3406_v25 = vpack.c.bf16 %v1945_v19, %v1941_v18 }
 0x2cd   :  { %v1938_v17 = vld [vmem:[#allocation9 + $0x5f0] sm:$0xff] }
 0x2ce   :  { %v3532_v22 = vpack.c.bf16 %v1938_v17, %v1934_v16  ;;  %v1974_v18 = vld [vmem:[#allocation9 + $0x710] sm:$0xff] }
 0x2cf   :  { %v1978_v19 = vld [vmem:[#allocation9 + $0x730] sm:$0xff] }
 0x361   :  { %v1597_v36 = vpop.f32.mrb[2].mxu0  ;;  %v4099_v37 = vpop.f32.mrb[2].mxu1 }
 0x362   :  { %v3634_v39 = vadd.f32 %v1597_v36, %v1443_v33  ;;  %v1599_v40 = vpop.f32.mrb[3].mxu0  ;;  %v1741_v41 = vpop.f32.mrb[3].mxu1  ;;  %v1908_v33 = vld [vmem:[#allocation9 + $0x500] sm:$0xff]  ;;  %v3518_v36 = vpack.c.bf16 %v1915_v30, %v1911_v29  ;;  %v1949_v29 = vld [vmem:[#allocation9 + $0x648] sm:$0xff] }
 0x363   :  { %v3635_v45 = vadd.f32 %v1599_v40, %v1447_v34  ;;  %v3637_v52 = vadd.f32 %v1741_v41, %v1455_v35  ;;  %v1912_v34 = vld [vmem:[#allocation9 + $0x520] sm:$0xff]  ;;  %v3390_v35 = vpack.c.bf16 %v1913_v28, %v1909_v27  ;;  %v1917_v40 = vld [vmem:[#allocation9 + $0x548] sm:$0xff]  ;;  %v1942_v27 = vld [vmem:[#allocation9 + $0x610] sm:$0xff] }
 0x364   :  { %v1744_v63 = vmax.f32 %v3634_v39, 0.0  ;;  %v1914_v39 = vld [vmem:[#allocation9 + $0x530] sm:$0xff]  ;;  %v1921_v41 = vld [vmem:[#allocation9 + $0x568] sm:$0xff]  ;;  %v3392_v44 = vpack.c.bf16 %v1912_v34, %v1908_v33 }
 0x365   :  { %v1745_v56 = vmax.f32 %v3635_v45, 0.0  ;;  %v1747_v47 = vmax.f32 %v3637_v52, 0.0  ;;  %v3520_v45 = vpack.c.bf16 %v1914_v39, %v1910_v38  ;;  %v1920_v52 = vld [vmem:[#allocation9 + $0x560] sm:$0xff]  ;;  %v3394_v53 = vpack.c.bf16 %v1921_v41, %v1917_v40  ;;  %v1946_v28 = vld [vmem:[#allocation9 + $0x630] sm:$0xff]  ;;  %v1953_v30 = vld [vmem:[#allocation9 + $0x668] sm:$0xff] }
 0x366   :  { %v3536_v34 = vpack.c.bf16 %v1946_v28, %v1942_v27  ;;  %v3410_v38 = vpack.c.bf16 %v1953_v30, %v1949_v29  ;;  %v1950_v40 = vld [vmem:[#allocation9 + $0x650] sm:$0xff] }
 0x367   :  { %2090 = vmatprep.mubr.f32.mxu0 %v1745_v56  ;;  %2232 = vmatprep.mubr.f32.mxu1 %v1745_v56  ;;  %v1922_v56 = vld [vmem:[#allocation9 + $0x570] sm:$0xff] }
 0x368   :  { %2091 = vmatmul.mubr.f32.vlgmr.msra.gmra.mrb[4].mxu0 %v1744_v63  ;;  %2233 = vmatmul.mubr.f32.vlgmr.msra.gmra.mrb[4].mxu1 %v1744_v63  ;;  %v3396_v63 = vpack.c.bf16 %v1920_v52, %v1916_v46  ;;  %v3524_v0 = vpack.c.bf16 %v1922_v56, %v1918_v55  ;;  %v1954_v41 = vld [vmem:[#allocation9 + $0x670] sm:$0xff]  ;;  %v3414_v55 = vpack.c.bf16 %v1961_v43, %v1957_v42 }
 0x369   :  { %3377 = vmatpush1.bf16.msra.mxu0 %v3376_v57  ;;  %3505 = vmatpush1.bf16.msra.mxu1 %v3504_v60  ;;  %v1925_v57 = vld [vmem:[#allocation9 + $0x588] sm:$0xff]  ;;  %v3540_v52 = vpack.c.bf16 %v1954_v41, %v1950_v40  ;;  %v1982_v29 = vld [vmem:[#allocation9 + $0x750] sm:$0xff] }
 0x36a   :  { %2161 = vmatprep.mubr.f32.mxu0 %v1747_v47  ;;  %2303 = vmatprep.mubr.f32.mxu1 %v1747_v47  ;;  %v1929_v60 = vld [vmem:[#allocation9 + $0x5a8] sm:$0xff]  ;;  %v1986_v30 = vld [vmem:[#allocation9 + $0x770] sm:$0xff] }
 0x36b   :  { %3379 = vmatprep.subr.bf16.mxu0 %v3378_v3  ;;  %3507 = vmatprep.subr.bf16.mxu1 %v3506_v4  ;;  %v3398_v3 = vpack.c.bf16 %v1929_v60, %v1925_v57  ;;  %v3526_v4 = vpack.c.bf16 %v1931_v62, %v1927_v61  ;;  %v1937_v47 = vld [vmem:[#allocation9 + $0x5e8] sm:$0xff]  ;;  %v1958_v57 = vld [vmem:[#allocation9 + $0x690] sm:$0xff] }
 0x36c   :  { %v3402_v14 = vpack.c.bf16 %v1937_v47, %v1933_v7  ;;  %v1962_v60 = vld [vmem:[#allocation9 + $0x6b0] sm:$0xff]  ;;  %v1965_v61 = vld [vmem:[#allocation9 + $0x6c8] sm:$0xff] }
 0x36d   :  { %3381 = vmatpush1.bf16.msra.mxu0 %v3380_v8  ;;  %3509 = vmatpush1.bf16.msra.mxu1 %v3508_v9  ;;  %v1935_v8 = vld [vmem:[#allocation9 + $0x5d8] sm:$0xff]  ;;  %v1969_v62 = vld [vmem:[#allocation9 + $0x6e8] sm:$0xff]  ;;  %v3544_v2 = vpack.c.bf16 %v1962_v60, %v1958_v57  ;;  %v1966_v7 = vld [vmem:[#allocation9 + $0x6d0] sm:$0xff]  ;;  %v1451_v57 = vrot.slane %v4091_v58, %v4086_v59 }
 0x36e   :  { %3383 = vmatprep.subr.bf16.mxu0 %v3382_v12  ;;  %3511 = vmatprep.subr.bf16.mxu1 %v3510_v13  ;;  %v1939_v9 = vld [vmem:[#allocation9 + $0x5f8] sm:$0xff]  ;;  %v1932_v12 = vld [vmem:[#allocation9 + $0x5c0] sm:$0xff]  ;;  %v3418_v5 = vpack.c.bf16 %v1969_v62, %v1965_v61  ;;  %v1970_v47 = vld [vmem:[#allocation9 + $0x6f0] sm:$0xff] }
 0x36f   :  { %v1936_v13 = vld [vmem:[#allocation9 + $0x5e0] sm:$0xff]  ;;  %v3530_v15 = vpack.c.bf16 %v1939_v9, %v1935_v8  ;;  %v1973_v8 = vld [vmem:[#allocation9 + $0x708] sm:$0xff]  ;;  %v1990_v42 = vld [vmem:[#allocation9 + $0x790] sm:$0xff] }
 0x370   :  { %v3404_v21 = vpack.c.bf16 %v1936_v13, %v1932_v12  ;;  %v1977_v9 = vld [vmem:[#allocation9 + $0x728] sm:$0xff]  ;;  %v3548_v13 = vpack.c.bf16 %v1970_v47, %v1966_v7  ;;  %v1994_v43 = vld [vmem:[#allocation9 + $0x7b0] sm:$0xff]  ;;  %v3636_v47 = vadd.f32 %v4099_v37, %v1451_v57 }
 0x371   :  { %3385 = vmatpush1.bf16.msra.mxu0 %v3384_v20  ;;  %3513 = vmatpush1.bf16.msra.mxu1 %v3512_v49  ;;  %v1943_v20 = vld [vmem:[#allocation9 + $0x618] sm:$0xff]  ;;  %v3422_v16 = vpack.c.bf16 %v1977_v9, %v1973_v8  ;;  %v1998_v62 = vld [vmem:[#allocation9 + $0x7d0] sm:$0xff]  ;;  %v2346_v9 = vld [vmem:[#allocation12 + $0x100] sm:$0xff] }
 0x372   :  { %3387 = vmatprep.subr.bf16.mxu0 %v3386_v23  ;;  %3515 = vmatprep.subr.bf16.mxu1 %v3514_v24  ;;  %v1947_v49 = vld [vmem:[#allocation9 + $0x638] sm:$0xff]  ;;  %v1940_v23 = vld [vmem:[#allocation9 + $0x600] sm:$0xff]  ;;  %v2315_v7 = vld [vmem:[#allocation12 + $0x8] sm:$0xff] }
 0x373   :  { %v1944_v24 = vld [vmem:[#allocation9 + $0x620] sm:$0xff]  ;;  %v3534_v26 = vpack.c.bf16 %v1947_v49, %v1943_v20  ;;  %v1981_v20 = vld [vmem:[#allocation9 + $0x748] sm:$0xff] }
 0x374   :  { %v3408_v33 = vpack.c.bf16 %v1944_v24, %v1940_v23  ;;  %v1985_v49 = vld [vmem:[#allocation9 + $0x768] sm:$0xff]  ;;  %v3552_v24 = vpack.c.bf16 %v1978_v19, %v1974_v18  ;;  %v2317_v18 = vld [vmem:[#allocation12 + $0x18] sm:$0xff]  ;;  %v1746_v19 = vmax.f32 %v3636_v47, 0.0  ;;  %v2324_v47 = vld [vmem:[#allocation12 + $0x50] sm:$0xff] }
 0x375   :  { %3389 = vmatpush1.bf16.msra.mxu0 %v3388_v31  ;;  %3517 = vmatpush1.bf16.msra.mxu1 %v3516_v32  ;;  %v1951_v31 = vld [vmem:[#allocation9 + $0x658] sm:$0xff]  ;;  %v3426_v27 = vpack.c.bf16 %v1985_v49, %v1981_v20 }
 0x376   :  { %3391 = vmatprep.subr.bf16.mxu0 %v3390_v35  ;;  %3519 = vmatprep.subr.bf16.mxu1 %v3518_v36  ;;  %v1955_v32 = vld [vmem:[#allocation9 + $0x678] sm:$0xff]  ;;  %v1948_v35 = vld [vmem:[#allocation9 + $0x640] sm:$0xff] }
 0x377   :  { %v1952_v36 = vld [vmem:[#allocation9 + $0x660] sm:$0xff]  ;;  %v3538_v39 = vpack.c.bf16 %v1955_v32, %v1951_v31  ;;  %v1989_v31 = vld [vmem:[#allocation9 + $0x788] sm:$0xff]  ;;  %v2348_v49 = vld [vmem:[#allocation12 + $0x110] sm:$0xff] }
 0x378   :  { %v3412_v46 = vpack.c.bf16 %v1952_v36, %v1948_v35  ;;  %v1993_v32 = vld [vmem:[#allocation9 + $0x7a8] sm:$0xff]  ;;  %v3556_v36 = vpack.c.bf16 %v1986_v30, %v1982_v29 }
 0x379   :  { %3393 = vmatpush1.bf16.msra.mxu0 %v3392_v44  ;;  %3521 = vmatpush1.bf16.msra.mxu1 %v3520_v45  ;;  %v1959_v44 = vld [vmem:[#allocation9 + $0x698] sm:$0xff]  ;;  %v3430_v40 = vpack.c.bf16 %v1993_v32, %v1989_v31  ;;  %v2319_v29 = vld [vmem:[#allocation12 + $0x28] sm:$0xff]  ;;  %v2350_v32 = vld [vmem:[#allocation12 + $0x120] sm:$0xff] }
 0x37a   :  { %3395 = vmatprep.subr.bf16.mxu0 %v3394_v53  ;;  %3523 = vmatprep.subr.bf16.mxu1 %v3522_v54  ;;  %v1963_v45 = vld [vmem:[#allocation9 + $0x6b8] sm:$0xff]  ;;  %v1956_v53 = vld [vmem:[#allocation9 + $0x680] sm:$0xff] }
 0x37b   :  { %v1960_v54 = vld [vmem:[#allocation9 + $0x6a0] sm:$0xff]  ;;  %v3542_v56 = vpack.c.bf16 %v1963_v45, %v1959_v44  ;;  %v1997_v44 = vld [vmem:[#allocation9 + $0x7c8] sm:$0xff] }
 0x37c   :  { %v3416_v1 = vpack.c.bf16 %v1960_v54, %v1956_v53  ;;  %v2001_v45 = vld [vmem:[#allocation9 + $0x7e8] sm:$0xff]  ;;  %v3560_v54 = vpack.c.bf16 %v1994_v43, %v1990_v42  ;;  %v2321_v42 = vld [vmem:[#allocation12 + $0x38] sm:$0xff] }
 0x37d   :  { %3397 = vmatpush1.bf16.msra.mxu0 %v3396_v63  ;;  %3525 = vmatpush1.bf16.msra.mxu1 %v3524_v0  ;;  %v1967_v63 = vld [vmem:[#allocation9 + $0x6d8] sm:$0xff]  ;;  %v3434_v60 = vpack.c.bf16 %v2001_v45, %v1997_v44 }
 0x37e   :  { %3399 = vmatprep.subr.bf16.mxu0 %v3398_v3  ;;  %3527 = vmatprep.subr.bf16.mxu1 %v3526_v4  ;;  %v1971_v0 = vld [vmem:[#allocation9 + $0x6f8] sm:$0xff]  ;;  %v1964_v3 = vld [vmem:[#allocation9 + $0x6c0] sm:$0xff] }
 0x37f   :  { %v1968_v4 = vld [vmem:[#allocation9 + $0x6e0] sm:$0xff]  ;;  %v3546_v6 = vpack.c.bf16 %v1971_v0, %v1967_v63  ;;  %v2002_v63 = vld [vmem:[#allocation9 + $0x7f0] sm:$0xff] }
 0x380   :  { %v3420_v12 = vpack.c.bf16 %v1968_v4, %v1964_v3  ;;  %v2330_v0 = vld [vmem:[#allocation12 + $0x80] sm:$0xff]  ;;  %v2363_v3 = vld [vmem:[#allocation12 + $0x188] sm:$0xff]  ;;  %v2352_v45 = vld [vmem:[#allocation12 + $0x130] sm:$0xff] }
 0x381   :  { %3401 = vmatpush1.bf16.msra.mxu0 %v3400_v10  ;;  %3529 = vmatpush1.bf16.msra.mxu1 %v3528_v11  ;;  %v1975_v10 = vld [vmem:[#allocation9 + $0x718] sm:$0xff] }
 0x382   :  { %3403 = vmatprep.subr.bf16.mxu0 %v3402_v14  ;;  %3531 = vmatprep.subr.bf16.mxu1 %v3530_v15  ;;  %v1979_v11 = vld [vmem:[#allocation9 + $0x738] sm:$0xff]  ;;  %v1972_v14 = vld [vmem:[#allocation9 + $0x700] sm:$0xff] }
 0x383   :  { %v1976_v15 = vld [vmem:[#allocation9 + $0x720] sm:$0xff]  ;;  %v3550_v17 = vpack.c.bf16 %v1979_v11, %v1975_v10  ;;  %v2347_v10 = vld [vmem:[#allocation12 + $0x108] sm:$0xff]  ;;  %v2332_v11 = vld [vmem:[#allocation12 + $0x90] sm:$0xff] }
 0x384   :  { %v3424_v23 = vpack.c.bf16 %v1976_v15, %v1972_v14  ;;  %v2365_v14 = vld [vmem:[#allocation12 + $0x198] sm:$0xff] }
 0x385   :  { %3405 = vmatpush1.bf16.msra.mxu0 %v3404_v21  ;;  %3533 = vmatpush1.bf16.msra.mxu1 %v3532_v22  ;;  %v1983_v21 = vld [vmem:[#allocation9 + $0x758] sm:$0xff] }
 0x386   :  { %3407 = vmatprep.subr.bf16.mxu0 %v3406_v25  ;;  %3535 = vmatprep.subr.bf16.mxu1 %v3534_v26  ;;  %v1987_v22 = vld [vmem:[#allocation9 + $0x778] sm:$0xff]  ;;  %v1980_v25 = vld [vmem:[#allocation9 + $0x740] sm:$0xff] }
 0x387   :  { %v1984_v26 = vld [vmem:[#allocation9 + $0x760] sm:$0xff]  ;;  %v3554_v28 = vpack.c.bf16 %v1987_v22, %v1983_v21 }
 0x388   :  { %v3428_v35 = vpack.c.bf16 %v1984_v26, %v1980_v25  ;;  %v2349_v21 = vld [vmem:[#allocation12 + $0x118] sm:$0xff]  ;;  %v2334_v22 = vld [vmem:[#allocation12 + $0xa0] sm:$0xff]  ;;  %v2367_v25 = vld [vmem:[#allocation12 + $0x1a8] sm:$0xff] }
 0x389   :  { %3409 = vmatpush1.bf16.msra.mxu0 %v3408_v33  ;;  %3537 = vmatpush1.bf16.msra.mxu1 %v3536_v34  ;;  %v1991_v33 = vld [vmem:[#allocation9 + $0x798] sm:$0xff] }
 0x38a   :  { %3411 = vmatprep.subr.bf16.mxu0 %v3410_v38  ;;  %3539 = vmatprep.subr.bf16.mxu1 %v3538_v39  ;;  %v1995_v34 = vld [vmem:[#allocation9 + $0x7b8] sm:$0xff]  ;;  %v1988_v38 = vld [vmem:[#allocation9 + $0x780] sm:$0xff] }
 0x38b   :  { %v1992_v39 = vld [vmem:[#allocation9 + $0x7a0] sm:$0xff]  ;;  %v3558_v41 = vpack.c.bf16 %v1995_v34, %v1991_v33  ;;  %v2351_v33 = vld [vmem:[#allocation12 + $0x128] sm:$0xff]  ;;  %v2336_v34 = vld [vmem:[#allocation12 + $0xb0] sm:$0xff] }
 0x38c   :  { %v3432_v53 = vpack.c.bf16 %v1992_v39, %v1988_v38  ;;  %v2369_v38 = vld [vmem:[#allocation12 + $0x1b8] sm:$0xff] }
 0x38d   :  { %3413 = vmatpush1.bf16.msra.mxu0 %v3412_v46  ;;  %3541 = vmatpush1.bf16.msra.mxu1 %v3540_v52  ;;  %v1999_v46 = vld [vmem:[#allocation9 + $0x7d8] sm:$0xff] }
 0x38e   :  { %3415 = vmatprep.subr.bf16.mxu0 %v3414_v55  ;;  %3543 = vmatprep.subr.bf16.mxu1 %v3542_v56  ;;  %v2003_v52 = vld [vmem:[#allocation9 + $0x7f8] sm:$0xff]  ;;  %v1996_v55 = vld [vmem:[#allocation9 + $0x7c0] sm:$0xff] }
 0x38f   :  { %v2000_v56 = vld [vmem:[#allocation9 + $0x7e0] sm:$0xff]  ;;  %v3562_v61 = vpack.c.bf16 %v2003_v52, %v1999_v46 }
 0x390   :  { %v3436_v4 = vpack.c.bf16 %v2000_v56, %v1996_v55  ;;  %v2353_v46 = vld [vmem:[#allocation12 + $0x138] sm:$0xff]  ;;  %v2338_v52 = vld [vmem:[#allocation12 + $0xc0] sm:$0xff]  ;;  %v2371_v55 = vld [vmem:[#allocation12 + $0x1c8] sm:$0xff] }
 0x391   :  { %3417 = vmatpush1.bf16.msra.mxu0 %v3416_v1  ;;  %3545 = vmatpush1.bf16.msra.mxu1 %v3544_v2  ;;  %v2331_v1 = vld [vmem:[#allocation12 + $0x88] sm:$0xff]  ;;  %v2362_v2 = vld [vmem:[#allocation12 + $0x180] sm:$0xff]  ;;  %v3612_v57 = vpack.c.bf16 %v2353_v46, %v2352_v45 }
 0x392   :  { %3419 = vmatprep.subr.bf16.mxu0 %v3418_v5  ;;  %3547 = vmatprep.subr.bf16.mxu1 %v3546_v6  ;;  %v3564_v5 = vpack.c.bf16 %v2002_v63, %v1998_v62  ;;  %v2314_v6 = vld [vmem:[#allocation12] sm:$0xff]  ;;  %v3566_v58 = vpack.c.bf16 %v2331_v1, %v2330_v0  ;;  %v3598_v8 = vpack.c.bf16 %v2363_v3, %v2362_v2  ;;  %v2355_v1 = vld [vmem:[#allocation12 + $0x148] sm:$0xff]  ;;  %v2340_v2 = vld [vmem:[#allocation12 + $0xd0] sm:$0xff] }
 0x393   :  { %v3568_v15 = vpack.c.bf16 %v2315_v7, %v2314_v6  ;;  %v2354_v0 = vld [vmem:[#allocation12 + $0x140] sm:$0xff]  ;;  %v2341_v3 = vld [vmem:[#allocation12 + $0xd8] sm:$0xff] }
 0x394   :  { %v3616_v7 = vpack.c.bf16 %v2355_v1, %v2354_v0 }
 0x395   :  { %3421 = vmatpush1.bf16.msra.mxu0 %v3420_v12  ;;  %3549 = vmatpush1.bf16.msra.mxu1 %v3548_v13  ;;  %v2333_v12 = vld [vmem:[#allocation12 + $0x98] sm:$0xff]  ;;  %v2364_v13 = vld [vmem:[#allocation12 + $0x190] sm:$0xff] }
 0x396   :  { %3423 = vmatprep.subr.bf16.mxu0 %v3422_v16  ;;  %3551 = vmatprep.subr.bf16.mxu1 %v3550_v17  ;;  %v3600_v16 = vpack.c.bf16 %v2347_v10, %v2346_v9  ;;  %v2316_v17 = vld [vmem:[#allocation12 + $0x10] sm:$0xff]  ;;  %v3570_v37 = vpack.c.bf16 %v2333_v12, %v2332_v11  ;;  %v3602_v20 = vpack.c.bf16 %v2365_v14, %v2364_v13  ;;  %v2357_v11 = vld [vmem:[#allocation12 + $0x158] sm:$0xff]  ;;  %v2342_v12 = vld [vmem:[#allocation12 + $0xe0] sm:$0xff] }
 0x397   :  { %v3572_v26 = vpack.c.bf16 %v2317_v18, %v2316_v17  ;;  %v2356_v10 = vld [vmem:[#allocation12 + $0x150] sm:$0xff]  ;;  %v2343_v13 = vld [vmem:[#allocation12 + $0xe8] sm:$0xff]  ;;  %v2374_v14 = vld [vmem:[#allocation12 + $0x1e0] sm:$0xff] }
 0x398   :  { %v3620_v17 = vpack.c.bf16 %v2357_v11, %v2356_v10  ;;  %v3590_v18 = vpack.c.bf16 %v2343_v13, %v2342_v12 }
 0x399   :  { %3425 = vmatpush1.bf16.msra.mxu0 %v3424_v23  ;;  %3553 = vmatpush1.bf16.msra.mxu1 %v3552_v24  ;;  %v2335_v23 = vld [vmem:[#allocation12 + $0xa8] sm:$0xff]  ;;  %v2366_v24 = vld [vmem:[#allocation12 + $0x1a0] sm:$0xff] }
 0x39a   :  { %3427 = vmatprep.subr.bf16.mxu0 %v3426_v27  ;;  %3555 = vmatprep.subr.bf16.mxu1 %v3554_v28  ;;  %v3604_v27 = vpack.c.bf16 %v2349_v21, %v2348_v49  ;;  %v2318_v28 = vld [vmem:[#allocation12 + $0x20] sm:$0xff]  ;;  %v3574_v30 = vpack.c.bf16 %v2335_v23, %v2334_v22  ;;  %v3606_v31 = vpack.c.bf16 %v2367_v25, %v2366_v24  ;;  %v2359_v22 = vld [vmem:[#allocation12 + $0x168] sm:$0xff]  ;;  %v2344_v24 = vld [vmem:[#allocation12 + $0xf0] sm:$0xff] }
 0x39b   :  { %v3576_v39 = vpack.c.bf16 %v2319_v29, %v2318_v28  ;;  %v2358_v49 = vld [vmem:[#allocation12 + $0x160] sm:$0xff]  ;;  %v2345_v25 = vld [vmem:[#allocation12 + $0xf8] sm:$0xff]  ;;  %v2328_v29 = vld [vmem:[#allocation12 + $0x70] sm:$0xff] }
 0x39c   :  { %v3624_v23 = vpack.c.bf16 %v2359_v22, %v2358_v49  ;;  %v2377_v28 = vld [vmem:[#allocation12 + $0x1f8] sm:$0xff] }
 0x39d   :  { %3429 = vmatpush1.bf16.msra.mxu0 %v3428_v35  ;;  %3557 = vmatpush1.bf16.msra.mxu1 %v3556_v36  ;;  %v2337_v35 = vld [vmem:[#allocation12 + $0xb8] sm:$0xff]  ;;  %v2368_v36 = vld [vmem:[#allocation12 + $0x1b0] sm:$0xff] }
 0x39e   :  { %3431 = vmatprep.subr.bf16.mxu0 %v3430_v40  ;;  %3559 = vmatprep.subr.bf16.mxu1 %v3558_v41  ;;  %v3608_v40 = vpack.c.bf16 %v2351_v33, %v2350_v32  ;;  %v2320_v41 = vld [vmem:[#allocation12 + $0x30] sm:$0xff]  ;;  %v3578_v43 = vpack.c.bf16 %v2337_v35, %v2336_v34  ;;  %v3610_v44 = vpack.c.bf16 %v2369_v38, %v2368_v36  ;;  %v2361_v34 = vld [vmem:[#allocation12 + $0x178] sm:$0xff] }
 0x39f   :  { %v3580_v56 = vpack.c.bf16 %v2321_v42, %v2320_v41  ;;  %v2360_v33 = vld [vmem:[#allocation12 + $0x170] sm:$0xff]  ;;  %v2004_v36 = vld [vmem:[#allocation10] sm:$0xf] }
 0x3a0   :  { %v3628_v35 = vpack.c.bf16 %v2361_v34, %v2360_v33  ;;  %v2009_v38 = vrot.slane %v2004_v36, %v4067_v48  ;;  %v2021_v41 = vrot.slane %v2004_v36, %v4075_v51 }
 0x3a1   :  { %3433 = vmatpush1.bf16.msra.mxu0 %v3432_v53  ;;  %3561 = vmatpush1.bf16.msra.mxu1 %v3560_v54  ;;  %v2339_v53 = vld [vmem:[#allocation12 + $0xc8] sm:$0xff]  ;;  %v2370_v54 = vld [vmem:[#allocation12 + $0x1c0] sm:$0xff] }
 0x3a2   :  { %3435 = vmatprep.subr.bf16.mxu0 %v3434_v60  ;;  %3563 = vmatprep.subr.bf16.mxu1 %v3562_v61  ;;  %v2322_v60 = vld [vmem:[#allocation12 + $0x40] sm:$0xff]  ;;  %v2323_v61 = vld [vmem:[#allocation12 + $0x48] sm:$0xff]  ;;  %v3582_v62 = vpack.c.bf16 %v2339_v53, %v2338_v52  ;;  %v3614_v63 = vpack.c.bf16 %v2371_v55, %v2370_v54 }
 0x3a3   :  { %v3584_v6 = vpack.c.bf16 %v2323_v61, %v2322_v60 }
 0x3a5   :  { %3437 = vmatpush1.bf16.msra.mxu0 %v3436_v4  ;;  %3565 = vmatpush1.bf16.msra.mxu1 %v3564_v5  ;;  %v2372_v4 = vld [vmem:[#allocation12 + $0x1d0] sm:$0xff]  ;;  %v2373_v5 = vld [vmem:[#allocation12 + $0x1d8] sm:$0xff] }
 0x3a6   :  { %3567 = vmatprep.subr.bf16.mxu0 %v3566_v58  ;;  %3599 = vmatprep.subr.bf16.mxu1 %v3598_v8  ;;  %v2325_v58 = vld [vmem:[#allocation12 + $0x58] sm:$0xff]  ;;  %v3586_v8 = vpack.c.bf16 %v2341_v3, %v2340_v2  ;;  %v3618_v9 = vpack.c.bf16 %v2373_v5, %v2372_v4 }
 0x3a8   :  { %2162 = vmatmul.mubr.f32.vlgmr.msra.gmra.mrb[4].mxu0 %v1746_v19  ;;  %2304 = vmatmul.mubr.f32.vlgmr.msra.gmra.mrb[4].mxu1 %v1746_v19 }
 0x3a9   :  { %3569 = vmatpush3.bf16.msra.mxu0 %v3568_v15  ;;  %3601 = vmatpush3.bf16.msra.mxu1 %v3600_v16  ;;  %v2375_v15 = vld [vmem:[#allocation12 + $0x1e8] sm:$0xff]  ;;  %v3588_v16 = vpack.c.bf16 %v2325_v58, %v2324_v47 }
 0x3aa   :  { %3571 = vmatprep.subr.bf16.mxu0 %v3570_v37  ;;  %3603 = vmatprep.subr.bf16.mxu1 %v3602_v20  ;;  %v3622_v19 = vpack.c.bf16 %v2375_v15, %v2374_v14  ;;  %v2326_v37 = vld [vmem:[#allocation12 + $0x60] sm:$0xff]  ;;  %v2327_v20 = vld [vmem:[#allocation12 + $0x68] sm:$0xff] }
 0x3ab   :  { %v3592_v21 = vpack.c.bf16 %v2327_v20, %v2326_v37 }
 0x3ad   :  { %3573 = vmatpush3.bf16.msra.mxu0 %v3572_v26  ;;  %3605 = vmatpush3.bf16.msra.mxu1 %v3604_v27  ;;  %v2376_v26 = vld [vmem:[#allocation12 + $0x1f0] sm:$0xff]  ;;  %v3594_v27 = vpack.c.bf16 %v2345_v25, %v2344_v24 }
 0x3ae   :  { %3575 = vmatprep.subr.bf16.mxu0 %v3574_v30  ;;  %3607 = vmatprep.subr.bf16.mxu1 %v3606_v31  ;;  %v2329_v30 = vld [vmem:[#allocation12 + $0x78] sm:$0xff]  ;;  %v3626_v31 = vpack.c.bf16 %v2377_v28, %v2376_v26 }
 0x3af   :  { %v3596_v32 = vpack.c.bf16 %v2329_v30, %v2328_v29 }
 0x3b1   :  { %3577 = vmatpush3.bf16.msra.mxu0 %v3576_v39  ;;  %3609 = vmatpush3.bf16.msra.mxu1 %v3608_v40  ;;  %v2017_v39 = vrot.slane %v2004_v36, %v4086_v59  ;;  %v2013_v40 = vrot.slane %v2004_v36, %v4072_v50  ;;  %v2535_v59 = vld [vmem:[#allocation13] ss:$0 sm:$0xff] }
 0x3b2   :  { %3579 = vmatprep.subr.bf16.mxu0 %v3578_v43  ;;  %3611 = vmatprep.subr.bf16.mxu1 %v3610_v44 }
 0x3b5   :  { %3581 = vmatpush3.bf16.msra.mxu0 %v3580_v56  ;;  %3613 = vmatpush3.bf16.msra.mxu1 %v3612_v57 }
 0x3b6   :  { %3583 = vmatprep.subr.bf16.mxu0 %v3582_v62  ;;  %3615 = vmatprep.subr.bf16.mxu1 %v3614_v63 }
 0x3b9   :  { %3585 = vmatpush3.bf16.msra.mxu0 %v3584_v6  ;;  %3617 = vmatpush3.bf16.msra.mxu1 %v3616_v7 }
 0x3ba   :  { %3587 = vmatprep.subr.bf16.mxu0 %v3586_v8  ;;  %3619 = vmatprep.subr.bf16.mxu1 %v3618_v9 }
 0x3bd   :  { %3589 = vmatpush3.bf16.msra.mxu0 %v3588_v16  ;;  %3621 = vmatpush3.bf16.msra.mxu1 %v3620_v17 }
 0x3be   :  { %3591 = vmatprep.subr.bf16.mxu0 %v3590_v18  ;;  %3623 = vmatprep.subr.bf16.mxu1 %v3622_v19 }
 0x3c1   :  { %3593 = vmatpush3.bf16.msra.mxu0 %v3592_v21  ;;  %3625 = vmatpush3.bf16.msra.mxu1 %v3624_v23 }
 0x3c2   :  { %3595 = vmatprep.subr.bf16.mxu0 %v3594_v27  ;;  %3627 = vmatprep.subr.bf16.mxu1 %v3626_v31 }
 0x3c5   :  { %3597 = vmatpush3.bf16.msra.mxu0 %v3596_v32  ;;  %3629 = vmatpush3.bf16.msra.mxu1 %v3628_v35 }
 0x47b   :  { %v2163_v42 = vpop.f32.mrb[4].mxu0  ;;  %v2305_v43 = vpop.f32.mrb[4].mxu1 }
 0x47c   :  { %v3638_v44 = vadd.f32 %v2163_v42, %v2009_v38  ;;  %v3640_v45 = vadd.f32 %v2305_v43, %v2017_v39  ;;  %v2165_v46 = vpop.f32.mrb[5].mxu0  ;;  %v2307_v52 = vpop.f32.mrb[5].mxu1 }
 0x47d   :  { %v3639_v53 = vadd.f32 %v2165_v46, %v2013_v40  ;;  %v3641_v54 = vadd.f32 %v2307_v52, %v2021_v41 }
 0x47e   :  { %v2310_v57 = vmax.f32 %v3638_v44, 0.0  ;;  %v2312_v60 = vmax.f32 %v3640_v45, 0.0 }
 0x47f   :  { %v2311_v55 = vmax.f32 %v3639_v53, 0.0  ;;  %v2313_v56 = vmax.f32 %v3641_v54, 0.0 }
 0x481   :  { %2449 = vmatprep.mubr.f32.mxu0 %v2311_v55  ;;  %2519 = vmatprep.mubr.f32.mxu1 %v2313_v56 }
 0x482   :  { %2450 = vmatmul.mubr.f32.vlgmr.msra.gmra.mrb[6].mxu0 %v2310_v57  ;;  %2520 = vmatmul.mubr.f32.vlgmr.msra.gmra.mrb[6].mxu1 %v2312_v60 }
 0x555   :  { %v2568_v48 = vpop.f32.mrb[6].mxu0  ;;  %v2603_v50 = vpop.f32.mrb[6].mxu1 }
 0x556   :  { %v2569_v51 = vpop.f32.mrb[7].mxu0  ;;  %v2604_v61 = vpop.f32.mrb[7].mxu1 }
 0x557   :  { %v2570_v62 = vadd.f32 %v2569_v51, %v2568_v48  ;;  %v2605_v63 = vadd.f32 %v2604_v61, %v2603_v50 }
 0x559   :  { %v2452_v0 = vadd.f32 %v2570_v62, %v2535_v59 }
 0x55b   :  { %v2522_v1 = vadd.f32 %v2605_v63, %v2452_v0 }
 0x55d   :  { %2525 = vst [vmem:[%s4120_s9] sm:$0xff] %v2522_v1 }
 0x55e   :  { %2530 = vsyncpa [#allocation3], 1 }
 0x55f   :  { %2531 = vsyncpa [#allocation5], 1 }
 0x560   :  { %2532 = vsyncpa [#allocation8], 1 }
 0x561   :  { %2533 = vsyncpa [#allocation11], 1 }
 0x562   :  { %2534 = vsyncpa [#allocation14], 1 }

</bundles_post_ra>
